<compile_context>
chip_gen: v7x
topology: tpu7x:2x2x1
jax: 0.10.0
libtpu: 0.0.40
codegen_flags: <defaults>
</compile_context>

<pallas_src>
import functools

import jax
import jax.numpy as jnp
from jax import lax
from jax.experimental import pallas as pl
from jax.experimental.pallas import tpu as pltpu

BATCH_BLOCK = 8          # sublane-aligned batch tile per grid step
LANE = 128               # TPU lane width


def _round_up(x, m):
    return ((x + m - 1) // m) * m


# ----------------------------------------------------------------------------
# Pallas kernel
# ----------------------------------------------------------------------------
def rnn_classifier_kernel(emb_ref, len_ref,
                          w_ih_f_ref, w_hh_f_ref, bx_f_ref, bhn_f_ref,
                          w_ih_b_ref, w_hh_b_ref, bx_b_ref, bhn_b_ref,
                          fc_w_f_ref, fc_w_b_ref, fc_b_ref,
                          out_ref,
                          xproj_f_ref, xproj_b_ref):
    T, TB, H = emb_ref.shape          # H = lane-padded hidden size
    H3 = 3 * H

    # ---- hoisted input projections: one large MXU matmul per direction -----
    # (T*TB, H) @ (H, 3H); input-side + recurrent r/z biases already folded.
    x_all = emb_ref[...].reshape(T * TB, H)
    xproj_f_ref[...] = (
        jnp.dot(x_all, w_ih_f_ref[...], preferred_element_type=jnp.float32)
        + bx_f_ref[...]).reshape(T, TB, H3)
    xproj_b_ref[...] = (
        jnp.dot(x_all, w_ih_b_ref[...], preferred_element_type=jnp.float32)
        + bx_b_ref[...]).reshape(T, TB, H3)

    lens = len_ref[...]               # (TB, 1) int32, valid length per row
    w_hh_f = w_hh_f_ref[...]          # (H, 3H) bf16
    w_hh_b = w_hh_b_ref[...]
    b_hn_f = bhn_f_ref[...]           # (1, H) f32
    b_hn_b = bhn_b_ref[...]

    def gru_cell(h, xp, w_hh, b_hn, m):
        # single fused (TB,H)@(H,3H) MXU push for all three gates
        hh = jnp.dot(h.astype(w_hh.dtype), w_hh,
                     preferred_element_type=jnp.float32)        # (TB, 3H) f32
        r = jax.nn.sigmoid(xp[:, 0:H] + hh[:, 0:H])
        z = jax.nn.sigmoid(xp[:, H:2 * H] + hh[:, H:2 * H])
        n = jnp.tanh(xp[:, 2 * H:] + r * (hh[:, 2 * H:] + b_hn))
        h_new = (1.0 - z) * n + z * h
        # packed-sequence emulation: freeze h outside the valid range
        return m * h_new + (1.0 - m) * h

    def step(i, carry):
        h_f, h_b = carry
        t_b = T - 1 - i
        m_f = (i < lens).astype(jnp.float32)      # (TB, 1)
        m_b = (t_b < lens).astype(jnp.float32)
        # forward/backward chains are independent -> interleave so their
        # MXU / EUP latencies overlap within one iteration.
        h_f = gru_cell(h_f, xproj_f_ref[i], w_hh_f, b_hn_f, m_f)
        h_b = gru_cell(h_b, xproj_b_ref[t_b], w_hh_b, b_hn_b, m_b)
        return h_f, h_b

    h0 = jnp.zeros((TB, H), dtype=jnp.float32)
    unroll = True if T <= 16 else 4   # full unroll only for short static T
    h_f, h_b = lax.fori_loop(0, T, step, (h0, h0), unroll=unroll)

    # fc(concat([backward, forward])) as two half-matmuls (no in-kernel concat)
    fc_w_b = fc_w_b_ref[...]
    fc_w_f = fc_w_f_ref[...]
    logits = (jnp.dot(h_b.astype(fc_w_b.dtype), fc_w_b,
                      preferred_element_type=jnp.float32)
              + jnp.dot(h_f.astype(fc_w_f.dtype), fc_w_f,
                        preferred_element_type=jnp.float32)
              + fc_b_ref[...])
    out_ref[...] = logits.astype(out_ref.dtype)   # lane-dense (TB, O_pad) store


# ----------------------------------------------------------------------------
# Parameters (PyTorch layout) and kernel-ready packing
# ----------------------------------------------------------------------------
def make_params(vocab_size, hidden_size, output_size, key):
    """Parameters in PyTorch layout (GRU gate order r, z, n)."""
    ks = jax.random.split(key, 11)
    k = 1.0 / jnp.sqrt(hidden_size)

    def u(key, shape):
        return jax.random.uniform(key, shape, jnp.float32, -k, k)

    H = hidden_size
    return dict(
        emb=u(ks[0], (vocab_size, H)),
        # weight_ih_l0 / weight_hh_l0 : (3H, H); bias_* : (3H,)
        w_ih_f=u(ks[1], (3 * H, H)), w_hh_f=u(ks[2], (3 * H, H)),
        b_ih_f=u(ks[3], (3 * H,)),   b_hh_f=u(ks[4], (3 * H,)),
        # *_reverse direction
        w_ih_b=u(ks[5], (3 * H, H)), w_hh_b=u(ks[6], (3 * H, H)),
        b_ih_b=u(ks[7], (3 * H,)),   b_hh_b=u(ks[8], (3 * H,)),
        # fc: Linear(2H, O). Columns 0:H of fc.weight multiply hidden[-1]
        # (backward); columns H:2H multiply hidden[-2] (forward).
        fc_w=u(ks[9], (output_size, 2 * H)), fc_b=u(ks[10], (output_size,)),
    )


def pack_params(params, hidden_size, output_size, compute_dtype=jnp.bfloat16):
    """Pad to TPU tiles, fuse gate weights to (H_pad, 3H_pad), fold biases."""
    H = hidden_size
    H_pad = _round_up(H, LANE)
    O_pad = _round_up(output_size, LANE)

    def pad2(x, rows, cols):
        return jnp.pad(x, ((0, rows - x.shape[0]), (0, cols - x.shape[1])))

    def gate_weight(w):               # torch (3H, H) -> (H_pad, 3H_pad), x @ W
        blocks = [pad2(w[g * H:(g + 1) * H, :].T, H_pad, H_pad) for g in range(3)]
        return jnp.concatenate(blocks, axis=1).astype(compute_dtype)

    def folded_input_bias(b_ih, b_hh):    # (1, 3H_pad) f32
        br = b_ih[0:H] + b_hh[0:H]
        bz = b_ih[H:2 * H] + b_hh[H:2 * H]
        bn = b_ih[2 * H:3 * H]
        blocks = [jnp.pad(x, (0, H_pad - H)) for x in (br, bz, bn)]
        return jnp.concatenate(blocks)[None, :].astype(jnp.float32)

    def hn_bias(b_hh):                    # (1, H_pad) f32, stays in the loop
        return jnp.pad(b_hh[2 * H:3 * H], (0, H_pad - H))[None, :].astype(jnp.float32)

    fc_wT = params['fc_w'].T              # (2H, O); rows 0:H -> backward hidden
    return dict(
        emb=jnp.pad(params['emb'], ((0, 0), (0, H_pad - H))).astype(compute_dtype),
        w_ih_f=gate_weight(params['w_ih_f']),
        w_hh_f=gate_weight(params['w_hh_f']),
        bx_f=folded_input_bias(params['b_ih_f'], params['b_hh_f']),
        bhn_f=hn_bias(params['b_hh_f']),
        w_ih_b=gate_weight(params['w_ih_b']),
        w_hh_b=gate_weight(params['w_hh_b']),
        bx_b=folded_input_bias(params['b_ih_b'], params['b_hh_b']),
        bhn_b=hn_bias(params['b_hh_b']),
        fc_w_b=pad2(fc_wT[:H], H_pad, O_pad).astype(compute_dtype),
        fc_w_f=pad2(fc_wT[H:], H_pad, O_pad).astype(compute_dtype),
        fc_b=jnp.pad(params['fc_b'], (0, O_pad - output_size))[None, :].astype(jnp.float32),
    )


# ----------------------------------------------------------------------------
# Forward wrapper
# ----------------------------------------------------------------------------
@functools.partial(jax.jit, static_argnames=('out_size',))
def rnn_classifier_forward(packed, input_ids, seq_lengths, out_size):
    """input_ids: (B, T) int32, seq_lengths: (B,) int32 -> logits (B, out_size)."""
    B, T = input_ids.shape
    H_pad = packed['w_hh_f'].shape[0]
    H3_pad = packed['w_hh_f'].shape[1]
    O_pad = packed['fc_b'].shape[-1]
    B_pad = _round_up(B, BATCH_BLOCK)

    # glue kept in JAX: input.t() + embedding row gather (no clean Pallas gather)
    emb = packed['emb'][input_ids.T]                              # (T, B, H_pad)
    emb = jnp.pad(emb, ((0, 0), (0, B_pad - B), (0, 0)))          # (T, B_pad, H_pad)
    lens = jnp.pad(seq_lengths.astype(jnp.int32), (0, B_pad - B))[:, None]  # (B_pad, 1)

    def rep(shape):   # replicated (broadcast) operand: same block for every grid step
        return pl.BlockSpec(shape, lambda b, _nd=len(shape): (0,) * _nd)

    grid_spec = pltpu.PrefetchScalarGridSpec(
        num_scalar_prefetch=0,
        grid=(B_pad // BATCH_BLOCK,),
        in_specs=[
            pl.BlockSpec((T, BATCH_BLOCK, H_pad), lambda b: (0, b, 0)),   # emb
            pl.BlockSpec((BATCH_BLOCK, 1), lambda b: (b, 0)),             # lengths
            rep((H_pad, H3_pad)), rep((H_pad, H3_pad)),                   # W_ih_f, W_hh_f
            rep((1, H3_pad)), rep((1, H_pad)),                            # bx_f, bhn_f
            rep((H_pad, H3_pad)), rep((H_pad, H3_pad)),                   # W_ih_b, W_hh_b
            rep((1, H3_pad)), rep((1, H_pad)),                            # bx_b, bhn_b
            rep((H_pad, O_pad)), rep((H_pad, O_pad)), rep((1, O_pad)),    # fc
        ],
        out_specs=pl.BlockSpec((BATCH_BLOCK, O_pad), lambda b: (b, 0)),
        scratch_shapes=[pltpu.VMEM((T, BATCH_BLOCK, H3_pad), jnp.float32),
                        pltpu.VMEM((T, BATCH_BLOCK, H3_pad), jnp.float32)],
    )

    out = pl.pallas_call(
        rnn_classifier_kernel,
        out_shape=jax.ShapeDtypeStruct((B_pad, O_pad), jnp.float32),
        grid_spec=grid_spec,
        compiler_params=pltpu.CompilerParams(
            dimension_semantics=("parallel",)),      # batch shards across TCs (v7x)
    )(emb, lens,
      packed['w_ih_f'], packed['w_hh_f'], packed['bx_f'], packed['bhn_f'],
      packed['w_ih_b'], packed['w_hh_b'], packed['bx_b'], packed['bhn_b'],
      packed['fc_w_f'], packed['fc_w_b'], packed['fc_b'])

    return out[:B, :out_size]


# ----------------------------------------------------------------------------
# Pure-JAX f32 reference (mirrors the PyTorch module exactly)
# ----------------------------------------------------------------------------
def rnn_classifier_reference(params, input_ids, seq_lengths):
    H = params['w_hh_f'].shape[1]
    emb = params['emb'][input_ids.T]                  # (T, B, H)
    T, B, _ = emb.shape
    mask = (jnp.arange(T)[:, None] < seq_lengths[None, :]
            ).astype(jnp.float32)[:, :, None]         # (T, B, 1)

    def run(w_ih, w_hh, b_ih, b_hh, forward):
        w_ir, w_iz, w_in = w_ih[0:H], w_ih[H:2 * H], w_ih[2 * H:]
        w_hr, w_hz, w_hn = w_hh[0:H], w_hh[H:2 * H], w_hh[2 * H:]
        b_ir, b_iz, b_in = b_ih[0:H], b_ih[H:2 * H], b_ih[2 * H:]
        b_hr, b_hz, b_hn = b_hh[0:H], b_hh[H:2 * H], b_hh[2 * H:]
        h = jnp.zeros((B, H), jnp.float32)
        ts = range(T) if forward else range(T - 1, -1, -1)
        for t in ts:
            x, m = emb[t], mask[t]
            r = jax.nn.sigmoid(x @ w_ir.T + b_ir + h @ w_hr.T + b_hr)
            z = jax.nn.sigmoid(x @ w_iz.T + b_iz + h @ w_hz.T + b_hz)
            n = jnp.tanh(x @ w_in.T + b_in + r * (h @ w_hn.T + b_hn))
            h = m * ((1.0 - z) * n + z * h) + (1.0 - m) * h
        return h

    h_f = run(params['w_ih_f'], params['w_hh_f'], params['b_ih_f'], params['b_hh_f'], True)
    h_b = run(params['w_ih_b'], params['w_hh_b'], params['b_ih_b'], params['b_hh_b'], False)
    hidden_cat = jnp.concatenate([h_b, h_f], axis=1)   # [hidden[-1], hidden[-2]]
    return hidden_cat @ params['fc_w'].T + params['fc_b']


if __name__ == "__main__":
    VOCAB = 32           # input_size (embedding rows)
    HIDDEN = 32          # hidden_size
    OUTPUT = 8           # output_size (num classes)
    B, T = 2, 8          # batch, max sequence length

    key = jax.random.PRNGKey(0)
    pkey, dkey = jax.random.split(key)
    params = make_params(VOCAB, HIDDEN, OUTPUT, pkey)
    packed = pack_params(params, HIDDEN, OUTPUT)     # bf16, padded, gate-fused

    input_ids = jax.random.randint(dkey, (B, T), 0, VOCAB, dtype=jnp.int32)
    seq_lengths = jnp.array([8, 5], dtype=jnp.int32)  # sorted desc (pack_padded_sequence)

    logits = rnn_classifier_forward(packed, input_ids, seq_lengths, out_size=OUTPUT)
    logits = jax.block_until_ready(logits)

    ref = rnn_classifier_reference(params, input_ids, seq_lengths)

    assert logits.shape == (B, OUTPUT)
    assert bool(jnp.all(jnp.isfinite(logits)))
    assert bool(jnp.allclose(logits, ref, atol=2e-2, rtol=2e-2)), \
        f"max abs diff = {float(jnp.max(jnp.abs(logits - ref)))}"
    print("KERNEL_OK")
</pallas_src>

<mosaic_0001>
module attributes {stable_mosaic.version = 11 : i64} {
  func.func @rnn_classifier_kernel(%arg0: i32, %arg1: memref<8x8x128xbf16, #tpu.memory_space<vmem>>, %arg2: memref<8x1xi32, #tpu.memory_space<vmem>>, %arg3: memref<128x384xbf16, #tpu.memory_space<vmem>>, %arg4: memref<128x384xbf16, #tpu.memory_space<vmem>>, %arg5: memref<1x384xf32, #tpu.memory_space<vmem>>, %arg6: memref<1x128xf32, #tpu.memory_space<vmem>>, %arg7: memref<128x384xbf16, #tpu.memory_space<vmem>>, %arg8: memref<128x384xbf16, #tpu.memory_space<vmem>>, %arg9: memref<1x384xf32, #tpu.memory_space<vmem>>, %arg10: memref<1x128xf32, #tpu.memory_space<vmem>>, %arg11: memref<128x128xbf16, #tpu.memory_space<vmem>>, %arg12: memref<128x128xbf16, #tpu.memory_space<vmem>>, %arg13: memref<1x128xf32, #tpu.memory_space<vmem>>, %arg14: memref<8x128xf32, #tpu.memory_space<vmem>>, %arg15: memref<8x8x384xf32, #tpu.memory_space<vmem>>, %arg16: memref<8x8x384xf32, #tpu.memory_space<vmem>>) attributes {dimension_semantics = [#tpu.dimension_semantics<parallel>], iteration_bounds = array<i64: 1>, scalar_prefetch = 0 : i64, scratch_operands = 2 : i64, tpu.core_type = #tpu.core_type<tc>, window_params = [{transform_indices = @transform_0, window_bounds = array<i64: 8, 8, 128>}, {transform_indices = @transform_1, window_bounds = array<i64: 8, 1>}, {pipeline_mode = #tpu.pipeline_mode<synchronous>, transform_indices = @transform_2, window_bounds = array<i64: 128, 384>}, {pipeline_mode = #tpu.pipeline_mode<synchronous>, transform_indices = @transform_3, window_bounds = array<i64: 128, 384>}, {pipeline_mode = #tpu.pipeline_mode<synchronous>, transform_indices = @transform_4, window_bounds = array<i64: 1, 384>}, {pipeline_mode = #tpu.pipeline_mode<synchronous>, transform_indices = @transform_5, window_bounds = array<i64: 1, 128>}, {pipeline_mode = #tpu.pipeline_mode<synchronous>, transform_indices = @transform_6, window_bounds = array<i64: 128, 384>}, {pipeline_mode = #tpu.pipeline_mode<synchronous>, transform_indices = @transform_7, window_bounds = array<i64: 128, 384>}, {pipeline_mode = #tpu.pipeline_mode<synchronous>, transform_indices = @transform_8, window_bounds = array<i64: 1, 384>}, {pipeline_mode = #tpu.pipeline_mode<synchronous>, transform_indices = @transform_9, window_bounds = array<i64: 1, 128>}, {pipeline_mode = #tpu.pipeline_mode<synchronous>, transform_indices = @transform_10, window_bounds = array<i64: 128, 128>}, {pipeline_mode = #tpu.pipeline_mode<synchronous>, transform_indices = @transform_11, window_bounds = array<i64: 128, 128>}, {pipeline_mode = #tpu.pipeline_mode<synchronous>, transform_indices = @transform_12, window_bounds = array<i64: 1, 128>}, {transform_indices = @transform_13, window_bounds = array<i64: 8, 128>}]} {
    %c0 = arith.constant 0 : index
    %c0_0 = arith.constant 0 : index
    %c0_1 = arith.constant 0 : index
    %0 = vector.load %arg1[%c0, %c0_0, %c0_1] : memref<8x8x128xbf16, #tpu.memory_space<vmem>>, vector<8x8x128xbf16>
    %1 = vector.shape_cast %0 : vector<8x8x128xbf16> to vector<64x128xbf16>
    %c0_2 = arith.constant 0 : index
    %c0_3 = arith.constant 0 : index
    %2 = vector.load %arg3[%c0_2, %c0_3] : memref<128x384xbf16, #tpu.memory_space<vmem>>, vector<128x384xbf16>
    %cst = arith.constant dense<0.000000e+00> : vector<64x384xf32>
    %3 = tpu.matmul %1, %2, %cst {dimension_numbers = #tpu.dot_dimension_numbers<[1], [0], [0], [1], [0, 0, 1, 1], [], []>} : vector<64x128xbf16>, vector<128x384xbf16>, vector<64x384xf32> -> vector<64x384xf32>
    %c0_4 = arith.constant 0 : index
    %c0_5 = arith.constant 0 : index
    %4 = vector.load %arg5[%c0_4, %c0_5] : memref<1x384xf32, #tpu.memory_space<vmem>>, vector<1x384xf32>
    %5 = vector.broadcast %4 : vector<1x384xf32> to vector<64x384xf32>
    %6 = arith.addf %3, %5 : vector<64x384xf32>
    %7 = vector.shape_cast %6 : vector<64x384xf32> to vector<8x8x384xf32>
    %c0_6 = arith.constant 0 : index
    %c0_7 = arith.constant 0 : index
    %c0_8 = arith.constant 0 : index
    %8 = vector.load %arg15[%c0_6, %c0_7, %c0_8] : memref<8x8x384xf32, #tpu.memory_space<vmem>>, vector<8x8x384xf32>
    tpu.vector_store %arg15[%c0_6, %c0_7, %c0_8], %7 {strides = array<i32>} : memref<8x8x384xf32, #tpu.memory_space<vmem>>, vector<8x8x384xf32>,
    %c0_9 = arith.constant 0 : index
    %c0_10 = arith.constant 0 : index
    %9 = vector.load %arg7[%c0_9, %c0_10] : memref<128x384xbf16, #tpu.memory_space<vmem>>, vector<128x384xbf16>
    %cst_11 = arith.constant dense<0.000000e+00> : vector<64x384xf32>
    %10 = tpu.matmul %1, %9, %cst_11 {dimension_numbers = #tpu.dot_dimension_numbers<[1], [0], [0], [1], [0, 0, 1, 1], [], []>} : vector<64x128xbf16>, vector<128x384xbf16>, vector<64x384xf32> -> vector<64x384xf32>
    %c0_12 = arith.constant 0 : index
    %c0_13 = arith.constant 0 : index
    %11 = vector.load %arg9[%c0_12, %c0_13] : memref<1x384xf32, #tpu.memory_space<vmem>>, vector<1x384xf32>
    %12 = vector.broadcast %11 : vector<1x384xf32> to vector<64x384xf32>
    %13 = arith.addf %10, %12 : vector<64x384xf32>
    %14 = vector.shape_cast %13 : vector<64x384xf32> to vector<8x8x384xf32>
    %c0_14 = arith.constant 0 : index
    %c0_15 = arith.constant 0 : index
    %c0_16 = arith.constant 0 : index
    %15 = vector.load %arg16[%c0_14, %c0_15, %c0_16] : memref<8x8x384xf32, #tpu.memory_space<vmem>>, vector<8x8x384xf32>
    tpu.vector_store %arg16[%c0_14, %c0_15, %c0_16], %14 {strides = array<i32>} : memref<8x8x384xf32, #tpu.memory_space<vmem>>, vector<8x8x384xf32>,
    %c0_17 = arith.constant 0 : index
    %c0_18 = arith.constant 0 : index
    %16 = vector.load %arg2[%c0_17, %c0_18] : memref<8x1xi32, #tpu.memory_space<vmem>>, vector<8x1xi32>
    %c0_19 = arith.constant 0 : index
    %c0_20 = arith.constant 0 : index
    %17 = vector.load %arg4[%c0_19, %c0_20] : memref<128x384xbf16, #tpu.memory_space<vmem>>, vector<128x384xbf16>
    %c0_21 = arith.constant 0 : index
    %c0_22 = arith.constant 0 : index
    %18 = vector.load %arg8[%c0_21, %c0_22] : memref<128x384xbf16, #tpu.memory_space<vmem>>, vector<128x384xbf16>
    %c0_23 = arith.constant 0 : index
    %c0_24 = arith.constant 0 : index
    %19 = vector.load %arg6[%c0_23, %c0_24] : memref<1x128xf32, #tpu.memory_space<vmem>>, vector<1x128xf32>
    %c0_25 = arith.constant 0 : index
    %c0_26 = arith.constant 0 : index
    %20 = vector.load %arg10[%c0_25, %c0_26] : memref<1x128xf32, #tpu.memory_space<vmem>>, vector<1x128xf32>
    %cst_27 = arith.constant 0.000000e+00 : f32
    %21 = vector.broadcast %cst_27 : f32 to vector<8x128xf32>
    %c0_i32 = arith.constant 0 : i32
    %c7_i32 = arith.constant 7 : i32
    %22 = arith.subi %c7_i32, %c0_i32 : i32
    %23 = vector.broadcast %c0_i32 : i32 to vector<8x1xi32>
    %24 = arith.cmpi slt, %23, %16 : vector<8x1xi32>
    %25 = arith.extui %24 : vector<8x1xi1> to vector<8x1xi32>
    %26 = arith.sitofp %25 : vector<8x1xi32> to vector<8x1xf32>
    %27 = vector.broadcast %22 : i32 to vector<8x1xi32>
    %28 = arith.cmpi slt, %27, %16 : vector<8x1xi32>
    %29 = arith.extui %28 : vector<8x1xi1> to vector<8x1xi32>
    %30 = arith.sitofp %29 : vector<8x1xi32> to vector<8x1xf32>
    %31 = arith.index_cast %c0_i32 : i32 to index
    %c0_28 = arith.constant 0 : index
    %c0_29 = arith.constant 0 : index
    %32 = vector.load %arg15[%31, %c0_28, %c0_29] : memref<8x8x384xf32, #tpu.memory_space<vmem>>, vector<1x8x384xf32>
    %33 = vector.shape_cast %32 : vector<1x8x384xf32> to vector<8x384xf32>
    %34 = arith.truncf %21 : vector<8x128xf32> to vector<8x128xbf16>
    %cst_30 = arith.constant dense<0.000000e+00> : vector<8x384xf32>
    %35 = tpu.matmul %34, %17, %cst_30 {dimension_numbers = #tpu.dot_dimension_numbers<[1], [0], [0], [1], [0, 0, 1, 1], [], []>} : vector<8x128xbf16>, vector<128x384xbf16>, vector<8x384xf32> -> vector<8x384xf32>
    %36 = vector.extract_strided_slice %33 {offsets = [0, 0], sizes = [8, 128], strides = [1, 1]} : vector<8x384xf32> to vector<8x128xf32>
    %37 = vector.extract_strided_slice %35 {offsets = [0, 0], sizes = [8, 128], strides = [1, 1]} : vector<8x384xf32> to vector<8x128xf32>
    %38 = arith.addf %36, %37 : vector<8x128xf32>
    %39 = arith.negf %38 : vector<8x128xf32>
    %40 = math.exp %39 : vector<8x128xf32>
    %cst_31 = arith.constant 1.000000e+00 : f32
    %41 = vector.broadcast %cst_31 : f32 to vector<8x128xf32>
    %42 = arith.addf %41, %40 : vector<8x128xf32>
    %43 = arith.divf %41, %42 : vector<8x128xf32>
    %44 = vector.extract_strided_slice %33 {offsets = [0, 128], sizes = [8, 128], strides = [1, 1]} : vector<8x384xf32> to vector<8x128xf32>
    %45 = vector.extract_strided_slice %35 {offsets = [0, 128], sizes = [8, 128], strides = [1, 1]} : vector<8x384xf32> to vector<8x128xf32>
    %46 = arith.addf %44, %45 : vector<8x128xf32>
    %47 = arith.negf %46 : vector<8x128xf32>
    %48 = math.exp %47 : vector<8x128xf32>
    %cst_32 = arith.constant 1.000000e+00 : f32
    %49 = vector.broadcast %cst_32 : f32 to vector<8x128xf32>
    %50 = arith.addf %49, %48 : vector<8x128xf32>
    %51 = arith.divf %49, %50 : vector<8x128xf32>
    %52 = vector.extract_strided_slice %33 {offsets = [0, 256], sizes = [8, 128], strides = [1, 1]} : vector<8x384xf32> to vector<8x128xf32>
    %53 = vector.extract_strided_slice %35 {offsets = [0, 256], sizes = [8, 128], strides = [1, 1]} : vector<8x384xf32> to vector<8x128xf32>
    %54 = vector.broadcast %19 : vector<1x128xf32> to vector<8x128xf32>
    %55 = arith.addf %53, %54 : vector<8x128xf32>
    %56 = arith.mulf %43, %55 : vector<8x128xf32>
    %57 = arith.addf %52, %56 : vector<8x128xf32>
    %58 = math.tanh %57 : vector<8x128xf32>
    %cst_33 = arith.constant 1.000000e+00 : f32
    %59 = vector.broadcast %cst_33 : f32 to vector<8x128xf32>
    %60 = arith.subf %59, %51 : vector<8x128xf32>
    %61 = arith.mulf %60, %58 : vector<8x128xf32>
    %62 = arith.mulf %51, %21 : vector<8x128xf32>
    %63 = arith.addf %61, %62 : vector<8x128xf32>
    %64 = vector.broadcast %26 : vector<8x1xf32> to vector<8x128xf32>
    %65 = arith.mulf %64, %63 : vector<8x128xf32>
    %cst_34 = arith.constant 1.000000e+00 : f32
    %66 = vector.broadcast %cst_34 : f32 to vector<8x1xf32>
    %67 = arith.subf %66, %26 : vector<8x1xf32>
    %68 = vector.broadcast %67 : vector<8x1xf32> to vector<8x128xf32>
    %69 = arith.mulf %68, %21 : vector<8x128xf32>
    %70 = arith.addf %65, %69 : vector<8x128xf32>
    %71 = arith.index_cast %22 : i32 to index
    %c0_35 = arith.constant 0 : index
    %c0_36 = arith.constant 0 : index
    %72 = vector.load %arg16[%71, %c0_35, %c0_36] : memref<8x8x384xf32, #tpu.memory_space<vmem>>, vector<1x8x384xf32>
    %73 = vector.shape_cast %72 : vector<1x8x384xf32> to vector<8x384xf32>
    %74 = arith.truncf %21 : vector<8x128xf32> to vector<8x128xbf16>
    %cst_37 = arith.constant dense<0.000000e+00> : vector<8x384xf32>
    %75 = tpu.matmul %74, %18, %cst_37 {dimension_numbers = #tpu.dot_dimension_numbers<[1], [0], [0], [1], [0, 0, 1, 1], [], []>} : vector<8x128xbf16>, vector<128x384xbf16>, vector<8x384xf32> -> vector<8x384xf32>
    %76 = vector.extract_strided_slice %73 {offsets = [0, 0], sizes = [8, 128], strides = [1, 1]} : vector<8x384xf32> to vector<8x128xf32>
    %77 = vector.extract_strided_slice %75 {offsets = [0, 0], sizes = [8, 128], strides = [1, 1]} : vector<8x384xf32> to vector<8x128xf32>
    %78 = arith.addf %76, %77 : vector<8x128xf32>
    %79 = arith.negf %78 : vector<8x128xf32>
    %80 = math.exp %79 : vector<8x128xf32>
    %cst_38 = arith.constant 1.000000e+00 : f32
    %81 = vector.broadcast %cst_38 : f32 to vector<8x128xf32>
    %82 = arith.addf %81, %80 : vector<8x128xf32>
    %83 = arith.divf %81, %82 : vector<8x128xf32>
    %84 = vector.extract_strided_slice %73 {offsets = [0, 128], sizes = [8, 128], strides = [1, 1]} : vector<8x384xf32> to vector<8x128xf32>
    %85 = vector.extract_strided_slice %75 {offsets = [0, 128], sizes = [8, 128], strides = [1, 1]} : vector<8x384xf32> to vector<8x128xf32>
    %86 = arith.addf %84, %85 : vector<8x128xf32>
    %87 = arith.negf %86 : vector<8x128xf32>
    %88 = math.exp %87 : vector<8x128xf32>
    %cst_39 = arith.constant 1.000000e+00 : f32
    %89 = vector.broadcast %cst_39 : f32 to vector<8x128xf32>
    %90 = arith.addf %89, %88 : vector<8x128xf32>
    %91 = arith.divf %89, %90 : vector<8x128xf32>
    %92 = vector.extract_strided_slice %73 {offsets = [0, 256], sizes = [8, 128], strides = [1, 1]} : vector<8x384xf32> to vector<8x128xf32>
    %93 = vector.extract_strided_slice %75 {offsets = [0, 256], sizes = [8, 128], strides = [1, 1]} : vector<8x384xf32> to vector<8x128xf32>
    %94 = vector.broadcast %20 : vector<1x128xf32> to vector<8x128xf32>
    %95 = arith.addf %93, %94 : vector<8x128xf32>
    %96 = arith.mulf %83, %95 : vector<8x128xf32>
    %97 = arith.addf %92, %96 : vector<8x128xf32>
    %98 = math.tanh %97 : vector<8x128xf32>
    %cst_40 = arith.constant 1.000000e+00 : f32
    %99 = vector.broadcast %cst_40 : f32 to vector<8x128xf32>
    %100 = arith.subf %99, %91 : vector<8x128xf32>
    %101 = arith.mulf %100, %98 : vector<8x128xf32>
    %102 = arith.mulf %91, %21 : vector<8x128xf32>
    %103 = arith.addf %101, %102 : vector<8x128xf32>
    %104 = vector.broadcast %30 : vector<8x1xf32> to vector<8x128xf32>
    %105 = arith.mulf %104, %103 : vector<8x128xf32>
    %cst_41 = arith.constant 1.000000e+00 : f32
    %106 = vector.broadcast %cst_41 : f32 to vector<8x1xf32>
    %107 = arith.subf %106, %30 : vector<8x1xf32>
    %108 = vector.broadcast %107 : vector<8x1xf32> to vector<8x128xf32>
    %109 = arith.mulf %108, %21 : vector<8x128xf32>
    %110 = arith.addf %105, %109 : vector<8x128xf32>
    %c1_i32 = arith.constant 1 : i32
    %c7_i32_42 = arith.constant 7 : i32
    %111 = arith.subi %c7_i32_42, %c1_i32 : i32
    %112 = vector.broadcast %c1_i32 : i32 to vector<8x1xi32>
    %113 = arith.cmpi slt, %112, %16 : vector<8x1xi32>
    %114 = arith.extui %113 : vector<8x1xi1> to vector<8x1xi32>
    %115 = arith.sitofp %114 : vector<8x1xi32> to vector<8x1xf32>
    %116 = vector.broadcast %111 : i32 to vector<8x1xi32>
    %117 = arith.cmpi slt, %116, %16 : vector<8x1xi32>
    %118 = arith.extui %117 : vector<8x1xi1> to vector<8x1xi32>
    %119 = arith.sitofp %118 : vector<8x1xi32> to vector<8x1xf32>
    %120 = arith.index_cast %c1_i32 : i32 to index
    %c0_43 = arith.constant 0 : index
    %c0_44 = arith.constant 0 : index
    %121 = vector.load %arg15[%120, %c0_43, %c0_44] : memref<8x8x384xf32, #tpu.memory_space<vmem>>, vector<1x8x384xf32>
    %122 = vector.shape_cast %121 : vector<1x8x384xf32> to vector<8x384xf32>
    %123 = arith.truncf %70 : vector<8x128xf32> to vector<8x128xbf16>
    %cst_45 = arith.constant dense<0.000000e+00> : vector<8x384xf32>
    %124 = tpu.matmul %123, %17, %cst_45 {dimension_numbers = #tpu.dot_dimension_numbers<[1], [0], [0], [1], [0, 0, 1, 1], [], []>} : vector<8x128xbf16>, vector<128x384xbf16>, vector<8x384xf32> -> vector<8x384xf32>
    %125 = vector.extract_strided_slice %122 {offsets = [0, 0], sizes = [8, 128], strides = [1, 1]} : vector<8x384xf32> to vector<8x128xf32>
    %126 = vector.extract_strided_slice %124 {offsets = [0, 0], sizes = [8, 128], strides = [1, 1]} : vector<8x384xf32> to vector<8x128xf32>
    %127 = arith.addf %125, %126 : vector<8x128xf32>
    %128 = arith.negf %127 : vector<8x128xf32>
    %129 = math.exp %128 : vector<8x128xf32>
    %cst_46 = arith.constant 1.000000e+00 : f32
    %130 = vector.broadcast %cst_46 : f32 to vector<8x128xf32>
    %131 = arith.addf %130, %129 : vector<8x128xf32>
    %132 = arith.divf %130, %131 : vector<8x128xf32>
    %133 = vector.extract_strided_slice %122 {offsets = [0, 128], sizes = [8, 128], strides = [1, 1]} : vector<8x384xf32> to vector<8x128xf32>
    %134 = vector.extract_strided_slice %124 {offsets = [0, 128], sizes = [8, 128], strides = [1, 1]} : vector<8x384xf32> to vector<8x128xf32>
    %135 = arith.addf %133, %134 : vector<8x128xf32>
    %136 = arith.negf %135 : vector<8x128xf32>
    %137 = math.exp %136 : vector<8x128xf32>
    %cst_47 = arith.constant 1.000000e+00 : f32
    %138 = vector.broadcast %cst_47 : f32 to vector<8x128xf32>
    %139 = arith.addf %138, %137 : vector<8x128xf32>
    %140 = arith.divf %138, %139 : vector<8x128xf32>
    %141 = vector.extract_strided_slice %122 {offsets = [0, 256], sizes = [8, 128], strides = [1, 1]} : vector<8x384xf32> to vector<8x128xf32>
    %142 = vector.extract_strided_slice %124 {offsets = [0, 256], sizes = [8, 128], strides = [1, 1]} : vector<8x384xf32> to vector<8x128xf32>
    %143 = vector.broadcast %19 : vector<1x128xf32> to vector<8x128xf32>
    %144 = arith.addf %142, %143 : vector<8x128xf32>
    %145 = arith.mulf %132, %144 : vector<8x128xf32>
    %146 = arith.addf %141, %145 : vector<8x128xf32>
    %147 = math.tanh %146 : vector<8x128xf32>
    %cst_48 = arith.constant 1.000000e+00 : f32
    %148 = vector.broadcast %cst_48 : f32 to vector<8x128xf32>
    %149 = arith.subf %148, %140 : vector<8x128xf32>
    %150 = arith.mulf %149, %147 : vector<8x128xf32>
    %151 = arith.mulf %140, %70 : vector<8x128xf32>
    %152 = arith.addf %150, %151 : vector<8x128xf32>
    %153 = vector.broadcast %115 : vector<8x1xf32> to vector<8x128xf32>
    %154 = arith.mulf %153, %152 : vector<8x128xf32>
    %cst_49 = arith.constant 1.000000e+00 : f32
    %155 = vector.broadcast %cst_49 : f32 to vector<8x1xf32>
    %156 = arith.subf %155, %115 : vector<8x1xf32>
    %157 = vector.broadcast %156 : vector<8x1xf32> to vector<8x128xf32>
    %158 = arith.mulf %157, %70 : vector<8x128xf32>
    %159 = arith.addf %154, %158 : vector<8x128xf32>
    %160 = arith.index_cast %111 : i32 to index
    %c0_50 = arith.constant 0 : index
    %c0_51 = arith.constant 0 : index
    %161 = vector.load %arg16[%160, %c0_50, %c0_51] : memref<8x8x384xf32, #tpu.memory_space<vmem>>, vector<1x8x384xf32>
    %162 = vector.shape_cast %161 : vector<1x8x384xf32> to vector<8x384xf32>
    %163 = arith.truncf %110 : vector<8x128xf32> to vector<8x128xbf16>
    %cst_52 = arith.constant dense<0.000000e+00> : vector<8x384xf32>
    %164 = tpu.matmul %163, %18, %cst_52 {dimension_numbers = #tpu.dot_dimension_numbers<[1], [0], [0], [1], [0, 0, 1, 1], [], []>} : vector<8x128xbf16>, vector<128x384xbf16>, vector<8x384xf32> -> vector<8x384xf32>
    %165 = vector.extract_strided_slice %162 {offsets = [0, 0], sizes = [8, 128], strides = [1, 1]} : vector<8x384xf32> to vector<8x128xf32>
    %166 = vector.extract_strided_slice %164 {offsets = [0, 0], sizes = [8, 128], strides = [1, 1]} : vector<8x384xf32> to vector<8x128xf32>
    %167 = arith.addf %165, %166 : vector<8x128xf32>
    %168 = arith.negf %167 : vector<8x128xf32>
    %169 = math.exp %168 : vector<8x128xf32>
    %cst_53 = arith.constant 1.000000e+00 : f32
    %170 = vector.broadcast %cst_53 : f32 to vector<8x128xf32>
    %171 = arith.addf %170, %169 : vector<8x128xf32>
    %172 = arith.divf %170, %171 : vector<8x128xf32>
    %173 = vector.extract_strided_slice %162 {offsets = [0, 128], sizes = [8, 128], strides = [1, 1]} : vector<8x384xf32> to vector<8x128xf32>
    %174 = vector.extract_strided_slice %164 {offsets = [0, 128], sizes = [8, 128], strides = [1, 1]} : vector<8x384xf32> to vector<8x128xf32>
    %175 = arith.addf %173, %174 : vector<8x128xf32>
    %176 = arith.negf %175 : vector<8x128xf32>
    %177 = math.exp %176 : vector<8x128xf32>
    %cst_54 = arith.constant 1.000000e+00 : f32
    %178 = vector.broadcast %cst_54 : f32 to vector<8x128xf32>
    %179 = arith.addf %178, %177 : vector<8x128xf32>
    %180 = arith.divf %178, %179 : vector<8x128xf32>
    %181 = vector.extract_strided_slice %162 {offsets = [0, 256], sizes = [8, 128], strides = [1, 1]} : vector<8x384xf32> to vector<8x128xf32>
    %182 = vector.extract_strided_slice %164 {offsets = [0, 256], sizes = [8, 128], strides = [1, 1]} : vector<8x384xf32> to vector<8x128xf32>
    %183 = vector.broadcast %20 : vector<1x128xf32> to vector<8x128xf32>
    %184 = arith.addf %182, %183 : vector<8x128xf32>
    %185 = arith.mulf %172, %184 : vector<8x128xf32>
    %186 = arith.addf %181, %185 : vector<8x128xf32>
    %187 = math.tanh %186 : vector<8x128xf32>
    %cst_55 = arith.constant 1.000000e+00 : f32
    %188 = vector.broadcast %cst_55 : f32 to vector<8x128xf32>
    %189 = arith.subf %188, %180 : vector<8x128xf32>
    %190 = arith.mulf %189, %187 : vector<8x128xf32>
    %191 = arith.mulf %180, %110 : vector<8x128xf32>
    %192 = arith.addf %190, %191 : vector<8x128xf32>
    %193 = vector.broadcast %119 : vector<8x1xf32> to vector<8x128xf32>
    %194 = arith.mulf %193, %192 : vector<8x128xf32>
    %cst_56 = arith.constant 1.000000e+00 : f32
    %195 = vector.broadcast %cst_56 : f32 to vector<8x1xf32>
    %196 = arith.subf %195, %119 : vector<8x1xf32>
    %197 = vector.broadcast %196 : vector<8x1xf32> to vector<8x128xf32>
    %198 = arith.mulf %197, %110 : vector<8x128xf32>
    %199 = arith.addf %194, %198 : vector<8x128xf32>
    %c2_i32 = arith.constant 2 : i32
    %c7_i32_57 = arith.constant 7 : i32
    %200 = arith.subi %c7_i32_57, %c2_i32 : i32
    %201 = vector.broadcast %c2_i32 : i32 to vector<8x1xi32>
    %202 = arith.cmpi slt, %201, %16 : vector<8x1xi32>
    %203 = arith.extui %202 : vector<8x1xi1> to vector<8x1xi32>
    %204 = arith.sitofp %203 : vector<8x1xi32> to vector<8x1xf32>
    %205 = vector.broadcast %200 : i32 to vector<8x1xi32>
    %206 = arith.cmpi slt, %205, %16 : vector<8x1xi32>
    %207 = arith.extui %206 : vector<8x1xi1> to vector<8x1xi32>
    %208 = arith.sitofp %207 : vector<8x1xi32> to vector<8x1xf32>
    %209 = arith.index_cast %c2_i32 : i32 to index
    %c0_58 = arith.constant 0 : index
    %c0_59 = arith.constant 0 : index
    %210 = vector.load %arg15[%209, %c0_58, %c0_59] : memref<8x8x384xf32, #tpu.memory_space<vmem>>, vector<1x8x384xf32>
    %211 = vector.shape_cast %210 : vector<1x8x384xf32> to vector<8x384xf32>
    %212 = arith.truncf %159 : vector<8x128xf32> to vector<8x128xbf16>
    %cst_60 = arith.constant dense<0.000000e+00> : vector<8x384xf32>
    %213 = tpu.matmul %212, %17, %cst_60 {dimension_numbers = #tpu.dot_dimension_numbers<[1], [0], [0], [1], [0, 0, 1, 1], [], []>} : vector<8x128xbf16>, vector<128x384xbf16>, vector<8x384xf32> -> vector<8x384xf32>
    %214 = vector.extract_strided_slice %211 {offsets = [0, 0], sizes = [8, 128], strides = [1, 1]} : vector<8x384xf32> to vector<8x128xf32>
    %215 = vector.extract_strided_slice %213 {offsets = [0, 0], sizes = [8, 128], strides = [1, 1]} : vector<8x384xf32> to vector<8x128xf32>
    %216 = arith.addf %214, %215 : vector<8x128xf32>
    %217 = arith.negf %216 : vector<8x128xf32>
    %218 = math.exp %217 : vector<8x128xf32>
    %cst_61 = arith.constant 1.000000e+00 : f32
    %219 = vector.broadcast %cst_61 : f32 to vector<8x128xf32>
    %220 = arith.addf %219, %218 : vector<8x128xf32>
    %221 = arith.divf %219, %220 : vector<8x128xf32>
    %222 = vector.extract_strided_slice %211 {offsets = [0, 128], sizes = [8, 128], strides = [1, 1]} : vector<8x384xf32> to vector<8x128xf32>
    %223 = vector.extract_strided_slice %213 {offsets = [0, 128], sizes = [8, 128], strides = [1, 1]} : vector<8x384xf32> to vector<8x128xf32>
    %224 = arith.addf %222, %223 : vector<8x128xf32>
    %225 = arith.negf %224 : vector<8x128xf32>
    %226 = math.exp %225 : vector<8x128xf32>
    %cst_62 = arith.constant 1.000000e+00 : f32
    %227 = vector.broadcast %cst_62 : f32 to vector<8x128xf32>
    %228 = arith.addf %227, %226 : vector<8x128xf32>
    %229 = arith.divf %227, %228 : vector<8x128xf32>
    %230 = vector.extract_strided_slice %211 {offsets = [0, 256], sizes = [8, 128], strides = [1, 1]} : vector<8x384xf32> to vector<8x128xf32>
    %231 = vector.extract_strided_slice %213 {offsets = [0, 256], sizes = [8, 128], strides = [1, 1]} : vector<8x384xf32> to vector<8x128xf32>
    %232 = vector.broadcast %19 : vector<1x128xf32> to vector<8x128xf32>
    %233 = arith.addf %231, %232 : vector<8x128xf32>
    %234 = arith.mulf %221, %233 : vector<8x128xf32>
    %235 = arith.addf %230, %234 : vector<8x128xf32>
    %236 = math.tanh %235 : vector<8x128xf32>
    %cst_63 = arith.constant 1.000000e+00 : f32
    %237 = vector.broadcast %cst_63 : f32 to vector<8x128xf32>
    %238 = arith.subf %237, %229 : vector<8x128xf32>
    %239 = arith.mulf %238, %236 : vector<8x128xf32>
    %240 = arith.mulf %229, %159 : vector<8x128xf32>
    %241 = arith.addf %239, %240 : vector<8x128xf32>
    %242 = vector.broadcast %204 : vector<8x1xf32> to vector<8x128xf32>
    %243 = arith.mulf %242, %241 : vector<8x128xf32>
    %cst_64 = arith.constant 1.000000e+00 : f32
    %244 = vector.broadcast %cst_64 : f32 to vector<8x1xf32>
    %245 = arith.subf %244, %204 : vector<8x1xf32>
    %246 = vector.broadcast %245 : vector<8x1xf32> to vector<8x128xf32>
    %247 = arith.mulf %246, %159 : vector<8x128xf32>
    %248 = arith.addf %243, %247 : vector<8x128xf32>
    %249 = arith.index_cast %200 : i32 to index
    %c0_65 = arith.constant 0 : index
    %c0_66 = arith.constant 0 : index
    %250 = vector.load %arg16[%249, %c0_65, %c0_66] : memref<8x8x384xf32, #tpu.memory_space<vmem>>, vector<1x8x384xf32>
    %251 = vector.shape_cast %250 : vector<1x8x384xf32> to vector<8x384xf32>
    %252 = arith.truncf %199 : vector<8x128xf32> to vector<8x128xbf16>
    %cst_67 = arith.constant dense<0.000000e+00> : vector<8x384xf32>
    %253 = tpu.matmul %252, %18, %cst_67 {dimension_numbers = #tpu.dot_dimension_numbers<[1], [0], [0], [1], [0, 0, 1, 1], [], []>} : vector<8x128xbf16>, vector<128x384xbf16>, vector<8x384xf32> -> vector<8x384xf32>
    %254 = vector.extract_strided_slice %251 {offsets = [0, 0], sizes = [8, 128], strides = [1, 1]} : vector<8x384xf32> to vector<8x128xf32>
    %255 = vector.extract_strided_slice %253 {offsets = [0, 0], sizes = [8, 128], strides = [1, 1]} : vector<8x384xf32> to vector<8x128xf32>
    %256 = arith.addf %254, %255 : vector<8x128xf32>
    %257 = arith.negf %256 : vector<8x128xf32>
    %258 = math.exp %257 : vector<8x128xf32>
    %cst_68 = arith.constant 1.000000e+00 : f32
    %259 = vector.broadcast %cst_68 : f32 to vector<8x128xf32>
    %260 = arith.addf %259, %258 : vector<8x128xf32>
    %261 = arith.divf %259, %260 : vector<8x128xf32>
    %262 = vector.extract_strided_slice %251 {offsets = [0, 128], sizes = [8, 128], strides = [1, 1]} : vector<8x384xf32> to vector<8x128xf32>
    %263 = vector.extract_strided_slice %253 {offsets = [0, 128], sizes = [8, 128], strides = [1, 1]} : vector<8x384xf32> to vector<8x128xf32>
    %264 = arith.addf %262, %263 : vector<8x128xf32>
    %265 = arith.negf %264 : vector<8x128xf32>
    %266 = math.exp %265 : vector<8x128xf32>
    %cst_69 = arith.constant 1.000000e+00 : f32
    %267 = vector.broadcast %cst_69 : f32 to vector<8x128xf32>
    %268 = arith.addf %267, %266 : vector<8x128xf32>
    %269 = arith.divf %267, %268 : vector<8x128xf32>
    %270 = vector.extract_strided_slice %251 {offsets = [0, 256], sizes = [8, 128], strides = [1, 1]} : vector<8x384xf32> to vector<8x128xf32>
    %271 = vector.extract_strided_slice %253 {offsets = [0, 256], sizes = [8, 128], strides = [1, 1]} : vector<8x384xf32> to vector<8x128xf32>
    %272 = vector.broadcast %20 : vector<1x128xf32> to vector<8x128xf32>
    %273 = arith.addf %271, %272 : vector<8x128xf32>
    %274 = arith.mulf %261, %273 : vector<8x128xf32>
    %275 = arith.addf %270, %274 : vector<8x128xf32>
    %276 = math.tanh %275 : vector<8x128xf32>
    %cst_70 = arith.constant 1.000000e+00 : f32
    %277 = vector.broadcast %cst_70 : f32 to vector<8x128xf32>
    %278 = arith.subf %277, %269 : vector<8x128xf32>
    %279 = arith.mulf %278, %276 : vector<8x128xf32>
    %280 = arith.mulf %269, %199 : vector<8x128xf32>
    %281 = arith.addf %279, %280 : vector<8x128xf32>
    %282 = vector.broadcast %208 : vector<8x1xf32> to vector<8x128xf32>
    %283 = arith.mulf %282, %281 : vector<8x128xf32>
    %cst_71 = arith.constant 1.000000e+00 : f32
    %284 = vector.broadcast %cst_71 : f32 to vector<8x1xf32>
    %285 = arith.subf %284, %208 : vector<8x1xf32>
    %286 = vector.broadcast %285 : vector<8x1xf32> to vector<8x128xf32>
    %287 = arith.mulf %286, %199 : vector<8x128xf32>
    %288 = arith.addf %283, %287 : vector<8x128xf32>
    %c3_i32 = arith.constant 3 : i32
    %c7_i32_72 = arith.constant 7 : i32
    %289 = arith.subi %c7_i32_72, %c3_i32 : i32
    %290 = vector.broadcast %c3_i32 : i32 to vector<8x1xi32>
    %291 = arith.cmpi slt, %290, %16 : vector<8x1xi32>
    %292 = arith.extui %291 : vector<8x1xi1> to vector<8x1xi32>
    %293 = arith.sitofp %292 : vector<8x1xi32> to vector<8x1xf32>
    %294 = vector.broadcast %289 : i32 to vector<8x1xi32>
    %295 = arith.cmpi slt, %294, %16 : vector<8x1xi32>
    %296 = arith.extui %295 : vector<8x1xi1> to vector<8x1xi32>
    %297 = arith.sitofp %296 : vector<8x1xi32> to vector<8x1xf32>
    %298 = arith.index_cast %c3_i32 : i32 to index
    %c0_73 = arith.constant 0 : index
    %c0_74 = arith.constant 0 : index
    %299 = vector.load %arg15[%298, %c0_73, %c0_74] : memref<8x8x384xf32, #tpu.memory_space<vmem>>, vector<1x8x384xf32>
    %300 = vector.shape_cast %299 : vector<1x8x384xf32> to vector<8x384xf32>
    %301 = arith.truncf %248 : vector<8x128xf32> to vector<8x128xbf16>
    %cst_75 = arith.constant dense<0.000000e+00> : vector<8x384xf32>
    %302 = tpu.matmul %301, %17, %cst_75 {dimension_numbers = #tpu.dot_dimension_numbers<[1], [0], [0], [1], [0, 0, 1, 1], [], []>} : vector<8x128xbf16>, vector<128x384xbf16>, vector<8x384xf32> -> vector<8x384xf32>
    %303 = vector.extract_strided_slice %300 {offsets = [0, 0], sizes = [8, 128], strides = [1, 1]} : vector<8x384xf32> to vector<8x128xf32>
    %304 = vector.extract_strided_slice %302 {offsets = [0, 0], sizes = [8, 128], strides = [1, 1]} : vector<8x384xf32> to vector<8x128xf32>
    %305 = arith.addf %303, %304 : vector<8x128xf32>
    %306 = arith.negf %305 : vector<8x128xf32>
    %307 = math.exp %306 : vector<8x128xf32>
    %cst_76 = arith.constant 1.000000e+00 : f32
    %308 = vector.broadcast %cst_76 : f32 to vector<8x128xf32>
    %309 = arith.addf %308, %307 : vector<8x128xf32>
    %310 = arith.divf %308, %309 : vector<8x128xf32>
    %311 = vector.extract_strided_slice %300 {offsets = [0, 128], sizes = [8, 128], strides = [1, 1]} : vector<8x384xf32> to vector<8x128xf32>
    %312 = vector.extract_strided_slice %302 {offsets = [0, 128], sizes = [8, 128], strides = [1, 1]} : vector<8x384xf32> to vector<8x128xf32>
    %313 = arith.addf %311, %312 : vector<8x128xf32>
    %314 = arith.negf %313 : vector<8x128xf32>
    %315 = math.exp %314 : vector<8x128xf32>
    %cst_77 = arith.constant 1.000000e+00 : f32
    %316 = vector.broadcast %cst_77 : f32 to vector<8x128xf32>
    %317 = arith.addf %316, %315 : vector<8x128xf32>
    %318 = arith.divf %316, %317 : vector<8x128xf32>
    %319 = vector.extract_strided_slice %300 {offsets = [0, 256], sizes = [8, 128], strides = [1, 1]} : vector<8x384xf32> to vector<8x128xf32>
    %320 = vector.extract_strided_slice %302 {offsets = [0, 256], sizes = [8, 128], strides = [1, 1]} : vector<8x384xf32> to vector<8x128xf32>
    %321 = vector.broadcast %19 : vector<1x128xf32> to vector<8x128xf32>
    %322 = arith.addf %320, %321 : vector<8x128xf32>
    %323 = arith.mulf %310, %322 : vector<8x128xf32>
    %324 = arith.addf %319, %323 : vector<8x128xf32>
    %325 = math.tanh %324 : vector<8x128xf32>
    %cst_78 = arith.constant 1.000000e+00 : f32
    %326 = vector.broadcast %cst_78 : f32 to vector<8x128xf32>
    %327 = arith.subf %326, %318 : vector<8x128xf32>
    %328 = arith.mulf %327, %325 : vector<8x128xf32>
    %329 = arith.mulf %318, %248 : vector<8x128xf32>
    %330 = arith.addf %328, %329 : vector<8x128xf32>
    %331 = vector.broadcast %293 : vector<8x1xf32> to vector<8x128xf32>
    %332 = arith.mulf %331, %330 : vector<8x128xf32>
    %cst_79 = arith.constant 1.000000e+00 : f32
    %333 = vector.broadcast %cst_79 : f32 to vector<8x1xf32>
    %334 = arith.subf %333, %293 : vector<8x1xf32>
    %335 = vector.broadcast %334 : vector<8x1xf32> to vector<8x128xf32>
    %336 = arith.mulf %335, %248 : vector<8x128xf32>
    %337 = arith.addf %332, %336 : vector<8x128xf32>
    %338 = arith.index_cast %289 : i32 to index
    %c0_80 = arith.constant 0 : index
    %c0_81 = arith.constant 0 : index
    %339 = vector.load %arg16[%338, %c0_80, %c0_81] : memref<8x8x384xf32, #tpu.memory_space<vmem>>, vector<1x8x384xf32>
    %340 = vector.shape_cast %339 : vector<1x8x384xf32> to vector<8x384xf32>
    %341 = arith.truncf %288 : vector<8x128xf32> to vector<8x128xbf16>
    %cst_82 = arith.constant dense<0.000000e+00> : vector<8x384xf32>
    %342 = tpu.matmul %341, %18, %cst_82 {dimension_numbers = #tpu.dot_dimension_numbers<[1], [0], [0], [1], [0, 0, 1, 1], [], []>} : vector<8x128xbf16>, vector<128x384xbf16>, vector<8x384xf32> -> vector<8x384xf32>
    %343 = vector.extract_strided_slice %340 {offsets = [0, 0], sizes = [8, 128], strides = [1, 1]} : vector<8x384xf32> to vector<8x128xf32>
    %344 = vector.extract_strided_slice %342 {offsets = [0, 0], sizes = [8, 128], strides = [1, 1]} : vector<8x384xf32> to vector<8x128xf32>
    %345 = arith.addf %343, %344 : vector<8x128xf32>
    %346 = arith.negf %345 : vector<8x128xf32>
    %347 = math.exp %346 : vector<8x128xf32>
    %cst_83 = arith.constant 1.000000e+00 : f32
    %348 = vector.broadcast %cst_83 : f32 to vector<8x128xf32>
    %349 = arith.addf %348, %347 : vector<8x128xf32>
    %350 = arith.divf %348, %349 : vector<8x128xf32>
    %351 = vector.extract_strided_slice %340 {offsets = [0, 128], sizes = [8, 128], strides = [1, 1]} : vector<8x384xf32> to vector<8x128xf32>
    %352 = vector.extract_strided_slice %342 {offsets = [0, 128], sizes = [8, 128], strides = [1, 1]} : vector<8x384xf32> to vector<8x128xf32>
    %353 = arith.addf %351, %352 : vector<8x128xf32>
    %354 = arith.negf %353 : vector<8x128xf32>
    %355 = math.exp %354 : vector<8x128xf32>
    %cst_84 = arith.constant 1.000000e+00 : f32
    %356 = vector.broadcast %cst_84 : f32 to vector<8x128xf32>
    %357 = arith.addf %356, %355 : vector<8x128xf32>
    %358 = arith.divf %356, %357 : vector<8x128xf32>
    %359 = vector.extract_strided_slice %340 {offsets = [0, 256], sizes = [8, 128], strides = [1, 1]} : vector<8x384xf32> to vector<8x128xf32>
    %360 = vector.extract_strided_slice %342 {offsets = [0, 256], sizes = [8, 128], strides = [1, 1]} : vector<8x384xf32> to vector<8x128xf32>
    %361 = vector.broadcast %20 : vector<1x128xf32> to vector<8x128xf32>
    %362 = arith.addf %360, %361 : vector<8x128xf32>
    %363 = arith.mulf %350, %362 : vector<8x128xf32>
    %364 = arith.addf %359, %363 : vector<8x128xf32>
    %365 = math.tanh %364 : vector<8x128xf32>
    %cst_85 = arith.constant 1.000000e+00 : f32
    %366 = vector.broadcast %cst_85 : f32 to vector<8x128xf32>
    %367 = arith.subf %366, %358 : vector<8x128xf32>
    %368 = arith.mulf %367, %365 : vector<8x128xf32>
    %369 = arith.mulf %358, %288 : vector<8x128xf32>
    %370 = arith.addf %368, %369 : vector<8x128xf32>
    %371 = vector.broadcast %297 : vector<8x1xf32> to vector<8x128xf32>
    %372 = arith.mulf %371, %370 : vector<8x128xf32>
    %cst_86 = arith.constant 1.000000e+00 : f32
    %373 = vector.broadcast %cst_86 : f32 to vector<8x1xf32>
    %374 = arith.subf %373, %297 : vector<8x1xf32>
    %375 = vector.broadcast %374 : vector<8x1xf32> to vector<8x128xf32>
    %376 = arith.mulf %375, %288 : vector<8x128xf32>
    %377 = arith.addf %372, %376 : vector<8x128xf32>
    %c4_i32 = arith.constant 4 : i32
    %c7_i32_87 = arith.constant 7 : i32
    %378 = arith.subi %c7_i32_87, %c4_i32 : i32
    %379 = vector.broadcast %c4_i32 : i32 to vector<8x1xi32>
    %380 = arith.cmpi slt, %379, %16 : vector<8x1xi32>
    %381 = arith.extui %380 : vector<8x1xi1> to vector<8x1xi32>
    %382 = arith.sitofp %381 : vector<8x1xi32> to vector<8x1xf32>
    %383 = vector.broadcast %378 : i32 to vector<8x1xi32>
    %384 = arith.cmpi slt, %383, %16 : vector<8x1xi32>
    %385 = arith.extui %384 : vector<8x1xi1> to vector<8x1xi32>
    %386 = arith.sitofp %385 : vector<8x1xi32> to vector<8x1xf32>
    %387 = arith.index_cast %c4_i32 : i32 to index
    %c0_88 = arith.constant 0 : index
    %c0_89 = arith.constant 0 : index
    %388 = vector.load %arg15[%387, %c0_88, %c0_89] : memref<8x8x384xf32, #tpu.memory_space<vmem>>, vector<1x8x384xf32>
    %389 = vector.shape_cast %388 : vector<1x8x384xf32> to vector<8x384xf32>
    %390 = arith.truncf %337 : vector<8x128xf32> to vector<8x128xbf16>
    %cst_90 = arith.constant dense<0.000000e+00> : vector<8x384xf32>
    %391 = tpu.matmul %390, %17, %cst_90 {dimension_numbers = #tpu.dot_dimension_numbers<[1], [0], [0], [1], [0, 0, 1, 1], [], []>} : vector<8x128xbf16>, vector<128x384xbf16>, vector<8x384xf32> -> vector<8x384xf32>
    %392 = vector.extract_strided_slice %389 {offsets = [0, 0], sizes = [8, 128], strides = [1, 1]} : vector<8x384xf32> to vector<8x128xf32>
    %393 = vector.extract_strided_slice %391 {offsets = [0, 0], sizes = [8, 128], strides = [1, 1]} : vector<8x384xf32> to vector<8x128xf32>
    %394 = arith.addf %392, %393 : vector<8x128xf32>
    %395 = arith.negf %394 : vector<8x128xf32>
    %396 = math.exp %395 : vector<8x128xf32>
    %cst_91 = arith.constant 1.000000e+00 : f32
    %397 = vector.broadcast %cst_91 : f32 to vector<8x128xf32>
    %398 = arith.addf %397, %396 : vector<8x128xf32>
    %399 = arith.divf %397, %398 : vector<8x128xf32>
    %400 = vector.extract_strided_slice %389 {offsets = [0, 128], sizes = [8, 128], strides = [1, 1]} : vector<8x384xf32> to vector<8x128xf32>
    %401 = vector.extract_strided_slice %391 {offsets = [0, 128], sizes = [8, 128], strides = [1, 1]} : vector<8x384xf32> to vector<8x128xf32>
    %402 = arith.addf %400, %401 : vector<8x128xf32>
    %403 = arith.negf %402 : vector<8x128xf32>
    %404 = math.exp %403 : vector<8x128xf32>
    %cst_92 = arith.constant 1.000000e+00 : f32
    %405 = vector.broadcast %cst_92 : f32 to vector<8x128xf32>
    %406 = arith.addf %405, %404 : vector<8x128xf32>
    %407 = arith.divf %405, %406 : vector<8x128xf32>
    %408 = vector.extract_strided_slice %389 {offsets = [0, 256], sizes = [8, 128], strides = [1, 1]} : vector<8x384xf32> to vector<8x128xf32>
    %409 = vector.extract_strided_slice %391 {offsets = [0, 256], sizes = [8, 128], strides = [1, 1]} : vector<8x384xf32> to vector<8x128xf32>
    %410 = vector.broadcast %19 : vector<1x128xf32> to vector<8x128xf32>
    %411 = arith.addf %409, %410 : vector<8x128xf32>
    %412 = arith.mulf %399, %411 : vector<8x128xf32>
    %413 = arith.addf %408, %412 : vector<8x128xf32>
    %414 = math.tanh %413 : vector<8x128xf32>
    %cst_93 = arith.constant 1.000000e+00 : f32
    %415 = vector.broadcast %cst_93 : f32 to vector<8x128xf32>
    %416 = arith.subf %415, %407 : vector<8x128xf32>
    %417 = arith.mulf %416, %414 : vector<8x128xf32>
    %418 = arith.mulf %407, %337 : vector<8x128xf32>
    %419 = arith.addf %417, %418 : vector<8x128xf32>
    %420 = vector.broadcast %382 : vector<8x1xf32> to vector<8x128xf32>
    %421 = arith.mulf %420, %419 : vector<8x128xf32>
    %cst_94 = arith.constant 1.000000e+00 : f32
    %422 = vector.broadcast %cst_94 : f32 to vector<8x1xf32>
    %423 = arith.subf %422, %382 : vector<8x1xf32>
    %424 = vector.broadcast %423 : vector<8x1xf32> to vector<8x128xf32>
    %425 = arith.mulf %424, %337 : vector<8x128xf32>
    %426 = arith.addf %421, %425 : vector<8x128xf32>
    %427 = arith.index_cast %378 : i32 to index
    %c0_95 = arith.constant 0 : index
    %c0_96 = arith.constant 0 : index
    %428 = vector.load %arg16[%427, %c0_95, %c0_96] : memref<8x8x384xf32, #tpu.memory_space<vmem>>, vector<1x8x384xf32>
    %429 = vector.shape_cast %428 : vector<1x8x384xf32> to vector<8x384xf32>
    %430 = arith.truncf %377 : vector<8x128xf32> to vector<8x128xbf16>
    %cst_97 = arith.constant dense<0.000000e+00> : vector<8x384xf32>
    %431 = tpu.matmul %430, %18, %cst_97 {dimension_numbers = #tpu.dot_dimension_numbers<[1], [0], [0], [1], [0, 0, 1, 1], [], []>} : vector<8x128xbf16>, vector<128x384xbf16>, vector<8x384xf32> -> vector<8x384xf32>
    %432 = vector.extract_strided_slice %429 {offsets = [0, 0], sizes = [8, 128], strides = [1, 1]} : vector<8x384xf32> to vector<8x128xf32>
    %433 = vector.extract_strided_slice %431 {offsets = [0, 0], sizes = [8, 128], strides = [1, 1]} : vector<8x384xf32> to vector<8x128xf32>
    %434 = arith.addf %432, %433 : vector<8x128xf32>
    %435 = arith.negf %434 : vector<8x128xf32>
    %436 = math.exp %435 : vector<8x128xf32>
    %cst_98 = arith.constant 1.000000e+00 : f32
    %437 = vector.broadcast %cst_98 : f32 to vector<8x128xf32>
    %438 = arith.addf %437, %436 : vector<8x128xf32>
    %439 = arith.divf %437, %438 : vector<8x128xf32>
    %440 = vector.extract_strided_slice %429 {offsets = [0, 128], sizes = [8, 128], strides = [1, 1]} : vector<8x384xf32> to vector<8x128xf32>
    %441 = vector.extract_strided_slice %431 {offsets = [0, 128], sizes = [8, 128], strides = [1, 1]} : vector<8x384xf32> to vector<8x128xf32>
    %442 = arith.addf %440, %441 : vector<8x128xf32>
    %443 = arith.negf %442 : vector<8x128xf32>
    %444 = math.exp %443 : vector<8x128xf32>
    %cst_99 = arith.constant 1.000000e+00 : f32
    %445 = vector.broadcast %cst_99 : f32 to vector<8x128xf32>
    %446 = arith.addf %445, %444 : vector<8x128xf32>
    %447 = arith.divf %445, %446 : vector<8x128xf32>
    %448 = vector.extract_strided_slice %429 {offsets = [0, 256], sizes = [8, 128], strides = [1, 1]} : vector<8x384xf32> to vector<8x128xf32>
    %449 = vector.extract_strided_slice %431 {offsets = [0, 256], sizes = [8, 128], strides = [1, 1]} : vector<8x384xf32> to vector<8x128xf32>
    %450 = vector.broadcast %20 : vector<1x128xf32> to vector<8x128xf32>
    %451 = arith.addf %449, %450 : vector<8x128xf32>
    %452 = arith.mulf %439, %451 : vector<8x128xf32>
    %453 = arith.addf %448, %452 : vector<8x128xf32>
    %454 = math.tanh %453 : vector<8x128xf32>
    %cst_100 = arith.constant 1.000000e+00 : f32
    %455 = vector.broadcast %cst_100 : f32 to vector<8x128xf32>
    %456 = arith.subf %455, %447 : vector<8x128xf32>
    %457 = arith.mulf %456, %454 : vector<8x128xf32>
    %458 = arith.mulf %447, %377 : vector<8x128xf32>
    %459 = arith.addf %457, %458 : vector<8x128xf32>
    %460 = vector.broadcast %386 : vector<8x1xf32> to vector<8x128xf32>
    %461 = arith.mulf %460, %459 : vector<8x128xf32>
    %cst_101 = arith.constant 1.000000e+00 : f32
    %462 = vector.broadcast %cst_101 : f32 to vector<8x1xf32>
    %463 = arith.subf %462, %386 : vector<8x1xf32>
    %464 = vector.broadcast %463 : vector<8x1xf32> to vector<8x128xf32>
    %465 = arith.mulf %464, %377 : vector<8x128xf32>
    %466 = arith.addf %461, %465 : vector<8x128xf32>
    %c5_i32 = arith.constant 5 : i32
    %c7_i32_102 = arith.constant 7 : i32
    %467 = arith.subi %c7_i32_102, %c5_i32 : i32
    %468 = vector.broadcast %c5_i32 : i32 to vector<8x1xi32>
    %469 = arith.cmpi slt, %468, %16 : vector<8x1xi32>
    %470 = arith.extui %469 : vector<8x1xi1> to vector<8x1xi32>
    %471 = arith.sitofp %470 : vector<8x1xi32> to vector<8x1xf32>
    %472 = vector.broadcast %467 : i32 to vector<8x1xi32>
    %473 = arith.cmpi slt, %472, %16 : vector<8x1xi32>
    %474 = arith.extui %473 : vector<8x1xi1> to vector<8x1xi32>
    %475 = arith.sitofp %474 : vector<8x1xi32> to vector<8x1xf32>
    %476 = arith.index_cast %c5_i32 : i32 to index
    %c0_103 = arith.constant 0 : index
    %c0_104 = arith.constant 0 : index
    %477 = vector.load %arg15[%476, %c0_103, %c0_104] : memref<8x8x384xf32, #tpu.memory_space<vmem>>, vector<1x8x384xf32>
    %478 = vector.shape_cast %477 : vector<1x8x384xf32> to vector<8x384xf32>
    %479 = arith.truncf %426 : vector<8x128xf32> to vector<8x128xbf16>
    %cst_105 = arith.constant dense<0.000000e+00> : vector<8x384xf32>
    %480 = tpu.matmul %479, %17, %cst_105 {dimension_numbers = #tpu.dot_dimension_numbers<[1], [0], [0], [1], [0, 0, 1, 1], [], []>} : vector<8x128xbf16>, vector<128x384xbf16>, vector<8x384xf32> -> vector<8x384xf32>
    %481 = vector.extract_strided_slice %478 {offsets = [0, 0], sizes = [8, 128], strides = [1, 1]} : vector<8x384xf32> to vector<8x128xf32>
    %482 = vector.extract_strided_slice %480 {offsets = [0, 0], sizes = [8, 128], strides = [1, 1]} : vector<8x384xf32> to vector<8x128xf32>
    %483 = arith.addf %481, %482 : vector<8x128xf32>
    %484 = arith.negf %483 : vector<8x128xf32>
    %485 = math.exp %484 : vector<8x128xf32>
    %cst_106 = arith.constant 1.000000e+00 : f32
    %486 = vector.broadcast %cst_106 : f32 to vector<8x128xf32>
    %487 = arith.addf %486, %485 : vector<8x128xf32>
    %488 = arith.divf %486, %487 : vector<8x128xf32>
    %489 = vector.extract_strided_slice %478 {offsets = [0, 128], sizes = [8, 128], strides = [1, 1]} : vector<8x384xf32> to vector<8x128xf32>
    %490 = vector.extract_strided_slice %480 {offsets = [0, 128], sizes = [8, 128], strides = [1, 1]} : vector<8x384xf32> to vector<8x128xf32>
    %491 = arith.addf %489, %490 : vector<8x128xf32>
    %492 = arith.negf %491 : vector<8x128xf32>
    %493 = math.exp %492 : vector<8x128xf32>
    %cst_107 = arith.constant 1.000000e+00 : f32
    %494 = vector.broadcast %cst_107 : f32 to vector<8x128xf32>
    %495 = arith.addf %494, %493 : vector<8x128xf32>
    %496 = arith.divf %494, %495 : vector<8x128xf32>
    %497 = vector.extract_strided_slice %478 {offsets = [0, 256], sizes = [8, 128], strides = [1, 1]} : vector<8x384xf32> to vector<8x128xf32>
    %498 = vector.extract_strided_slice %480 {offsets = [0, 256], sizes = [8, 128], strides = [1, 1]} : vector<8x384xf32> to vector<8x128xf32>
    %499 = vector.broadcast %19 : vector<1x128xf32> to vector<8x128xf32>
    %500 = arith.addf %498, %499 : vector<8x128xf32>
    %501 = arith.mulf %488, %500 : vector<8x128xf32>
    %502 = arith.addf %497, %501 : vector<8x128xf32>
    %503 = math.tanh %502 : vector<8x128xf32>
    %cst_108 = arith.constant 1.000000e+00 : f32
    %504 = vector.broadcast %cst_108 : f32 to vector<8x128xf32>
    %505 = arith.subf %504, %496 : vector<8x128xf32>
    %506 = arith.mulf %505, %503 : vector<8x128xf32>
    %507 = arith.mulf %496, %426 : vector<8x128xf32>
    %508 = arith.addf %506, %507 : vector<8x128xf32>
    %509 = vector.broadcast %471 : vector<8x1xf32> to vector<8x128xf32>
    %510 = arith.mulf %509, %508 : vector<8x128xf32>
    %cst_109 = arith.constant 1.000000e+00 : f32
    %511 = vector.broadcast %cst_109 : f32 to vector<8x1xf32>
    %512 = arith.subf %511, %471 : vector<8x1xf32>
    %513 = vector.broadcast %512 : vector<8x1xf32> to vector<8x128xf32>
    %514 = arith.mulf %513, %426 : vector<8x128xf32>
    %515 = arith.addf %510, %514 : vector<8x128xf32>
    %516 = arith.index_cast %467 : i32 to index
    %c0_110 = arith.constant 0 : index
    %c0_111 = arith.constant 0 : index
    %517 = vector.load %arg16[%516, %c0_110, %c0_111] : memref<8x8x384xf32, #tpu.memory_space<vmem>>, vector<1x8x384xf32>
    %518 = vector.shape_cast %517 : vector<1x8x384xf32> to vector<8x384xf32>
    %519 = arith.truncf %466 : vector<8x128xf32> to vector<8x128xbf16>
    %cst_112 = arith.constant dense<0.000000e+00> : vector<8x384xf32>
    %520 = tpu.matmul %519, %18, %cst_112 {dimension_numbers = #tpu.dot_dimension_numbers<[1], [0], [0], [1], [0, 0, 1, 1], [], []>} : vector<8x128xbf16>, vector<128x384xbf16>, vector<8x384xf32> -> vector<8x384xf32>
    %521 = vector.extract_strided_slice %518 {offsets = [0, 0], sizes = [8, 128], strides = [1, 1]} : vector<8x384xf32> to vector<8x128xf32>
    %522 = vector.extract_strided_slice %520 {offsets = [0, 0], sizes = [8, 128], strides = [1, 1]} : vector<8x384xf32> to vector<8x128xf32>
    %523 = arith.addf %521, %522 : vector<8x128xf32>
    %524 = arith.negf %523 : vector<8x128xf32>
    %525 = math.exp %524 : vector<8x128xf32>
    %cst_113 = arith.constant 1.000000e+00 : f32
    %526 = vector.broadcast %cst_113 : f32 to vector<8x128xf32>
    %527 = arith.addf %526, %525 : vector<8x128xf32>
    %528 = arith.divf %526, %527 : vector<8x128xf32>
    %529 = vector.extract_strided_slice %518 {offsets = [0, 128], sizes = [8, 128], strides = [1, 1]} : vector<8x384xf32> to vector<8x128xf32>
    %530 = vector.extract_strided_slice %520 {offsets = [0, 128], sizes = [8, 128], strides = [1, 1]} : vector<8x384xf32> to vector<8x128xf32>
    %531 = arith.addf %529, %530 : vector<8x128xf32>
    %532 = arith.negf %531 : vector<8x128xf32>
    %533 = math.exp %532 : vector<8x128xf32>
    %cst_114 = arith.constant 1.000000e+00 : f32
    %534 = vector.broadcast %cst_114 : f32 to vector<8x128xf32>
    %535 = arith.addf %534, %533 : vector<8x128xf32>
    %536 = arith.divf %534, %535 : vector<8x128xf32>
    %537 = vector.extract_strided_slice %518 {offsets = [0, 256], sizes = [8, 128], strides = [1, 1]} : vector<8x384xf32> to vector<8x128xf32>
    %538 = vector.extract_strided_slice %520 {offsets = [0, 256], sizes = [8, 128], strides = [1, 1]} : vector<8x384xf32> to vector<8x128xf32>
    %539 = vector.broadcast %20 : vector<1x128xf32> to vector<8x128xf32>
    %540 = arith.addf %538, %539 : vector<8x128xf32>
    %541 = arith.mulf %528, %540 : vector<8x128xf32>
    %542 = arith.addf %537, %541 : vector<8x128xf32>
    %543 = math.tanh %542 : vector<8x128xf32>
    %cst_115 = arith.constant 1.000000e+00 : f32
    %544 = vector.broadcast %cst_115 : f32 to vector<8x128xf32>
    %545 = arith.subf %544, %536 : vector<8x128xf32>
    %546 = arith.mulf %545, %543 : vector<8x128xf32>
    %547 = arith.mulf %536, %466 : vector<8x128xf32>
    %548 = arith.addf %546, %547 : vector<8x128xf32>
    %549 = vector.broadcast %475 : vector<8x1xf32> to vector<8x128xf32>
    %550 = arith.mulf %549, %548 : vector<8x128xf32>
    %cst_116 = arith.constant 1.000000e+00 : f32
    %551 = vector.broadcast %cst_116 : f32 to vector<8x1xf32>
    %552 = arith.subf %551, %475 : vector<8x1xf32>
    %553 = vector.broadcast %552 : vector<8x1xf32> to vector<8x128xf32>
    %554 = arith.mulf %553, %466 : vector<8x128xf32>
    %555 = arith.addf %550, %554 : vector<8x128xf32>
    %c6_i32 = arith.constant 6 : i32
    %c7_i32_117 = arith.constant 7 : i32
    %556 = arith.subi %c7_i32_117, %c6_i32 : i32
    %557 = vector.broadcast %c6_i32 : i32 to vector<8x1xi32>
    %558 = arith.cmpi slt, %557, %16 : vector<8x1xi32>
    %559 = arith.extui %558 : vector<8x1xi1> to vector<8x1xi32>
    %560 = arith.sitofp %559 : vector<8x1xi32> to vector<8x1xf32>
    %561 = vector.broadcast %556 : i32 to vector<8x1xi32>
    %562 = arith.cmpi slt, %561, %16 : vector<8x1xi32>
    %563 = arith.extui %562 : vector<8x1xi1> to vector<8x1xi32>
    %564 = arith.sitofp %563 : vector<8x1xi32> to vector<8x1xf32>
    %565 = arith.index_cast %c6_i32 : i32 to index
    %c0_118 = arith.constant 0 : index
    %c0_119 = arith.constant 0 : index
    %566 = vector.load %arg15[%565, %c0_118, %c0_119] : memref<8x8x384xf32, #tpu.memory_space<vmem>>, vector<1x8x384xf32>
    %567 = vector.shape_cast %566 : vector<1x8x384xf32> to vector<8x384xf32>
    %568 = arith.truncf %515 : vector<8x128xf32> to vector<8x128xbf16>
    %cst_120 = arith.constant dense<0.000000e+00> : vector<8x384xf32>
    %569 = tpu.matmul %568, %17, %cst_120 {dimension_numbers = #tpu.dot_dimension_numbers<[1], [0], [0], [1], [0, 0, 1, 1], [], []>} : vector<8x128xbf16>, vector<128x384xbf16>, vector<8x384xf32> -> vector<8x384xf32>
    %570 = vector.extract_strided_slice %567 {offsets = [0, 0], sizes = [8, 128], strides = [1, 1]} : vector<8x384xf32> to vector<8x128xf32>
    %571 = vector.extract_strided_slice %569 {offsets = [0, 0], sizes = [8, 128], strides = [1, 1]} : vector<8x384xf32> to vector<8x128xf32>
    %572 = arith.addf %570, %571 : vector<8x128xf32>
    %573 = arith.negf %572 : vector<8x128xf32>
    %574 = math.exp %573 : vector<8x128xf32>
    %cst_121 = arith.constant 1.000000e+00 : f32
    %575 = vector.broadcast %cst_121 : f32 to vector<8x128xf32>
    %576 = arith.addf %575, %574 : vector<8x128xf32>
    %577 = arith.divf %575, %576 : vector<8x128xf32>
    %578 = vector.extract_strided_slice %567 {offsets = [0, 128], sizes = [8, 128], strides = [1, 1]} : vector<8x384xf32> to vector<8x128xf32>
    %579 = vector.extract_strided_slice %569 {offsets = [0, 128], sizes = [8, 128], strides = [1, 1]} : vector<8x384xf32> to vector<8x128xf32>
    %580 = arith.addf %578, %579 : vector<8x128xf32>
    %581 = arith.negf %580 : vector<8x128xf32>
    %582 = math.exp %581 : vector<8x128xf32>
    %cst_122 = arith.constant 1.000000e+00 : f32
    %583 = vector.broadcast %cst_122 : f32 to vector<8x128xf32>
    %584 = arith.addf %583, %582 : vector<8x128xf32>
    %585 = arith.divf %583, %584 : vector<8x128xf32>
    %586 = vector.extract_strided_slice %567 {offsets = [0, 256], sizes = [8, 128], strides = [1, 1]} : vector<8x384xf32> to vector<8x128xf32>
    %587 = vector.extract_strided_slice %569 {offsets = [0, 256], sizes = [8, 128], strides = [1, 1]} : vector<8x384xf32> to vector<8x128xf32>
    %588 = vector.broadcast %19 : vector<1x128xf32> to vector<8x128xf32>
    %589 = arith.addf %587, %588 : vector<8x128xf32>
    %590 = arith.mulf %577, %589 : vector<8x128xf32>
    %591 = arith.addf %586, %590 : vector<8x128xf32>
    %592 = math.tanh %591 : vector<8x128xf32>
    %cst_123 = arith.constant 1.000000e+00 : f32
    %593 = vector.broadcast %cst_123 : f32 to vector<8x128xf32>
    %594 = arith.subf %593, %585 : vector<8x128xf32>
    %595 = arith.mulf %594, %592 : vector<8x128xf32>
    %596 = arith.mulf %585, %515 : vector<8x128xf32>
    %597 = arith.addf %595, %596 : vector<8x128xf32>
    %598 = vector.broadcast %560 : vector<8x1xf32> to vector<8x128xf32>
    %599 = arith.mulf %598, %597 : vector<8x128xf32>
    %cst_124 = arith.constant 1.000000e+00 : f32
    %600 = vector.broadcast %cst_124 : f32 to vector<8x1xf32>
    %601 = arith.subf %600, %560 : vector<8x1xf32>
    %602 = vector.broadcast %601 : vector<8x1xf32> to vector<8x128xf32>
    %603 = arith.mulf %602, %515 : vector<8x128xf32>
    %604 = arith.addf %599, %603 : vector<8x128xf32>
    %605 = arith.index_cast %556 : i32 to index
    %c0_125 = arith.constant 0 : index
    %c0_126 = arith.constant 0 : index
    %606 = vector.load %arg16[%605, %c0_125, %c0_126] : memref<8x8x384xf32, #tpu.memory_space<vmem>>, vector<1x8x384xf32>
    %607 = vector.shape_cast %606 : vector<1x8x384xf32> to vector<8x384xf32>
    %608 = arith.truncf %555 : vector<8x128xf32> to vector<8x128xbf16>
    %cst_127 = arith.constant dense<0.000000e+00> : vector<8x384xf32>
    %609 = tpu.matmul %608, %18, %cst_127 {dimension_numbers = #tpu.dot_dimension_numbers<[1], [0], [0], [1], [0, 0, 1, 1], [], []>} : vector<8x128xbf16>, vector<128x384xbf16>, vector<8x384xf32> -> vector<8x384xf32>
    %610 = vector.extract_strided_slice %607 {offsets = [0, 0], sizes = [8, 128], strides = [1, 1]} : vector<8x384xf32> to vector<8x128xf32>
    %611 = vector.extract_strided_slice %609 {offsets = [0, 0], sizes = [8, 128], strides = [1, 1]} : vector<8x384xf32> to vector<8x128xf32>
    %612 = arith.addf %610, %611 : vector<8x128xf32>
    %613 = arith.negf %612 : vector<8x128xf32>
    %614 = math.exp %613 : vector<8x128xf32>
    %cst_128 = arith.constant 1.000000e+00 : f32
    %615 = vector.broadcast %cst_128 : f32 to vector<8x128xf32>
    %616 = arith.addf %615, %614 : vector<8x128xf32>
    %617 = arith.divf %615, %616 : vector<8x128xf32>
    %618 = vector.extract_strided_slice %607 {offsets = [0, 128], sizes = [8, 128], strides = [1, 1]} : vector<8x384xf32> to vector<8x128xf32>
    %619 = vector.extract_strided_slice %609 {offsets = [0, 128], sizes = [8, 128], strides = [1, 1]} : vector<8x384xf32> to vector<8x128xf32>
    %620 = arith.addf %618, %619 : vector<8x128xf32>
    %621 = arith.negf %620 : vector<8x128xf32>
    %622 = math.exp %621 : vector<8x128xf32>
    %cst_129 = arith.constant 1.000000e+00 : f32
    %623 = vector.broadcast %cst_129 : f32 to vector<8x128xf32>
    %624 = arith.addf %623, %622 : vector<8x128xf32>
    %625 = arith.divf %623, %624 : vector<8x128xf32>
    %626 = vector.extract_strided_slice %607 {offsets = [0, 256], sizes = [8, 128], strides = [1, 1]} : vector<8x384xf32> to vector<8x128xf32>
    %627 = vector.extract_strided_slice %609 {offsets = [0, 256], sizes = [8, 128], strides = [1, 1]} : vector<8x384xf32> to vector<8x128xf32>
    %628 = vector.broadcast %20 : vector<1x128xf32> to vector<8x128xf32>
    %629 = arith.addf %627, %628 : vector<8x128xf32>
    %630 = arith.mulf %617, %629 : vector<8x128xf32>
    %631 = arith.addf %626, %630 : vector<8x128xf32>
    %632 = math.tanh %631 : vector<8x128xf32>
    %cst_130 = arith.constant 1.000000e+00 : f32
    %633 = vector.broadcast %cst_130 : f32 to vector<8x128xf32>
    %634 = arith.subf %633, %625 : vector<8x128xf32>
    %635 = arith.mulf %634, %632 : vector<8x128xf32>
    %636 = arith.mulf %625, %555 : vector<8x128xf32>
    %637 = arith.addf %635, %636 : vector<8x128xf32>
    %638 = vector.broadcast %564 : vector<8x1xf32> to vector<8x128xf32>
    %639 = arith.mulf %638, %637 : vector<8x128xf32>
    %cst_131 = arith.constant 1.000000e+00 : f32
    %640 = vector.broadcast %cst_131 : f32 to vector<8x1xf32>
    %641 = arith.subf %640, %564 : vector<8x1xf32>
    %642 = vector.broadcast %641 : vector<8x1xf32> to vector<8x128xf32>
    %643 = arith.mulf %642, %555 : vector<8x128xf32>
    %644 = arith.addf %639, %643 : vector<8x128xf32>
    %c7_i32_132 = arith.constant 7 : i32
    %c7_i32_133 = arith.constant 7 : i32
    %645 = arith.subi %c7_i32_133, %c7_i32_132 : i32
    %646 = vector.broadcast %c7_i32_132 : i32 to vector<8x1xi32>
    %647 = arith.cmpi slt, %646, %16 : vector<8x1xi32>
    %648 = arith.extui %647 : vector<8x1xi1> to vector<8x1xi32>
    %649 = arith.sitofp %648 : vector<8x1xi32> to vector<8x1xf32>
    %650 = vector.broadcast %645 : i32 to vector<8x1xi32>
    %651 = arith.cmpi slt, %650, %16 : vector<8x1xi32>
    %652 = arith.extui %651 : vector<8x1xi1> to vector<8x1xi32>
    %653 = arith.sitofp %652 : vector<8x1xi32> to vector<8x1xf32>
    %654 = arith.index_cast %c7_i32_132 : i32 to index
    %c0_134 = arith.constant 0 : index
    %c0_135 = arith.constant 0 : index
    %655 = vector.load %arg15[%654, %c0_134, %c0_135] : memref<8x8x384xf32, #tpu.memory_space<vmem>>, vector<1x8x384xf32>
    %656 = vector.shape_cast %655 : vector<1x8x384xf32> to vector<8x384xf32>
    %657 = arith.truncf %604 : vector<8x128xf32> to vector<8x128xbf16>
    %cst_136 = arith.constant dense<0.000000e+00> : vector<8x384xf32>
    %658 = tpu.matmul %657, %17, %cst_136 {dimension_numbers = #tpu.dot_dimension_numbers<[1], [0], [0], [1], [0, 0, 1, 1], [], []>} : vector<8x128xbf16>, vector<128x384xbf16>, vector<8x384xf32> -> vector<8x384xf32>
    %659 = vector.extract_strided_slice %656 {offsets = [0, 0], sizes = [8, 128], strides = [1, 1]} : vector<8x384xf32> to vector<8x128xf32>
    %660 = vector.extract_strided_slice %658 {offsets = [0, 0], sizes = [8, 128], strides = [1, 1]} : vector<8x384xf32> to vector<8x128xf32>
    %661 = arith.addf %659, %660 : vector<8x128xf32>
    %662 = arith.negf %661 : vector<8x128xf32>
    %663 = math.exp %662 : vector<8x128xf32>
    %cst_137 = arith.constant 1.000000e+00 : f32
    %664 = vector.broadcast %cst_137 : f32 to vector<8x128xf32>
    %665 = arith.addf %664, %663 : vector<8x128xf32>
    %666 = arith.divf %664, %665 : vector<8x128xf32>
    %667 = vector.extract_strided_slice %656 {offsets = [0, 128], sizes = [8, 128], strides = [1, 1]} : vector<8x384xf32> to vector<8x128xf32>
    %668 = vector.extract_strided_slice %658 {offsets = [0, 128], sizes = [8, 128], strides = [1, 1]} : vector<8x384xf32> to vector<8x128xf32>
    %669 = arith.addf %667, %668 : vector<8x128xf32>
    %670 = arith.negf %669 : vector<8x128xf32>
    %671 = math.exp %670 : vector<8x128xf32>
    %cst_138 = arith.constant 1.000000e+00 : f32
    %672 = vector.broadcast %cst_138 : f32 to vector<8x128xf32>
    %673 = arith.addf %672, %671 : vector<8x128xf32>
    %674 = arith.divf %672, %673 : vector<8x128xf32>
    %675 = vector.extract_strided_slice %656 {offsets = [0, 256], sizes = [8, 128], strides = [1, 1]} : vector<8x384xf32> to vector<8x128xf32>
    %676 = vector.extract_strided_slice %658 {offsets = [0, 256], sizes = [8, 128], strides = [1, 1]} : vector<8x384xf32> to vector<8x128xf32>
    %677 = vector.broadcast %19 : vector<1x128xf32> to vector<8x128xf32>
    %678 = arith.addf %676, %677 : vector<8x128xf32>
    %679 = arith.mulf %666, %678 : vector<8x128xf32>
    %680 = arith.addf %675, %679 : vector<8x128xf32>
    %681 = math.tanh %680 : vector<8x128xf32>
    %cst_139 = arith.constant 1.000000e+00 : f32
    %682 = vector.broadcast %cst_139 : f32 to vector<8x128xf32>
    %683 = arith.subf %682, %674 : vector<8x128xf32>
    %684 = arith.mulf %683, %681 : vector<8x128xf32>
    %685 = arith.mulf %674, %604 : vector<8x128xf32>
    %686 = arith.addf %684, %685 : vector<8x128xf32>
    %687 = vector.broadcast %649 : vector<8x1xf32> to vector<8x128xf32>
    %688 = arith.mulf %687, %686 : vector<8x128xf32>
    %cst_140 = arith.constant 1.000000e+00 : f32
    %689 = vector.broadcast %cst_140 : f32 to vector<8x1xf32>
    %690 = arith.subf %689, %649 : vector<8x1xf32>
    %691 = vector.broadcast %690 : vector<8x1xf32> to vector<8x128xf32>
    %692 = arith.mulf %691, %604 : vector<8x128xf32>
    %693 = arith.addf %688, %692 : vector<8x128xf32>
    %694 = arith.index_cast %645 : i32 to index
    %c0_141 = arith.constant 0 : index
    %c0_142 = arith.constant 0 : index
    %695 = vector.load %arg16[%694, %c0_141, %c0_142] : memref<8x8x384xf32, #tpu.memory_space<vmem>>, vector<1x8x384xf32>
    %696 = vector.shape_cast %695 : vector<1x8x384xf32> to vector<8x384xf32>
    %697 = arith.truncf %644 : vector<8x128xf32> to vector<8x128xbf16>
    %cst_143 = arith.constant dense<0.000000e+00> : vector<8x384xf32>
    %698 = tpu.matmul %697, %18, %cst_143 {dimension_numbers = #tpu.dot_dimension_numbers<[1], [0], [0], [1], [0, 0, 1, 1], [], []>} : vector<8x128xbf16>, vector<128x384xbf16>, vector<8x384xf32> -> vector<8x384xf32>
    %699 = vector.extract_strided_slice %696 {offsets = [0, 0], sizes = [8, 128], strides = [1, 1]} : vector<8x384xf32> to vector<8x128xf32>
    %700 = vector.extract_strided_slice %698 {offsets = [0, 0], sizes = [8, 128], strides = [1, 1]} : vector<8x384xf32> to vector<8x128xf32>
    %701 = arith.addf %699, %700 : vector<8x128xf32>
    %702 = arith.negf %701 : vector<8x128xf32>
    %703 = math.exp %702 : vector<8x128xf32>
    %cst_144 = arith.constant 1.000000e+00 : f32
    %704 = vector.broadcast %cst_144 : f32 to vector<8x128xf32>
    %705 = arith.addf %704, %703 : vector<8x128xf32>
    %706 = arith.divf %704, %705 : vector<8x128xf32>
    %707 = vector.extract_strided_slice %696 {offsets = [0, 128], sizes = [8, 128], strides = [1, 1]} : vector<8x384xf32> to vector<8x128xf32>
    %708 = vector.extract_strided_slice %698 {offsets = [0, 128], sizes = [8, 128], strides = [1, 1]} : vector<8x384xf32> to vector<8x128xf32>
    %709 = arith.addf %707, %708 : vector<8x128xf32>
    %710 = arith.negf %709 : vector<8x128xf32>
    %711 = math.exp %710 : vector<8x128xf32>
    %cst_145 = arith.constant 1.000000e+00 : f32
    %712 = vector.broadcast %cst_145 : f32 to vector<8x128xf32>
    %713 = arith.addf %712, %711 : vector<8x128xf32>
    %714 = arith.divf %712, %713 : vector<8x128xf32>
    %715 = vector.extract_strided_slice %696 {offsets = [0, 256], sizes = [8, 128], strides = [1, 1]} : vector<8x384xf32> to vector<8x128xf32>
    %716 = vector.extract_strided_slice %698 {offsets = [0, 256], sizes = [8, 128], strides = [1, 1]} : vector<8x384xf32> to vector<8x128xf32>
    %717 = vector.broadcast %20 : vector<1x128xf32> to vector<8x128xf32>
    %718 = arith.addf %716, %717 : vector<8x128xf32>
    %719 = arith.mulf %706, %718 : vector<8x128xf32>
    %720 = arith.addf %715, %719 : vector<8x128xf32>
    %721 = math.tanh %720 : vector<8x128xf32>
    %cst_146 = arith.constant 1.000000e+00 : f32
    %722 = vector.broadcast %cst_146 : f32 to vector<8x128xf32>
    %723 = arith.subf %722, %714 : vector<8x128xf32>
    %724 = arith.mulf %723, %721 : vector<8x128xf32>
    %725 = arith.mulf %714, %644 : vector<8x128xf32>
    %726 = arith.addf %724, %725 : vector<8x128xf32>
    %727 = vector.broadcast %653 : vector<8x1xf32> to vector<8x128xf32>
    %728 = arith.mulf %727, %726 : vector<8x128xf32>
    %cst_147 = arith.constant 1.000000e+00 : f32
    %729 = vector.broadcast %cst_147 : f32 to vector<8x1xf32>
    %730 = arith.subf %729, %653 : vector<8x1xf32>
    %731 = vector.broadcast %730 : vector<8x1xf32> to vector<8x128xf32>
    %732 = arith.mulf %731, %644 : vector<8x128xf32>
    %733 = arith.addf %728, %732 : vector<8x128xf32>
    %c8_i32 = arith.constant 8 : i32
    %c0_148 = arith.constant 0 : index
    %c0_149 = arith.constant 0 : index
    %734 = vector.load %arg12[%c0_148, %c0_149] : memref<128x128xbf16, #tpu.memory_space<vmem>>, vector<128x128xbf16>
    %c0_150 = arith.constant 0 : index
    %c0_151 = arith.constant 0 : index
    %735 = vector.load %arg11[%c0_150, %c0_151] : memref<128x128xbf16, #tpu.memory_space<vmem>>, vector<128x128xbf16>
    %736 = arith.truncf %733 : vector<8x128xf32> to vector<8x128xbf16>
    %cst_152 = arith.constant dense<0.000000e+00> : vector<8x128xf32>
    %737 = tpu.matmul %736, %734, %cst_152 {dimension_numbers = #tpu.dot_dimension_numbers<[1], [0], [0], [1], [0, 0, 1, 1], [], []>} : vector<8x128xbf16>, vector<128x128xbf16>, vector<8x128xf32> -> vector<8x128xf32>
    %738 = arith.truncf %693 : vector<8x128xf32> to vector<8x128xbf16>
    %cst_153 = arith.constant dense<0.000000e+00> : vector<8x128xf32>
    %739 = tpu.matmul %738, %735, %cst_153 {dimension_numbers = #tpu.dot_dimension_numbers<[1], [0], [0], [1], [0, 0, 1, 1], [], []>} : vector<8x128xbf16>, vector<128x128xbf16>, vector<8x128xf32> -> vector<8x128xf32>
    %740 = arith.addf %737, %739 : vector<8x128xf32>
    %c0_154 = arith.constant 0 : index
    %c0_155 = arith.constant 0 : index
    %741 = vector.load %arg13[%c0_154, %c0_155] : memref<1x128xf32, #tpu.memory_space<vmem>>, vector<1x128xf32>
    %742 = vector.broadcast %741 : vector<1x128xf32> to vector<8x128xf32>
    %743 = arith.addf %740, %742 : vector<8x128xf32>
    %c0_156 = arith.constant 0 : index
    %c0_157 = arith.constant 0 : index
    %744 = vector.load %arg14[%c0_156, %c0_157] : memref<8x128xf32, #tpu.memory_space<vmem>>, vector<8x128xf32>
    tpu.vector_store %arg14[%c0_156, %c0_157], %743 {strides = array<i32>} : memref<8x128xf32, #tpu.memory_space<vmem>>, vector<8x128xf32>,
    return
  }
  func.func @transform_0(%arg0: i32) -> (i32, i32, i32) {
    %c0_i32 = arith.constant 0 : i32
    %c0_i32_0 = arith.constant 0 : i32
    %c0_i32_1 = arith.constant 0 : i32
    return %c0_i32, %arg0, %c0_i32_0 : i32, i32, i32
  }
  func.func @transform_1(%arg0: i32) -> (i32, i32) {
    %c0_i32 = arith.constant 0 : i32
    %c0_i32_0 = arith.constant 0 : i32
    return %arg0, %c0_i32 : i32, i32
  }
  func.func @transform_2(%arg0: i32) -> (i32, i32) {
    %c0_i32 = arith.constant 0 : i32
    %c0_i32_0 = arith.constant 0 : i32
    %c0_i32_1 = arith.constant 0 : i32
    return %c0_i32, %c0_i32_0 : i32, i32
  }
  func.func @transform_3(%arg0: i32) -> (i32, i32) {
    %c0_i32 = arith.constant 0 : i32
    %c0_i32_0 = arith.constant 0 : i32
    %c0_i32_1 = arith.constant 0 : i32
    return %c0_i32, %c0_i32_0 : i32, i32
  }
  func.func @transform_4(%arg0: i32) -> (i32, i32) {
    %c0_i32 = arith.constant 0 : i32
    %c0_i32_0 = arith.constant 0 : i32
    %c0_i32_1 = arith.constant 0 : i32
    return %c0_i32, %c0_i32_0 : i32, i32
  }
  func.func @transform_5(%arg0: i32) -> (i32, i32) {
    %c0_i32 = arith.constant 0 : i32
    %c0_i32_0 = arith.constant 0 : i32
    %c0_i32_1 = arith.constant 0 : i32
    return %c0_i32, %c0_i32_0 : i32, i32
  }
  func.func @transform_6(%arg0: i32) -> (i32, i32) {
    %c0_i32 = arith.constant 0 : i32
    %c0_i32_0 = arith.constant 0 : i32
    %c0_i32_1 = arith.constant 0 : i32
    return %c0_i32, %c0_i32_0 : i32, i32
  }
  func.func @transform_7(%arg0: i32) -> (i32, i32) {
    %c0_i32 = arith.constant 0 : i32
    %c0_i32_0 = arith.constant 0 : i32
    %c0_i32_1 = arith.constant 0 : i32
    return %c0_i32, %c0_i32_0 : i32, i32
  }
  func.func @transform_8(%arg0: i32) -> (i32, i32) {
    %c0_i32 = arith.constant 0 : i32
    %c0_i32_0 = arith.constant 0 : i32
    %c0_i32_1 = arith.constant 0 : i32
    return %c0_i32, %c0_i32_0 : i32, i32
  }
  func.func @transform_9(%arg0: i32) -> (i32, i32) {
    %c0_i32 = arith.constant 0 : i32
    %c0_i32_0 = arith.constant 0 : i32
    %c0_i32_1 = arith.constant 0 : i32
    return %c0_i32, %c0_i32_0 : i32, i32
  }
  func.func @transform_10(%arg0: i32) -> (i32, i32) {
    %c0_i32 = arith.constant 0 : i32
    %c0_i32_0 = arith.constant 0 : i32
    %c0_i32_1 = arith.constant 0 : i32
    return %c0_i32, %c0_i32_0 : i32, i32
  }
  func.func @transform_11(%arg0: i32) -> (i32, i32) {
    %c0_i32 = arith.constant 0 : i32
    %c0_i32_0 = arith.constant 0 : i32
    %c0_i32_1 = arith.constant 0 : i32
    return %c0_i32, %c0_i32_0 : i32, i32
  }
  func.func @transform_12(%arg0: i32) -> (i32, i32) {
    %c0_i32 = arith.constant 0 : i32
    %c0_i32_0 = arith.constant 0 : i32
    %c0_i32_1 = arith.constant 0 : i32
    return %c0_i32, %c0_i32_0 : i32, i32
  }
  func.func @transform_13(%arg0: i32) -> (i32, i32) {
    %c0_i32 = arith.constant 0 : i32
    %c0_i32_0 = arith.constant 0 : i32
    return %arg0, %c0_i32 : i32, i32
  }
}

</mosaic_0001>

<bundles_post_ra>
// kernel: rnn_classifier_forward.1
= control target key start
LH: loop header
LB: loop body
LE: loop exit
PB: predicated region body
PF: predicated region fallthrough
CT: control target
= control target key end

     0   :  { %18 = vsyncpa [#allocation5], 0  ;;  %s5994_s0 = inlined_call_operand.vmem [shape: bf16[8,8,128], index: 0, kind: input, shape index: {}]   ;;  %s5995_s1 = inlined_call_operand.vmem [shape: s32[8,1], index: 1, kind: input, shape index: {}]   ;;  %s5996_s2 = inlined_call_operand.vmem [shape: bf16[128,384], index: 2, kind: input, shape index: {}]   ;;  %s5997_s3 = inlined_call_operand.hbm [shape: bf16[128,384], index: 3, kind: input, shape index: {}]   ;;  %s5998_s4 = inlined_call_operand.vmem [shape: f32[1,384], index: 4, kind: input, shape index: {}]   ;;  %s5999_s5 = inlined_call_operand.vmem [shape: f32[1,128], index: 5, kind: input, shape index: {}]   ;;  %s6000_s6 = inlined_call_operand.hbm [shape: bf16[128,384], index: 6, kind: input, shape index: {}]   ;;  %s6001_s7 = inlined_call_operand.hbm [shape: bf16[128,384], index: 7, kind: input, shape index: {}]   ;;  %s6002_s8 = inlined_call_operand.vmem [shape: f32[1,384], index: 8, kind: input, shape index: {}]   ;;  %s6003_s9 = inlined_call_operand.vmem [shape: f32[1,128], index: 9, kind: input, shape index: {}]   ;;  %s6004_s10 = inlined_call_operand.hbm [shape: bf16[128,128], index: 10, kind: input, shape index: {}]   ;;  %s6005_s11 = inlined_call_operand.hbm [shape: bf16[128,128], index: 11, kind: input, shape index: {}]   ;;  %s6006_s12 = inlined_call_operand.vmem [shape: f32[1,128], index: 12, kind: input, shape index: {}]   ;;  %s6007_s13 = inlined_call_operand.vmem [shape: f32[8,128], index: 13, kind: output, shape index: {}]  }
   0x1   :  { %19 = vsyncpa [#allocation7], 0 }
   0x2   :  { %20 = vsyncpa [#allocation10], 0  ;;  %s4556_s25 = smov [#allocation6]   ;;  %s4557_s27 = smov [#allocation9]  }
   0x3   :  { %s48_s26 = sshll.u32 %s4556_s25, 4  ;;  %s76_s28 = sshll.u32 %s4557_s27, 4  ;;  %s49_s26 = int_to_ptr.vmem [resolvable:$true] %s48_s26  ;;  %s4638_s28 = int_to_ptr.vmem [resolvable:$true] %s76_s28 }
   0x4   :  { %s4440_s14 = scalar_lea.hbm %s6000_s6, 3072 }
   0x5   :  { %p4441_p0 = scmp.ne.s32.totalorder %s6000_s6, %s4440_s14  ;;  %p4444_p1 = scmp.lt.u32.totalorder %s4440_s14, %s6000_s6 }
   0x7   :  { %p4446_p2 = pnand %p4444_p1, %p4441_p0 }
   0x9   :  { %4449 = shalt.err (!%p4446_p2)
}
   0xa   :  { %s4450_s19 = scalar_lea.vmem %s49_s26, 3072  ;;  %p4455_p4 = scmp.lt.s32.totalorder %s49_s26, %s49_s26 }
   0xb   :  { %p4451_p3 = scmp.ne.s32.totalorder %s49_s26, %s4450_s19  ;;  %p4456_p5 = scmp.lt.s32.totalorder %s4450_s19, %s4450_s19 }
   0xd   :  { %p4457_p6 = por %p4456_p5, %p4455_p4 }
   0xf   :  { %p4458_p7 = pnand %p4457_p6, %p4451_p3 }
  0x11   :  { %4461 = shalt.err (!%p4458_p7)
}
  0x12   :  { %s4558_s20 = smov 192   ;;  %s4559_s21 = smov 12  }
  0x13   :  { %54 = dma.hbm_to_vmem [thread:$0]  %s6000_s6, 3072, %s49_s26, [#allocation7], %s4558_s20, %s4558_s20, %s4559_s21  }
  0x14   :  { %s4462_s27 = scalar_lea.hbm %s6004_s10, 1024 }
  0x15   :  { %p4463_p8 = scmp.ne.s32.totalorder %s6004_s10, %s4462_s27  ;;  %p4466_p9 = scmp.lt.u32.totalorder %s4462_s27, %s6004_s10 }
  0x17   :  { %p4468_p10 = pnand %p4466_p9, %p4463_p8 }
  0x19   :  { %4471 = shalt.err (!%p4468_p10)
}
  0x1a   :  { %s4472_s16 = scalar_lea.vmem %s4638_s28, 1024  ;;  %p4477_p12 = scmp.lt.s32.totalorder %s4638_s28, %s4638_s28 }
  0x1b   :  { %p4473_p11 = scmp.ne.s32.totalorder %s4638_s28, %s4472_s16  ;;  %p4478_p13 = scmp.lt.s32.totalorder %s4472_s16, %s4472_s16 }
  0x1d   :  { %p4479_p0 = por %p4478_p13, %p4477_p12 }
  0x1f   :  { %p4480_p1 = pnand %p4479_p0, %p4473_p11 }
  0x21   :  { %4483 = shalt.err (!%p4480_p1)
}
  0x22   :  { %s4560_s6 = smov 64   ;;  %s4561_s26 = smov 4  }
  0x23   :  { %82 = dma.hbm_to_vmem [thread:$0]  %s6004_s10, 1024, %s4638_s28, [#allocation10], %s4560_s6, %s4560_s6, %s4561_s26  }
  0x24   :  { %s4562_s19 = smov [#allocation4]   ;;  %s4563_s23 = smov [#allocation8]  }
  0x25   :  { %s32_s22 = sshll.u32 %s4562_s19, 4  ;;  %s60_s24 = sshll.u32 %s4563_s23, 4  ;;  %s33_s22 = int_to_ptr.vmem [resolvable:$true] %s32_s22  ;;  %s4675_s24 = int_to_ptr.vmem [resolvable:$true] %s60_s24 }
  0x26   :  { %s4484_s29 = scalar_lea.hbm %s5997_s3, 3072 }
  0x27   :  { %p4485_p2 = scmp.ne.s32.totalorder %s5997_s3, %s4484_s29  ;;  %p4488_p3 = scmp.lt.u32.totalorder %s4484_s29, %s5997_s3 }
  0x29   :  { %p4490_p4 = pnand %p4488_p3, %p4485_p2 }
  0x2b   :  { %4493 = shalt.err (!%p4490_p4)
}
  0x2c   :  { %s4494_s10 = scalar_lea.vmem %s33_s22, 3072  ;;  %p4499_p6 = scmp.lt.s32.totalorder %s33_s22, %s33_s22 }
  0x2d   :  { %p4495_p5 = scmp.ne.s32.totalorder %s33_s22, %s4494_s10  ;;  %p4500_p7 = scmp.lt.s32.totalorder %s4494_s10, %s4494_s10 }
  0x2f   :  { %p4501_p8 = por %p4500_p7, %p4499_p6 }
  0x31   :  { %p4502_p9 = pnand %p4501_p8, %p4495_p5 }
  0x33   :  { %4505 = shalt.err (!%p4502_p9)
}
  0x34   :  { %38 = dma.hbm_to_vmem [thread:$0]  %s5997_s3, 3072, %s33_s22, [#allocation5], %s4558_s20, %s4558_s20, %s4559_s21  }
  0x35   :  { %s4506_s23 = scalar_lea.hbm %s6001_s7, 3072 }
  0x36   :  { %p4507_p10 = scmp.ne.s32.totalorder %s6001_s7, %s4506_s23  ;;  %p4510_p11 = scmp.lt.u32.totalorder %s4506_s23, %s6001_s7 }
  0x38   :  { %p4512_p12 = pnand %p4510_p11, %p4507_p10 }
  0x3a   :  { %4515 = shalt.err (!%p4512_p12)
}
  0x3b   :  { %s4516_s14 = scalar_lea.vmem %s4675_s24, 3072  ;;  %p4521_p0 = scmp.lt.s32.totalorder %s4675_s24, %s4675_s24 }
  0x3c   :  { %p4517_p13 = scmp.ne.s32.totalorder %s4675_s24, %s4516_s14  ;;  %p4522_p1 = scmp.lt.s32.totalorder %s4516_s14, %s4516_s14 }
  0x3e   :  { %p4523_p2 = por %p4522_p1, %p4521_p0 }
  0x40   :  { %p4524_p3 = pnand %p4523_p2, %p4517_p13 }
  0x42   :  { %4527 = shalt.err (!%p4524_p3)
}
  0x43   :  { %66 = dma.hbm_to_vmem [thread:$0]  %s6001_s7, 3072, %s4675_s24, [#allocation7], %s4558_s20, %s4558_s20, %s4559_s21  }
  0x44   :  { %s4564_s15 = smov [#allocation11]   ;;  %s4528_s17 = scalar_lea.hbm %s6005_s11, 1024 }
  0x45   :  { %s88_s16 = sshll.u32 %s4564_s15, 4  ;;  %p4529_p4 = scmp.ne.s32.totalorder %s6005_s11, %s4528_s17  ;;  %s89_s16 = int_to_ptr.vmem [resolvable:$true] %s88_s16 }
  0x46   :  { %p4532_p5 = scmp.lt.u32.totalorder %s4528_s17, %s6005_s11 }
  0x48   :  { %p4534_p6 = pnand %p4532_p5, %p4529_p4 }
  0x4a   :  { %4537 = shalt.err (!%p4534_p6)
}
  0x4b   :  { %s4538_s27 = scalar_lea.vmem %s89_s16, 1024  ;;  %p4543_p8 = scmp.lt.s32.totalorder %s89_s16, %s89_s16 }
  0x4c   :  { %p4539_p7 = scmp.ne.s32.totalorder %s89_s16, %s4538_s27  ;;  %p4544_p9 = scmp.lt.s32.totalorder %s4538_s27, %s4538_s27 }
  0x4e   :  { %p4545_p10 = por %p4544_p9, %p4543_p8 }
  0x50   :  { %p4546_p11 = pnand %p4545_p10, %p4539_p7 }
  0x52   :  { %4549 = shalt.err (!%p4546_p11)
}
  0x53   :  { %94 = dma.hbm_to_vmem [thread:$0]  %s6005_s11, 1024, %s89_s16, [#allocation10], %s4560_s6, %s4560_s6, %s4561_s26  }
  0x54   :  { %4550 = dma.done.wait [#allocation5], 3072  }
  0x55   :  { %4551 = vsyncadd [#allocation5], 4294964224 }
  0x56   :  { %4552 = dma.done.wait [#allocation7], 6144  }
  0x57   :  { %4553 = vsyncadd [#allocation7], 4294961152 }
  0x58   :  { %4554 = dma.done.wait [#allocation10], 2048  }
  0x59   :  { %4555 = vsyncadd [#allocation10], 4294965248  ;;  %v6008_v0 = vmov 0   ;;  %v4035_v1 = vld [vmem:[%s5996_s2 + $0x4] ss:$12 sps:$4 sm:$0xff]   ;;  %v4813_v32 = vld [vmem:[%s5994_s0 + $0x8] sm:$0xff]  }
  0x5a   :  { %354 = vmatprep.mubr.bf16.mxu0 %v6008_v0  ;;  %4033 = vset.pattern.permute.xlu0 %v6008_v0  ;;  %v4037_v2 = vld [vmem:[%s5996_s2] ss:$12 sps:$4 sm:$0xff]   ;;  %v4038_v3 = vld [vmem:[%s5996_s2 + $0x1c] ss:$12 sps:$4 sm:$0xff]   ;;  %v4040_v4 = vld [vmem:[%s5996_s2 + $0x18] ss:$12 sps:$4 sm:$0xff]  }
  0x5b   :  { %4034 = vset.pattern.permute.xlu1 %v6008_v0  ;;  %322 = vmatprep.subr.bf16.mxu0 %v4035_v1  ;;  %v4041_v5 = vld [vmem:[%s5996_s2 + $0x34] ss:$12 sps:$4 sm:$0xff]   ;;  %v4043_v6 = vld [vmem:[%s5996_s2 + $0x30] ss:$12 sps:$4 sm:$0xff]   ;;  %v4044_v7 = vld [vmem:[%s5996_s2 + $0x4c] ss:$12 sps:$4 sm:$0xff]  }
  0x5c   :  { %323 = vmatpush1.bf16.msra.mxu0 %v4037_v2  ;;  %v4053_v8 = vld [vmem:[%s5996_s2 + $0x8] ss:$12 sps:$4 sm:$0xff]   ;;  %v4057_v10 = vld [vmem:[%s5996_s2 + $0x20] ss:$12 sps:$4 sm:$0xff]   ;;  %v4047_v11 = vld [vmem:[%s5996_s2 + $0x64] ss:$12 sps:$4 sm:$0xff]  }
  0x5d   :  { %324 = vmatprep.subr.bf16.mxu0 %v4038_v3  ;;  %v4046_v9 = vld [vmem:[%s5996_s2 + $0x48] ss:$12 sps:$4 sm:$0xff]   ;;  %3613 = vmatprep.subr.bf16.mxu1 %v4053_v8  ;;  %v4061_v12 = vld [vmem:[%s5996_s2 + $0x38] ss:$12 sps:$4 sm:$0xff]   ;;  %v4049_v13 = vld [vmem:[%s5996_s2 + $0x60] ss:$12 sps:$4 sm:$0xff]  }
  0x5e   :  { %3614 = vmatpush3.bf16.msra.mxu1 %v4053_v8  ;;  %v4050_v14 = vld [vmem:[%s5996_s2 + $0x7c] ss:$12 sps:$4 sm:$0xff]   ;;  %v4775_v15 = vld [vmem:[%s5994_s0] sm:$0xff]   ;;  %v4058_v21 = vld [vmem:[%s5996_s2 + $0xac] ss:$12 sps:$4 sm:$0xff]   ;;  %v6010_v61 = vmov 0.0  }
  0x5f   :  { %3615 = vmatprep.subr.bf16.mxu1 %v4057_v10  ;;  %v4066_v16 = vld [vmem:[%s5996_s2 + $0x50] ss:$12 sps:$4 sm:$0xff]   ;;  %3629 = vmatprep.mubr.bf16.mxu1 %v4775_v15  ;;  %v4052_v17 = vld [vmem:[%s5996_s2 + $0x78] ss:$12 sps:$4 sm:$0xff]   ;;  %v4054_v18 = vld [vmem:[%s5996_s2 + $0x94] ss:$12 sps:$4 sm:$0xff]  }
  0x60   :  { %325 = vmatpush1.bf16.msra.mxu0 %v4040_v4  ;;  %v4070_v19 = vld [vmem:[%s5996_s2 + $0x68] ss:$12 sps:$4 sm:$0xff]   ;;  %v4056_v20 = vld [vmem:[%s5996_s2 + $0x90] ss:$12 sps:$4 sm:$0xff]   ;;  %v4075_v22 = vld [vmem:[%s5996_s2 + $0x80] ss:$12 sps:$4 sm:$0xff]  }
  0x61   :  { %326 = vmatprep.subr.bf16.mxu0 %v4041_v5  ;;  %v4060_v23 = vld [vmem:[%s5996_s2 + $0xa8] ss:$12 sps:$4 sm:$0xff]   ;;  %v4065_v24 = vld [vmem:[#allocation6 + $0x4] ss:$12 sps:$4 sm:$0xff]   ;;  %v4063_v26 = vld [vmem:[#allocation6] ss:$12 sps:$4 sm:$0xff]  }
  0x62   :  { %3616 = vmatpush3.bf16.msra.mxu1 %v4057_v10  ;;  %v4079_v25 = vld [vmem:[%s5996_s2 + $0x98] ss:$12 sps:$4 sm:$0xff]   ;;  %v4069_v27 = vld [vmem:[#allocation6 + $0x1c] ss:$12 sps:$4 sm:$0xff]   ;;  %v4074_v30 = vld [vmem:[#allocation6 + $0x34] ss:$12 sps:$4 sm:$0xff]  }
  0x63   :  { %3617 = vmatprep.subr.bf16.mxu1 %v4061_v12  ;;  %v4084_v28 = vld [vmem:[%s5996_s2 + $0xb0] ss:$12 sps:$4 sm:$0xff]   ;;  %v4067_v29 = vld [vmem:[#allocation6 + $0x18] ss:$12 sps:$4 sm:$0xff]   ;;  %v4088_v31 = vld [vmem:[#allocation6 + $0x8] ss:$12 sps:$4 sm:$0xff]  }
  0x64   :  { %327 = vmatpush1.bf16.msra.mxu0 %v4043_v6  ;;  %v4072_v33 = vld [vmem:[#allocation6 + $0x30] ss:$12 sps:$4 sm:$0xff]   ;;  %v4078_v34 = vld [vmem:[#allocation6 + $0x4c] ss:$12 sps:$4 sm:$0xff]   ;;  %v4076_v35 = vld [vmem:[#allocation6 + $0x48] ss:$12 sps:$4 sm:$0xff]  }
  0x65   :  { %328 = vmatprep.subr.bf16.mxu0 %v4044_v7  ;;  %v4093_v36 = vld [vmem:[#allocation6 + $0x20] ss:$12 sps:$4 sm:$0xff]   ;;  %v4820_v37 = vld [vmem:[%s5994_s0 + $0x10] sm:$0xff]   ;;  %v4097_v39 = vld [vmem:[#allocation6 + $0x38] ss:$12 sps:$4 sm:$0xff]   ;;  %vm4567_vm4 = vmmov 0  }
  0x66   :  { %3618 = vmatpush3.bf16.msra.mxu1 %v4061_v12  ;;  %v4083_v38 = vld [vmem:[#allocation6 + $0x64] ss:$12 sps:$4 sm:$0xff]   ;;  %v4081_v40 = vld [vmem:[#allocation6 + $0x60] ss:$12 sps:$4 sm:$0xff]   ;;  %v4087_v41 = vld [vmem:[#allocation6 + $0x7c] ss:$12 sps:$4 sm:$0xff]  }
  0x67   :  { %3619 = vmatprep.subr.bf16.mxu1 %v4066_v16  ;;  %v4827_v42 = vld [vmem:[%s5994_s0 + $0x18] sm:$0xff]   ;;  %v4092_v45 = vld [vmem:[#allocation6 + $0x94] ss:$12 sps:$4 sm:$0xff]   ;;  %v4835_v51 = vld [vmem:[#allocation4 + $0x4] ss:$12 sps:$4 sm:$0xff]  }
  0x68   :  { %329 = vmatpush1.bf16.msra.mxu0 %v4046_v9  ;;  %v4101_v43 = vld [vmem:[#allocation6 + $0x50] ss:$12 sps:$4 sm:$0xff]   ;;  %v4085_v44 = vld [vmem:[#allocation6 + $0x78] ss:$12 sps:$4 sm:$0xff]   ;;  %v4105_v46 = vld [vmem:[#allocation6 + $0x68] ss:$12 sps:$4 sm:$0xff]  }
  0x69   :  { %330 = vmatprep.subr.bf16.mxu0 %v4047_v11  ;;  %v4090_v47 = vld [vmem:[#allocation6 + $0x90] ss:$12 sps:$4 sm:$0xff]   ;;  %v4096_v48 = vld [vmem:[#allocation6 + $0xac] ss:$12 sps:$4 sm:$0xff]   ;;  %v4094_v50 = vld [vmem:[#allocation6 + $0xa8] ss:$12 sps:$4 sm:$0xff]  }
  0x6a   :  { %3620 = vmatpush3.bf16.msra.mxu1 %v4066_v16  ;;  %v4109_v49 = vld [vmem:[#allocation6 + $0x80] ss:$12 sps:$4 sm:$0xff]   ;;  %v4113_v52 = vld [vmem:[#allocation6 + $0x98] ss:$12 sps:$4 sm:$0xff]   ;;  %v4840_v54 = vld [vmem:[#allocation4 + $0x1c] ss:$12 sps:$4 sm:$0xff]  }
  0x6b   :  { %3621 = vmatprep.subr.bf16.mxu1 %v4070_v19  ;;  %v4837_v53 = vld [vmem:[#allocation4] ss:$12 sps:$4 sm:$0xff]   ;;  %v4117_v55 = vld [vmem:[#allocation6 + $0xb0] ss:$12 sps:$4 sm:$0xff]   ;;  %v4844_v56 = vld [vmem:[#allocation4 + $0x18] ss:$12 sps:$4 sm:$0xff]  }
  0x6c   :  { %331 = vmatpush1.bf16.msra.mxu0 %v4049_v13  ;;  %v4848_v57 = vld [vmem:[#allocation4 + $0x34] ss:$12 sps:$4 sm:$0xff]   ;;  %v4851_v58 = vld [vmem:[#allocation4 + $0x30] ss:$12 sps:$4 sm:$0xff]   ;;  %v4854_v59 = vld [vmem:[#allocation4 + $0x4c] ss:$12 sps:$4 sm:$0xff]  }
  0x6d   :  { %332 = vmatprep.subr.bf16.mxu0 %v4050_v14  ;;  %v4856_v60 = vld [vmem:[#allocation4 + $0x8] ss:$12 sps:$4 sm:$0xff]   ;;  %v4865_v63 = vld [vmem:[#allocation4 + $0x64] ss:$12 sps:$4 sm:$0xff]   ;;  %v4869_v1 = vld [vmem:[#allocation4 + $0x20] ss:$12 sps:$4 sm:$0xff]  }
  0x6e   :  { %3622 = vmatpush3.bf16.msra.mxu1 %v4070_v19  ;;  %v4861_v62 = vld [vmem:[#allocation4 + $0x48] ss:$12 sps:$4 sm:$0xff]   ;;  %v4876_v2 = vld [vmem:[%s5995_s1] sm:$0xff]  ;;  %v4900_v10 = vld [vmem:[#allocation4 + $0x50] ss:$12 sps:$4 sm:$0xff]  }
  0x6f   :  { %3623 = vmatprep.subr.bf16.mxu1 %v4075_v22  ;;  %v4879_v3 = vld [vmem:[#allocation4 + $0x60] ss:$12 sps:$4 sm:$0xff]   ;;  %vm890_vm0 = vcmp.gt.s32.totalorder %v4876_v2, 0  ;;  %v4883_v4 = vld [vmem:[#allocation4 + $0x7c] ss:$12 sps:$4 sm:$0xff]   ;;  %vm1405_vm1 = vcmp.gt.s32.totalorder %v4876_v2, 1 }
  0x70   :  { %333 = vmatpush1.bf16.msra.mxu0 %v4052_v17  ;;  %6060 = vst [vmem:[#allocation15_spill] sm:$0xff] %v4879_v3  ;;  %6061 = vst [vmem:[#allocation16_spill] sm:$0xff] %v4883_v4  ;;  %v3320_v5 = vsel %vm890_vm0, 1.0, %v6010_v61  ;;  %v4887_v6 = vld [vmem:[#allocation4 + $0x78] ss:$12 sps:$4 sm:$0xff]   ;;  %vm1408_vm2 = vcmp.gt.s32.totalorder %v4876_v2, 6 }
  0x71   :  { %334 = vmatprep.subr.bf16.mxu0 %v4054_v18  ;;  %6062 = vst [vmem:[#allocation17_spill] sm:$0xff] %v4887_v6  ;;  %v4890_v7 = vld [vmem:[#allocation4 + $0x38] ss:$12 sps:$4 sm:$0xff]   ;;  %1138 = vperm.xlu0 %4033, %v3320_v5   ;;  %v4894_v8 = vld [vmem:[#allocation4 + $0x94] ss:$12 sps:$4 sm:$0xff]   ;;  %v1142_v9 = vsub.f32 1.0, %v3320_v5 }
  0x72   :  { %3624 = vmatpush3.bf16.msra.mxu1 %v4075_v22  ;;  %6063 = vst [vmem:[#allocation18_spill] sm:$0xff] %v4894_v8  ;;  %vm893_vm3 = vcmp.gt.s32.totalorder %v4876_v2, 7  ;;  %v3376_v11 = vsel %vm1405_vm1, 1.0, %v6010_v61  ;;  %v3377_v14 = vsel %vm1408_vm2, 1.0, %v6010_v61  ;;  %v4907_v16 = vld [vmem:[#allocation4 + $0x90] ss:$12 sps:$4 sm:$0xff]  }
  0x73   :  { %3625 = vmatprep.subr.bf16.mxu1 %v4079_v25  ;;  %v3321_v12 = vsel %vm893_vm3, 1.0, %v6010_v61  ;;  %v1525_v13 = vsub.f32 1.0, %v3376_v11  ;;  %6064 = vst [vmem:[#allocation19_spill] sm:$0xff] %v4907_v16  ;;  %v4912_v17 = vld [vmem:[#allocation4 + $0xac] ss:$12 sps:$4 sm:$0xff]   ;;  %vm1655_vm5 = vcmp.gt.s32.totalorder %v4876_v2, 2 }
  0x74   :  { %335 = vmatpush1.bf16.msra.mxu0 %v4056_v20  ;;  %6065 = vst [vmem:[#allocation20_spill] sm:$0xff] %v4912_v17  ;;  %v4916_v18 = vld [vmem:[#allocation4 + $0x68] ss:$12 sps:$4 sm:$0xff]   ;;  %1393 = vperm.xlu1 %4034, %v3321_v12   ;;  %v4923_v20 = vld [vmem:[#allocation8 + $0x4] ss:$12 sps:$4 sm:$0xff]   ;;  %vm1658_vm6 = vcmp.gt.s32.totalorder %v4876_v2, 5 }
  0x75   :  { %336 = vmatprep.subr.bf16.mxu0 %v4058_v21  ;;  %1145 = vperm.xlu0 %4033, %v1142_v9   ;;  %6066 = vst [vmem:[#allocation21_spill] sm:$0xff] %v4916_v18  ;;  %v4919_v19 = vld [vmem:[#allocation4 + $0xa8] ss:$12 sps:$4 sm:$0xff]   ;;  %6068 = vst [vmem:[#allocation23_spill] sm:$0xff] %v4923_v20  ;;  %v4928_v21 = vld [vmem:[#allocation4 + $0x80] ss:$12 sps:$4 sm:$0xff]  }
  0x76   :  { %3626 = vmatpush3.bf16.msra.mxu1 %v4079_v25  ;;  %6067 = vst [vmem:[#allocation22_spill] sm:$0xff] %v4919_v19  ;;  %6069 = vst [vmem:[#allocation24_spill] sm:$0xff] %v4928_v21  ;;  %v4935_v22 = vld [vmem:[#allocation8] ss:$12 sps:$4 sm:$0xff]   ;;  %v1647_v25 = vsub.f32 1.0, %v3377_v14  ;;  %vm1905_vm7 = vcmp.gt.s32.totalorder %v4876_v2, 3 }
  0x77   :  { %3627 = vmatprep.subr.bf16.mxu1 %v4084_v28  ;;  %vm1908_vm8 = vcmp.gt.s32.totalorder %v4876_v2, 4  ;;  %v5021_v2 = vld [vmem:[#allocation8 + $0x80] ss:$12 sps:$4 sm:$0xff]   ;;  %v5027_v5 = vld [vmem:[#allocation8 + $0x98] ss:$12 sps:$4 sm:$0xff]  }
  0x78   :  { %337 = vmatpush1.bf16.msra.mxu0 %v4060_v23  ;;  %v4938_v23 = vld [vmem:[#allocation8 + $0x1c] ss:$12 sps:$4 sm:$0xff]  }
  0x79   :  { %661 = vmatprep.subr.bf16.mxu0 %v4065_v24  ;;  %1521 = vperm.xlu0 %4033, %v3376_v11   ;;  %v4941_v24 = vld [vmem:[#allocation4 + $0x98] ss:$12 sps:$4 sm:$0xff]   ;;  %v5035_v9 = vld [vmem:[#allocation8 + $0xb0] ss:$12 sps:$4 sm:$0xff]   ;;  %v155_v11 = vlaneseq }
  0x7a   :  { %3628 = vmatpush3.bf16.msra.mxu1 %v4084_v28  ;;  %6070 = vst [vmem:[#allocation25_spill] sm:$0xff] %v4941_v24  ;;  %v4952_v28 = vld [vmem:[#allocation8 + $0x34] ss:$12 sps:$4 sm:$0xff]  }
  0x7b   :  { %355 = vmatmul.mubr.bf16.vlgmr.msra.gmra.mrb[0].mxu0 %v4775_v15  ;;  %3637 = vmatprep.subr.bf16.mxu1 %v4088_v31 }
  0x7c   :  { %662 = vmatpush1.bf16.msra.mxu0 %v4063_v26  ;;  %364 = vmatprep.mubr.bf16.mxu0 %v6008_v0  ;;  %v3382_v26 = vsel %vm1655_vm5, 1.0, %v6010_v61 }
  0x7d   :  { %663 = vmatprep.subr.bf16.mxu0 %v4069_v27  ;;  %3630 = vmatmul.mubr.bf16.vlgmr.msra.gmra.mrb[0].mxu1 %v4813_v32  ;;  %v4948_v27 = vld [vmem:[#allocation8 + $0x18] ss:$12 sps:$4 sm:$0xff]  }
  0x7e   :  { %3638 = vmatpush3.bf16.msra.mxu1 %v4088_v31  ;;  %3633 = vmatprep.mubr.bf16.mxu1 %v4820_v37  ;;  %v3383_v31 = vsel %vm1658_vm6, 1.0, %v6010_v61 }
  0x7f   :  { %3639 = vmatprep.subr.bf16.mxu1 %v4093_v36  ;;  %1643 = vperm.xlu0 %4033, %v3377_v14   ;;  %v153_v14 = vld [vmem:[%s5998_s4] sm:$0x7] }
  0x80   :  { %664 = vmatpush1.bf16.msra.mxu0 %v4067_v29  ;;  %v4955_v29 = vld [vmem:[#allocation4 + $0xb0] ss:$12 sps:$4 sm:$0xff]  }
  0x81   :  { %665 = vmatprep.subr.bf16.mxu0 %v4074_v30  ;;  %6071 = vst [vmem:[#allocation26_spill] sm:$0xff] %v4955_v29  ;;  %v1775_v30 = vsub.f32 1.0, %v3382_v26 }
  0x82   :  { %3640 = vmatpush3.bf16.msra.mxu1 %v4093_v36  ;;  %v1897_v36 = vsub.f32 1.0, %v3383_v31 }
  0x83   :  { %365 = vmatmul.mubr.bf16.gmra.mrb[4].mxu0 %v4813_v32  ;;  %3641 = vmatprep.subr.bf16.mxu1 %v4097_v39 }
  0x84   :  { %666 = vmatpush1.bf16.msra.mxu0 %v4072_v33  ;;  %374 = vmatprep.mubr.bf16.mxu0 %v6008_v0  ;;  %v4963_v33 = vld [vmem:[#allocation8 + $0x4c] ss:$12 sps:$4 sm:$0xff]  }
  0x85   :  { %667 = vmatprep.subr.bf16.mxu0 %v4078_v34  ;;  %3634 = vmatmul.mubr.bf16.gmra.mrb[4].mxu1 %v4827_v42  ;;  %v4967_v34 = vld [vmem:[#allocation8 + $0x8] ss:$12 sps:$4 sm:$0xff]  }
  0x86   :  { %3642 = vmatpush3.bf16.msra.mxu1 %v4097_v39  ;;  %3653 = vmatprep.mubr.bf16.mxu1 %v4775_v15  ;;  %v4980_v39 = vld [vmem:[#allocation8 + $0x20] ss:$12 sps:$4 sm:$0xff]  }
  0x87   :  { %3643 = vmatprep.subr.bf16.mxu1 %v4101_v43  ;;  %1771 = vperm.xlu0 %4033, %v3382_v26  }
  0x88   :  { %668 = vmatpush1.bf16.msra.mxu0 %v4076_v35  ;;  %v4971_v35 = vld [vmem:[#allocation8 + $0x48] ss:$12 sps:$4 sm:$0xff]  }
  0x89   :  { %669 = vmatprep.subr.bf16.mxu0 %v4083_v38  ;;  %v4975_v38 = vld [vmem:[#allocation8 + $0x64] ss:$12 sps:$4 sm:$0xff]  }
  0x8a   :  { %3644 = vmatpush3.bf16.msra.mxu1 %v4101_v43  ;;  %v4990_v43 = vld [vmem:[#allocation8 + $0x7c] ss:$12 sps:$4 sm:$0xff]  }
  0x8b   :  { %375 = vmatmul.mubr.bf16.gmra.mrb[8].mxu0 %v4820_v37  ;;  %3645 = vmatprep.subr.bf16.mxu1 %v4105_v46 }
  0x8c   :  { %670 = vmatpush1.bf16.msra.mxu0 %v4081_v40  ;;  %384 = vmatprep.mubr.bf16.mxu0 %v6008_v0  ;;  %v4986_v40 = vld [vmem:[#allocation8 + $0x60] ss:$12 sps:$4 sm:$0xff]  }
  0x8d   :  { %671 = vmatprep.subr.bf16.mxu0 %v4087_v41  ;;  %1893 = vperm.xlu0 %4033, %v3383_v31  }
  0x8e   :  { %3646 = vmatpush3.bf16.msra.mxu1 %v4105_v46 }
  0x8f   :  { %3647 = vmatprep.subr.bf16.mxu1 %v4109_v49 }
  0x90   :  { %672 = vmatpush1.bf16.msra.mxu0 %v4085_v44  ;;  %v4993_v44 = vld [vmem:[#allocation8 + $0x38] ss:$12 sps:$4 sm:$0xff]  }
  0x91   :  { %673 = vmatprep.subr.bf16.mxu0 %v4092_v45  ;;  %v4997_v45 = vld [vmem:[#allocation8 + $0x78] ss:$12 sps:$4 sm:$0xff]  }
  0x92   :  { %3648 = vmatpush3.bf16.msra.mxu1 %v4109_v49  ;;  %v5007_v49 = vld [vmem:[#allocation8 + $0x90] ss:$12 sps:$4 sm:$0xff]  }
  0x93   :  { %385 = vmatmul.mubr.bf16.gmra.mrb[12].mxu0 %v4827_v42  ;;  %3649 = vmatprep.subr.bf16.mxu1 %v4113_v52 }
  0x94   :  { %674 = vmatpush1.bf16.msra.mxu0 %v4090_v47  ;;  %693 = vmatprep.mubr.bf16.mxu0 %v6008_v0  ;;  %v5000_v47 = vld [vmem:[#allocation8 + $0x94] ss:$12 sps:$4 sm:$0xff]  }
  0x95   :  { %675 = vmatprep.subr.bf16.mxu0 %v4096_v48  ;;  %v5003_v48 = vld [vmem:[#allocation8 + $0x50] ss:$12 sps:$4 sm:$0xff]  }
  0x96   :  { %3650 = vmatpush3.bf16.msra.mxu1 %v4113_v52  ;;  %v5013_v52 = vld [vmem:[#allocation8 + $0x68] ss:$12 sps:$4 sm:$0xff]  }
  0x97   :  { %3651 = vmatprep.subr.bf16.mxu1 %v4117_v55 }
  0x98   :  { %676 = vmatpush1.bf16.msra.mxu0 %v4094_v50  ;;  %v5010_v50 = vld [vmem:[#allocation8 + $0xac] ss:$12 sps:$4 sm:$0xff]  }
  0x99   :  { %1027 = vmatprep.subr.bf16.mxu0 %v4835_v51 }
  0x9a   :  { %3652 = vmatpush3.bf16.msra.mxu1 %v4117_v55  ;;  %v5017_v55 = vld [vmem:[#allocation8 + $0xa8] ss:$12 sps:$4 sm:$0xff]  }
  0x9b   :  { %694 = vmatmul.mubr.bf16.vlgmr.msra.gmra.mrb[16].mxu0 %v4775_v15  ;;  %3661 = vmatprep.subr.bf16.mxu1 %v6010_v61  ;;  %v1397_v15 = vsub.f32 1.0, %v3321_v12  ;;  %v5073_v12 = vshrl.u32 %v155_v11, 7 }
  0x9c   :  { %1028 = vmatpush1.bf16.msra.mxu0 %v4837_v53  ;;  %703 = vmatprep.mubr.bf16.mxu0 %v6008_v0 }
  0x9d   :  { %1029 = vmatprep.subr.bf16.mxu0 %v4840_v54  ;;  %3654 = vmatmul.mubr.bf16.vlgmr.msra.gmra.mrb[8].mxu1 %v4813_v32 }
  0x9e   :  { %3662 = vmatpush3.bf16.msra.mxu1 %v4856_v60  ;;  %3657 = vmatprep.mubr.bf16.mxu1 %v4820_v37 }
  0x9f   :  { %3663 = vmatprep.subr.bf16.mxu1 %v6010_v61  ;;  %1400 = vperm.xlu1 %4034, %v1397_v15   ;;  %v161_v15 = vsub.s32 1, %v5073_v12 }
  0xa0   :  { %1030 = vmatpush1.bf16.msra.mxu0 %v4844_v56 }
  0xa1   :  { %1031 = vmatprep.subr.bf16.mxu0 %v4848_v57  ;;  %v5086_v31 = vrot.slane %v153_v14, %v161_v15 }
  0xa2   :  { %3664 = vmatpush3.bf16.msra.mxu1 %v4869_v1 }
  0xa3   :  { %704 = vmatmul.mubr.bf16.gmra.mrb[20].mxu0 %v4813_v32  ;;  %3665 = vmatprep.subr.bf16.mxu1 %v6010_v61  ;;  %v4960_v32 = vld [vmem:[#allocation8 + $0x30] ss:$12 sps:$4 sm:$0xff]  }
  0xa4   :  { %1032 = vmatpush1.bf16.msra.mxu0 %v4851_v58  ;;  %713 = vmatprep.mubr.bf16.mxu0 %v6008_v0 }
  0xa5   :  { %1033 = vmatprep.subr.bf16.mxu0 %v4854_v59  ;;  %3658 = vmatmul.mubr.bf16.gmra.mrb[12].mxu1 %v4827_v42 }
  0xa6   :  { %3666 = vmatpush3.bf16.msra.mxu1 %v4890_v7  ;;  %3677 = vmatprep.mubr.msk.bf16.mxu1 %vm4567_vm4, %v6010_v61 }
  0xa7   :  { %3667 = vmatprep.subr.bf16.mxu1 %v6010_v61  ;;  %1528 = vperm.xlu1 %4034, %v1525_v13   ;;  %v157_v13 = vsub.s32 0, %v5073_v12 }
  0xa8   :  { %1034 = vmatpush1.bf16.msra.mxu0 %v4861_v62 }
  0xa9   :  { %1035 = vmatprep.subr.bf16.mxu0 %v4865_v63 }
  0xaa   :  { %3668 = vmatpush3.bf16.msra.mxu1 %v4900_v10 }
  0xab   :  { %714 = vmatmul.mubr.bf16.gmra.mrb[24].mxu0 %v4820_v37  ;;  %3669 = vmatprep.subr.bf16.mxu1 %v6010_v61  ;;  %v3388_v37 = vsel %vm1905_vm7, 1.0, %v6010_v61 }
  0xac   :  { %1036 = vmatpush1.bf16.msra.mxu0 %v4879_v3  ;;  %723 = vmatprep.mubr.bf16.mxu0 %v6008_v0  ;;  %v2025_v41 = vsub.f32 1.0, %v3388_v37 }
  0xad   :  { %1037 = vmatprep.subr.bf16.mxu0 %v4883_v4  ;;  %1650 = vperm.xlu1 %4034, %v1647_v25   ;;  %v5080_v25 = vrot.slane %v153_v14, %v157_v13 }
  0xae   :  { %3670 = vmatpush3.bf16.msra.mxu1 %v4916_v18  ;;  %2021 = vperm.xlu0 %4033, %v3388_v37  }
  0xaf   :  { %3671 = vmatprep.subr.bf16.mxu1 %v6010_v61 }
  0xb0   :  { %1038 = vmatpush1.bf16.msra.mxu0 %v4887_v6 }
  0xb1   :  { %1039 = vmatprep.subr.bf16.mxu0 %v4894_v8  ;;  %1778 = vperm.xlu1 %4034, %v1775_v30  }
  0xb2   :  { %3672 = vmatpush3.bf16.msra.mxu1 %v4928_v21 }
  0xb3   :  { %724 = vmatmul.mubr.bf16.gmra.mrb[28].mxu0 %v4827_v42  ;;  %3673 = vmatprep.subr.bf16.mxu1 %v6010_v61  ;;  %v3389_v42 = vsel %vm1908_vm8, 1.0, %v6010_v61 }
  0xb4   :  { %1040 = vmatpush1.bf16.msra.mxu0 %v4907_v16  ;;  %1059 = vmatprep.mubr.bf16.mxu0 %v6008_v0  ;;  %v2147_v46 = vsub.f32 1.0, %v3389_v42 }
  0xb5   :  { %1041 = vmatprep.subr.bf16.mxu0 %v4912_v17  ;;  %1900 = vperm.xlu1 %4034, %v1897_v36  }
  0xb6   :  { %3674 = vmatpush3.bf16.msra.mxu1 %v4941_v24  ;;  %2143 = vperm.xlu0 %4033, %v3389_v42   ;;  %v165_v42 = vsub.s32 2, %v5073_v12 }
  0xb7   :  { %3675 = vmatprep.subr.bf16.mxu1 %v6010_v61 }
  0xb8   :  { %1042 = vmatpush1.bf16.msra.mxu0 %v4919_v19  ;;  %v5095_v11 = vrot.slane %v153_v14, %v165_v42 }
  0xb9   :  { %1282 = vmatprep.subr.bf16.mxu0 %v4923_v20  ;;  %2028 = vperm.xlu1 %4034, %v2025_v41  }
  0xba   :  { %3676 = vmatpush3.bf16.msra.mxu1 %v4955_v29 }
  0xbb   :  { %1060 = vmatmul.mubr.bf16.vlgmr.msra.gmra.mrb[32].mxu0 %v6008_v0  ;;  %3681 = vmatprep.subr.bf16.mxu1 %v6010_v61 }
  0xbc   :  { %1283 = vmatpush1.bf16.msra.mxu0 %v4935_v22  ;;  %1314 = vmatprep.mubr.bf16.mxu0 %v6008_v0 }
  0xbd   :  { %1284 = vmatprep.subr.bf16.mxu0 %v4938_v23  ;;  %3678 = vmatmul.mubr.bf16.vlgmr.msra.gmra.mrb[16].mxu1 %v6008_v0 }
  0xbe   :  { %3682 = vmatpush3.bf16.msra.mxu1 %v4967_v34  ;;  %3697 = vmatprep.mubr.msk.bf16.mxu1 %vm4567_vm4, %v6010_v61 }
  0xbf   :  { %3683 = vmatprep.subr.bf16.mxu1 %v6010_v61  ;;  %2150 = vperm.xlu1 %4034, %v2147_v46  }
  0xc0   :  { %1285 = vmatpush1.bf16.msra.mxu0 %v4948_v27 }
  0xc1   :  { %1286 = vmatprep.subr.bf16.mxu0 %v4952_v28 }
  0xc2   :  { %3684 = vmatpush3.bf16.msra.mxu1 %v4980_v39 }
  0xc3   :  { %3685 = vmatprep.subr.bf16.mxu1 %v6010_v61 }
  0xc4   :  { %1287 = vmatpush1.bf16.msra.mxu0 %v4960_v32 }
  0xc5   :  { %1288 = vmatprep.subr.bf16.mxu0 %v4963_v33 }
  0xc6   :  { %3686 = vmatpush3.bf16.msra.mxu1 %v4993_v44 }
  0xc7   :  { %3687 = vmatprep.subr.bf16.mxu1 %v6010_v61 }
  0xc8   :  { %1289 = vmatpush1.bf16.msra.mxu0 %v4971_v35 }
  0xc9   :  { %1290 = vmatprep.subr.bf16.mxu0 %v4975_v38 }
  0xca   :  { %3688 = vmatpush3.bf16.msra.mxu1 %v5003_v48 }
  0xcb   :  { %3689 = vmatprep.subr.bf16.mxu1 %v6010_v61 }
  0xcc   :  { %1291 = vmatpush1.bf16.msra.mxu0 %v4986_v40 }
  0xcd   :  { %1292 = vmatprep.subr.bf16.mxu0 %v4990_v43 }
  0xce   :  { %3690 = vmatpush3.bf16.msra.mxu1 %v5013_v52 }
  0xcf   :  { %3691 = vmatprep.subr.bf16.mxu1 %v6010_v61 }
  0xd0   :  { %1293 = vmatpush1.bf16.msra.mxu0 %v4997_v45 }
  0xd1   :  { %1294 = vmatprep.subr.bf16.mxu0 %v5000_v47 }
  0xd2   :  { %3692 = vmatpush3.bf16.msra.mxu1 %v5021_v2 }
  0xd3   :  { %3693 = vmatprep.subr.bf16.mxu1 %v6010_v61 }
  0xd4   :  { %1295 = vmatpush1.bf16.msra.mxu0 %v5007_v49 }
  0xd5   :  { %1296 = vmatprep.subr.bf16.mxu0 %v5010_v50 }
  0xd6   :  { %3694 = vmatpush3.bf16.msra.mxu1 %v5027_v5 }
  0xd7   :  { %3695 = vmatprep.subr.bf16.mxu1 %v6010_v61 }
  0xd8   :  { %1297 = vmatpush1.bf16.msra.mxu0 %v5017_v55 }
  0xd9   :  { %1416 = vmatprep.subr.bf16.mxu0 %v4835_v51 }
  0xda   :  { %3696 = vmatpush3.bf16.msra.mxu1 %v5035_v9 }
  0xdb   :  { %1315 = vmatmul.mubr.bf16.vlgmr.msra.gmra.mrb[36].mxu0 %v6008_v0  ;;  %3701 = vmatprep.subr.bf16.mxu1 %v6010_v61 }
  0xdc   :  { %1417 = vmatpush1.bf16.msra.mxu0 %v4837_v53  ;;  %1448 = vmatprep.mubr.bf16.mxu0 %v6008_v0 }
  0xdd   :  { %1418 = vmatprep.subr.bf16.mxu0 %v4840_v54  ;;  %3698 = vmatmul.mubr.bf16.vlgmr.msra.gmra.mrb[20].mxu1 %v6008_v0 }
  0xde   :  { %3702 = vmatpush3.bf16.msra.mxu1 %v4856_v60  ;;  %3717 = vmatprep.mubr.msk.bf16.mxu1 %vm4567_vm4, %v6010_v61 }
  0xdf   :  { %3703 = vmatprep.subr.bf16.mxu1 %v6010_v61 }
  0xe0   :  { %1419 = vmatpush1.bf16.msra.mxu0 %v4844_v56 }
  0xe1   :  { %1420 = vmatprep.subr.bf16.mxu0 %v4848_v57 }
  0xe2   :  { %3704 = vmatpush3.bf16.msra.mxu1 %v4869_v1 }
  0xe3   :  { %3705 = vmatprep.subr.bf16.mxu1 %v6010_v61 }
  0xe4   :  { %1421 = vmatpush1.bf16.msra.mxu0 %v4851_v58 }
  0xe5   :  { %1422 = vmatprep.subr.bf16.mxu0 %v4854_v59 }
  0xe6   :  { %3706 = vmatpush3.bf16.msra.mxu1 %v4890_v7 }
  0xe7   :  { %3707 = vmatprep.subr.bf16.mxu1 %v6010_v61 }
  0xe8   :  { %1423 = vmatpush1.bf16.msra.mxu0 %v4861_v62 }
  0xe9   :  { %1424 = vmatprep.subr.bf16.mxu0 %v4865_v63 }
  0xea   :  { %3708 = vmatpush3.bf16.msra.mxu1 %v4900_v10 }
  0xeb   :  { %3709 = vmatprep.subr.bf16.mxu1 %v6010_v61 }
  0xec   :  { %1425 = vmatpush1.bf16.msra.mxu0 %v4879_v3 }
  0xed   :  { %1426 = vmatprep.subr.bf16.mxu0 %v4883_v4 }
  0xee   :  { %3710 = vmatpush3.bf16.msra.mxu1 %v4916_v18 }
  0xef   :  { %3711 = vmatprep.subr.bf16.mxu1 %v6010_v61 }
  0xf0   :  { %1427 = vmatpush1.bf16.msra.mxu0 %v4887_v6 }
  0xf1   :  { %1428 = vmatprep.subr.bf16.mxu0 %v4894_v8 }
  0xf2   :  { %3712 = vmatpush3.bf16.msra.mxu1 %v4928_v21 }
  0xf3   :  { %3713 = vmatprep.subr.bf16.mxu1 %v6010_v61 }
  0xf4   :  { %1429 = vmatpush1.bf16.msra.mxu0 %v4907_v16 }
  0xf5   :  { %1430 = vmatprep.subr.bf16.mxu0 %v4912_v17 }
  0xf6   :  { %3714 = vmatpush3.bf16.msra.mxu1 %v4941_v24 }
  0xf7   :  { %3715 = vmatprep.subr.bf16.mxu1 %v6010_v61 }
  0xf8   :  { %1431 = vmatpush1.bf16.msra.mxu0 %v4919_v19 }
  0xf9   :  { %1538 = vmatprep.subr.bf16.mxu0 %v4923_v20 }
  0xfa   :  { %3716 = vmatpush3.bf16.msra.mxu1 %v4955_v29 }
  0xfb   :  { %3721 = vmatprep.subr.bf16.mxu1 %v6010_v61 }
 0x14e   :  { %v5082_v26 = vpop.f32.mrb[0].mxu0 }
 0x14f   :  { %v5084_v30 = vpop.f32.mrb[1].mxu0 }
 0x150   :  { %v360_v36 = vpop.f32.mrb[2].mxu0  ;;  %v3631_v17 = vpop.f32.mrb[0].mxu1 }
 0x151   :  { %v5089_v37 = vadd.f32 %v360_v36, %v5080_v25  ;;  %v362_v41 = vpop.f32.mrb[3].mxu0  ;;  %v5107_v12 = vadd.f32 %v3631_v17, %v5095_v11 }
 0x152   :  { %v5093_v46 = vadd.f32 %v362_v41, %v5086_v31  ;;  %v5109_v41 = vpop.f32.mrb[1].mxu1 }
 0x153   :  { %6072 = vst [vmem:[#allocation27_spill] sm:$0xff] %v5089_v37  ;;  %6077 = vst [vmem:[#allocation32_spill] sm:$0xff] %v5107_v12 }
 0x154   :  { %6073 = vst [vmem:[#allocation28_spill] sm:$0xff] %v5093_v46 }
 0x156   :  { %v366_v0 = vpop.f32.mrb[4].mxu0 }
 0x157   :  { %v5098_v61 = vadd.f32 %v366_v0, %v5080_v25  ;;  %v368_v20 = vpop.f32.mrb[5].mxu0  ;;  %v3632_v0 = vpop.f32.mrb[2].mxu1 }
 0x158   :  { %v5101_v29 = vadd.f32 %v368_v20, %v5086_v31  ;;  %v370_v19 = vpop.f32.mrb[6].mxu0  ;;  %v432_v20 = vpop.f32.mrb[3].mxu1 }
 0x159   :  { %6074 = vst [vmem:[#allocation29_spill] sm:$0xff] %v5098_v61  ;;  %v5104_v36 = vadd.f32 %v370_v19, %v5080_v25  ;;  %v372_v37 = vpop.f32.mrb[7].mxu0  ;;  %v5115_v61 = vadd.f32 %v3632_v0, %v5095_v11  ;;  %v3635_v24 = vpop.f32.mrb[4].mxu1 }
 0x15a   :  { %6075 = vst [vmem:[#allocation30_spill] sm:$0xff] %v5101_v29  ;;  %v5112_v14 = vadd.f32 %v372_v37, %v5086_v31  ;;  %v5118_v29 = vadd.f32 %v432_v20, %v5095_v11  ;;  %v5130_v0 = vadd.f32 %v3635_v24, %v5095_v11 }
 0x15b   :  { %6076 = vst [vmem:[#allocation31_spill] sm:$0xff] %v5104_v36  ;;  %6079 = vst [vmem:[#allocation34_spill] sm:$0xff] %v5115_v61  ;;  %v445_v61 = vpop.f32.mrb[5].mxu1 }
 0x15c   :  { %6078 = vst [vmem:[#allocation33_spill] sm:$0xff] %v5112_v14  ;;  %6080 = vst [vmem:[#allocation35_spill] sm:$0xff] %v5118_v29 }
 0x15d   :  { %6084 = vst [vmem:[#allocation39_spill] sm:$0xff] %v5130_v0 }
 0x15e   :  { %v376_v46 = vpop.f32.mrb[8].mxu0 }
 0x15f   :  { %v5121_v19 = vadd.f32 %v376_v46, %v5080_v25  ;;  %v378_v36 = vpop.f32.mrb[9].mxu0  ;;  %v5136_v46 = vadd.f32 %v445_v61, %v5095_v11  ;;  %v516_v61 = vld [vmem:[%s6002_s8] sm:$0x7] }
 0x160   :  { %v5124_v17 = vadd.f32 %v378_v36, %v5086_v31  ;;  %v380_v12 = vpop.f32.mrb[10].mxu0 }
 0x161   :  { %6081 = vst [vmem:[#allocation36_spill] sm:$0xff] %v5121_v19  ;;  %v5127_v37 = vadd.f32 %v380_v12, %v5080_v25  ;;  %v382_v14 = vpop.f32.mrb[11].mxu0  ;;  %6086 = vst [vmem:[#allocation41_spill] sm:$0xff] %v5136_v46  ;;  %v3636_v19 = vpop.f32.mrb[6].mxu1 }
 0x162   :  { %6082 = vst [vmem:[#allocation37_spill] sm:$0xff] %v5124_v17  ;;  %v5133_v20 = vadd.f32 %v382_v14, %v5086_v31  ;;  %v5139_v36 = vadd.f32 %v3636_v19, %v5095_v11  ;;  %v448_v17 = vpop.f32.mrb[7].mxu1 }
 0x163   :  { %6083 = vst [vmem:[#allocation38_spill] sm:$0xff] %v5127_v37  ;;  %v5142_v29 = vadd.f32 %v448_v17, %v5095_v11 }
 0x164   :  { %6085 = vst [vmem:[#allocation40_spill] sm:$0xff] %v5133_v20  ;;  %6087 = vst [vmem:[#allocation42_spill] sm:$0xff] %v5139_v36 }
 0x165   :  { %6088 = vst [vmem:[#allocation43_spill] sm:$0xff] %v5142_v29  ;;  %v5159_v29 = vrot.slane %v516_v61, %v157_v13  ;;  %v5175_v13 = vrot.slane %v516_v61, %v165_v42 }
 0x166   :  { %v386_v12 = vpop.f32.mrb[12].mxu0 }
 0x167   :  { %v5145_v37 = vadd.f32 %v386_v12, %v5080_v25  ;;  %v388_v24 = vpop.f32.mrb[13].mxu0  ;;  %v5161_v12 = vrot.slane %v516_v61, %v161_v15 }
 0x168   :  { %v5148_v0 = vadd.f32 %v388_v24, %v5086_v31  ;;  %v390_v14 = vpop.f32.mrb[14].mxu0 }
 0x169   :  { %6089 = vst [vmem:[#allocation44_spill] sm:$0xff] %v5145_v37  ;;  %v5154_v19 = vadd.f32 %v390_v14, %v5080_v25  ;;  %v392_v36 = vpop.f32.mrb[15].mxu0 }
 0x16a   :  { %6090 = vst [vmem:[#allocation45_spill] sm:$0xff] %v5148_v0  ;;  %v5157_v17 = vadd.f32 %v392_v36, %v5086_v31 }
 0x16b   :  { %6091 = vst [vmem:[#allocation46_spill] sm:$0xff] %v5154_v19 }
 0x16c   :  { %6092 = vst [vmem:[#allocation47_spill] sm:$0xff] %v5157_v17 }
 0x16e   :  { %v695_v37 = vpop.f32.mrb[16].mxu0 }
 0x16f   :  { %v5164_v24 = vadd.f32 %v695_v37, %v5159_v29  ;;  %v697_v0 = vpop.f32.mrb[17].mxu0 }
 0x170   :  { %v5167_v20 = vadd.f32 %v697_v0, %v5161_v12  ;;  %v699_v46 = vpop.f32.mrb[18].mxu0 }
 0x171   :  { %6093 = vst [vmem:[#allocation48_spill] sm:$0xff] %v5164_v24  ;;  %v5170_v14 = vadd.f32 %v699_v46, %v5159_v29  ;;  %v701_v19 = vpop.f32.mrb[19].mxu0 }
 0x172   :  { %6094 = vst [vmem:[#allocation49_spill] sm:$0xff] %v5167_v20  ;;  %v5173_v36 = vadd.f32 %v701_v19, %v5161_v12  ;;  %v3655_v20 = vpop.f32.mrb[8].mxu1 }
 0x173   :  { %6095 = vst [vmem:[#allocation50_spill] sm:$0xff] %v5170_v14  ;;  %v5187_v14 = vadd.f32 %v3655_v20, %v5175_v13  ;;  %v768_v19 = vpop.f32.mrb[9].mxu1 }
 0x174   :  { %6096 = vst [vmem:[#allocation51_spill] sm:$0xff] %v5173_v36  ;;  %v5193_v61 = vadd.f32 %v768_v19, %v5175_v13 }
 0x175   :  { %6100 = vst [vmem:[#allocation55_spill] sm:$0xff] %v5187_v14 }
 0x176   :  { %v705_v15 = vpop.f32.mrb[20].mxu0  ;;  %6102 = vst [vmem:[#allocation57_spill] sm:$0xff] %v5193_v61 }
 0x177   :  { %v5178_v17 = vadd.f32 %v705_v15, %v5159_v29  ;;  %v707_v37 = vpop.f32.mrb[21].mxu0  ;;  %v3656_v15 = vpop.f32.mrb[10].mxu1 }
 0x178   :  { %v5181_v24 = vadd.f32 %v707_v37, %v5161_v12  ;;  %v709_v0 = vpop.f32.mrb[22].mxu0  ;;  %v5196_v37 = vadd.f32 %v3656_v15, %v5175_v13  ;;  %v771_v36 = vpop.f32.mrb[11].mxu1 }
 0x179   :  { %6097 = vst [vmem:[#allocation52_spill] sm:$0xff] %v5178_v17  ;;  %v5184_v16 = vadd.f32 %v709_v0, %v5159_v29  ;;  %v711_v46 = vpop.f32.mrb[23].mxu0 }
 0x17a   :  { %6098 = vst [vmem:[#allocation53_spill] sm:$0xff] %v5181_v24  ;;  %v5190_v42 = vadd.f32 %v711_v46, %v5161_v12  ;;  %6103 = vst [vmem:[#allocation58_spill] sm:$0xff] %v5196_v37  ;;  %v5199_v24 = vadd.f32 %v771_v36, %v5175_v13 }
 0x17b   :  { %6099 = vst [vmem:[#allocation54_spill] sm:$0xff] %v5184_v16 }
 0x17c   :  { %6101 = vst [vmem:[#allocation56_spill] sm:$0xff] %v5190_v42  ;;  %6104 = vst [vmem:[#allocation59_spill] sm:$0xff] %v5199_v24  ;;  %v3659_v42 = vpop.f32.mrb[12].mxu1 }
 0x17d   :  { %v5211_v15 = vadd.f32 %v3659_v42, %v5175_v13  ;;  %v784_v37 = vpop.f32.mrb[13].mxu1 }
 0x17e   :  { %v715_v0 = vpop.f32.mrb[24].mxu0  ;;  %v5219_v24 = vpop.f32.mrb[14].mxu1 }
 0x17f   :  { %v5202_v17 = vadd.f32 %v715_v0, %v5159_v29  ;;  %v717_v20 = vpop.f32.mrb[25].mxu0  ;;  %6108 = vst [vmem:[#allocation63_spill] sm:$0xff] %v5211_v15  ;;  %v5217_v0 = vadd.f32 %v784_v37, %v5175_v13  ;;  %v357_v37 = vadd.f32 %v5082_v26, %v5080_v25  ;;  %v5237_v26 = vld [vmem:[%s5999_s5] ss:$0 sm:$0xff] }
 0x180   :  { %v5205_v14 = vadd.f32 %v717_v20, %v5161_v12  ;;  %v719_v46 = vpop.f32.mrb[26].mxu0  ;;  %v787_v20 = vpop.f32.mrb[15].mxu1 }
 0x181   :  { %6105 = vst [vmem:[#allocation60_spill] sm:$0xff] %v5202_v17  ;;  %v5208_v19 = vadd.f32 %v719_v46, %v5159_v29  ;;  %v721_v61 = vpop.f32.mrb[27].mxu0  ;;  %6110 = vst [vmem:[#allocation65_spill] sm:$0xff] %v5217_v0  ;;  %v5222_v16 = vadd.f32 %v787_v20, %v5175_v13  ;;  %v359_v0 = vadd.f32 %v5084_v30, %v5086_v31 }
 0x182   :  { %6106 = vst [vmem:[#allocation61_spill] sm:$0xff] %v5205_v14  ;;  %v5214_v36 = vadd.f32 %v721_v61, %v5161_v12 }
 0x183   :  { %6107 = vst [vmem:[#allocation62_spill] sm:$0xff] %v5208_v19  ;;  %6111 = vst [vmem:[#allocation66_spill] sm:$0xff] %v5222_v16 }
 0x184   :  { %6109 = vst [vmem:[#allocation64_spill] sm:$0xff] %v5214_v36 }
 0x186   :  { %v725_v14 = vpop.f32.mrb[28].mxu0 }
 0x187   :  { %v5225_v46 = vadd.f32 %v725_v14, %v5159_v29  ;;  %v727_v17 = vpop.f32.mrb[29].mxu0 }
 0x188   :  { %v5228_v42 = vadd.f32 %v727_v17, %v5161_v12  ;;  %v729_v19 = vpop.f32.mrb[30].mxu0 }
 0x189   :  { %6112 = vst [vmem:[#allocation67_spill] sm:$0xff] %v5225_v46  ;;  %v731_v61 = vpop.f32.mrb[31].mxu0 }
 0x18a   :  { %6113 = vst [vmem:[#allocation68_spill] sm:$0xff] %v5228_v42 }
 0x18e   :  { %v1061_v36 = vpop.f32.mrb[32].mxu0 }
 0x18f   :  { %v1108_v15 = vadd.f32 %v1061_v36, %v357_v37  ;;  %v1063_v20 = vpop.f32.mrb[33].mxu0 }
 0x190   :  { %v1115_v16 = vadd.f32 %v1063_v20, %v359_v0  ;;  %v1065_v8 = vpop.f32.mrb[34].mxu0  ;;  %v1102_v6 = vpop.f32.mrb[16].mxu1 }
 0x191   :  { %v3346_v21 = vmul.f32 -1.442695, %v1108_v15  ;;  %v1066_v14 = vpop.f32.mrb[35].mxu0  ;;  %v3679_v17 = vpop.f32.mrb[17].mxu1  ;;  %v1128_v8 = vadd.f32 %v5237_v26, %v1102_v6 }
 0x192   :  { %v3347_v46 = vmul.f32 -1.442695, %v1115_v16  ;;  %v1105_v42 = vpop.f32.mrb[18].mxu1  ;;  %v430_v16 = vadd.f32 %v5109_v41, %v5095_v11  ;;  %v5244_v17 = vpop.permute.xlu0 %1138 }
 0x193   :  { %4183 = vpow2.f32 %v3346_v21  ;;  %v3680_v4 = vpop.f32.mrb[19].mxu1  ;;  %6114 = vst [vmem:[#allocation69_spill] sm:$0xff] %v5244_v17 }
 0x194   :  { %4185 = vpow2.f32 %v3347_v46  ;;  %v730_v4 = vadd.f32 %v729_v19, %v5159_v29 }
 0x19d   :  { %v4184_v18 = vpop.eup %4183 }
 0x19e   :  { %v1112_v3 = vadd.f32 1.0, %v4184_v18  ;;  %v4186_v25 = vpop.eup %4185 }
 0x19f   :  { %v1119_v30 = vadd.f32 1.0, %v4186_v25 }
 0x1a0   :  { %4187 = vrcp.f32 %v1112_v3  ;;  %v732_v3 = vadd.f32 %v731_v61, %v5161_v12 }
 0x1a1   :  { %4189 = vrcp.f32 %v1119_v30 }
 0x1aa   :  { %v4188_v31 = vpop.eup %4187 }
 0x1ab   :  { %v1129_v21 = vmul.f32 %v4188_v31, %v1128_v8  ;;  %v4190_v6 = vpop.eup %4189 }
 0x1ac   :  { %v1132_v11 = vsub.f32 1.0, %v4190_v6  ;;  %v1134_v12 = vmul.f32 0.0, %v4190_v6 }
 0x1ad   :  { %v1130_v15 = vadd.f32 %v1129_v21, %v430_v16  ;;  %v5246_v16 = vpop.permute.xlu0 %1145 }
 0x1ae   :  { %v1316_v18 = vpop.f32.mrb[36].mxu0  ;;  %6115 = vst [vmem:[#allocation70_spill] sm:$0xff] %v5246_v16  ;;  %v1148_v21 = vmul.f32 0.0, %v5246_v16 }
 0x1af   :  { %4191 = vtanh.f32 %v1130_v15  ;;  %v1363_v36 = vadd.f32 %v1316_v18, %v730_v4  ;;  %v1318_v0 = vpop.f32.mrb[37].mxu0 }
 0x1b0   :  { %v1370_v46 = vadd.f32 %v1318_v0, %v732_v3  ;;  %v1320_v42 = vpop.f32.mrb[38].mxu0  ;;  %v1357_v41 = vpop.f32.mrb[20].mxu1  ;;  %v5257_v0 = vld [vmem:[%s6003_s9] ss:$0 sm:$0xff] }
 0x1b1   :  { %v3373_v37 = vmul.f32 -1.442695, %v1363_v36  ;;  %v1321_v20 = vpop.f32.mrb[39].mxu0  ;;  %v3699_v29 = vpop.f32.mrb[21].mxu1 }
 0x1b2   :  { %v3374_v14 = vmul.f32 -1.442695, %v1370_v46  ;;  %v1360_v61 = vpop.f32.mrb[22].mxu1  ;;  %v6116_v46 = vmov 0.0   ;;  %v6117_v20 = vmov 0  }
 0x1b3   :  { %4193 = vpow2.f32 %v3373_v37  ;;  %v3700_v30 = vpop.f32.mrb[23].mxu1  ;;  %v1383_v37 = vadd.f32 %v5257_v0, %v1357_v41 }
 0x1b4   :  { %4195 = vpow2.f32 %v3374_v14  ;;  %v796_v14 = vadd.f32 %v5219_v24, %v5175_v13  ;;  %v5285_v13 = vpop.permute.xlu1 %1393 }
 0x1b5   :  { %6118 = vst [vmem:[#allocation71_spill] sm:$0xff] %v5285_v13 }
 0x1b8   :  { %v5291_v30 = vpop.permute.xlu1 %1400 }
 0x1b9   :  { %v4192_v25 = vpop.eup %4191  ;;  %6119 = vst [vmem:[#allocation72_spill] sm:$0xff] %v5291_v30 }
 0x1ba   :  { %v1133_v19 = vmul.f32 %v4192_v25, %v1132_v11 }
 0x1bc   :  { %v1135_v8 = vadd.f32 %v1134_v12, %v1133_v19 }
 0x1bd   :  { %v4194_v31 = vpop.eup %4193 }
 0x1be   :  { %v1367_v4 = vadd.f32 1.0, %v4194_v31  ;;  %v1141_v15 = vmul.f32 %v5244_v17, %v1135_v8  ;;  %v4196_v36 = vpop.eup %4195  ;;  %v1403_v8 = vmul.f32 0.0, %v5291_v30  ;;  %v5580_v30 = vld [vmem:[#allocation8 + $0x90] ss:$12 sps:$4 sm:$0xff]  }
 0x1bf   :  { %v1374_v42 = vadd.f32 1.0, %v4196_v36 }
 0x1c0   :  { %4197 = vrcp.f32 %v1367_v4  ;;  %v5250_v3 = vadd.f32 %v1148_v21, %v1141_v15 }
 0x1c1   :  { %4199 = vrcp.f32 %v1374_v42 }
 0x1c2   :  { %v1415_v18 = vpack.c.bf16 %v5250_v3, %v5250_v3 }
 0x1c4   :  { %1449 = vmatmul.mubr.bf16.vlgmr.msra.gmra.mrb[40].mxu0 %v1415_v18  ;;  %3718 = vmatmul.mubr.bf16.vlgmr.msra.gmra.mrb[24].mxu1 %v1415_v18  ;;  %v6132_v18 = vld [vmem:[#allocation27_spill] sm:$0xff] }
 0x1c5   :  { %1539 = vmatpush1.bf16.msra.mxu0 %v4935_v22  ;;  %3722 = vmatpush3.bf16.msra.mxu1 %v4967_v34 }
 0x1c6   :  { %1540 = vmatprep.subr.bf16.mxu0 %v4938_v23  ;;  %3723 = vmatprep.subr.bf16.mxu1 %v6116_v46 }
 0x1c7   :  { %1570 = vmatprep.mubr.bf16.mxu0 %v6117_v20  ;;  %3737 = vmatprep.mubr.msk.bf16.mxu1 %vm4567_vm4, %v6116_v46 }
 0x1c9   :  { %1541 = vmatpush1.bf16.msra.mxu0 %v4948_v27  ;;  %3724 = vmatpush3.bf16.msra.mxu1 %v4980_v39 }
 0x1ca   :  { %v4198_v6 = vpop.eup %4197  ;;  %1542 = vmatprep.subr.bf16.mxu0 %v4952_v28  ;;  %3725 = vmatprep.subr.bf16.mxu1 %v6116_v46 }
 0x1cb   :  { %v1384_v11 = vmul.f32 %v4198_v6, %v1383_v37  ;;  %v4200_v24 = vpop.eup %4199  ;;  %v6133_v6 = vld [vmem:[#allocation28_spill] sm:$0xff] }
 0x1cc   :  { %v1387_v25 = vsub.f32 1.0, %v4200_v24  ;;  %v1389_v12 = vmul.f32 0.0, %v4200_v24 }
 0x1cd   :  { %v1385_v41 = vadd.f32 %v1384_v11, %v796_v14  ;;  %1543 = vmatpush1.bf16.msra.mxu0 %v4960_v32  ;;  %3726 = vmatpush3.bf16.msra.mxu1 %v4993_v44 }
 0x1ce   :  { %1544 = vmatprep.subr.bf16.mxu0 %v4963_v33  ;;  %3727 = vmatprep.subr.bf16.mxu1 %v6116_v46 }
 0x1cf   :  { %4201 = vtanh.f32 %v1385_v41 }
 0x1d1   :  { %1545 = vmatpush1.bf16.msra.mxu0 %v4971_v35  ;;  %3728 = vmatpush3.bf16.msra.mxu1 %v5003_v48 }
 0x1d2   :  { %1546 = vmatprep.subr.bf16.mxu0 %v4975_v38  ;;  %3729 = vmatprep.subr.bf16.mxu1 %v6116_v46 }
 0x1d5   :  { %1547 = vmatpush1.bf16.msra.mxu0 %v4986_v40  ;;  %3730 = vmatpush3.bf16.msra.mxu1 %v5013_v52 }
 0x1d6   :  { %1548 = vmatprep.subr.bf16.mxu0 %v4990_v43  ;;  %3731 = vmatprep.subr.bf16.mxu1 %v6116_v46 }
 0x1d9   :  { %v4202_v29 = vpop.eup %4201  ;;  %1549 = vmatpush1.bf16.msra.mxu0 %v4997_v45  ;;  %3732 = vmatpush3.bf16.msra.mxu1 %v5021_v2 }
 0x1da   :  { %v1388_v19 = vmul.f32 %v4202_v29, %v1387_v25  ;;  %1550 = vmatprep.subr.bf16.mxu0 %v5000_v47  ;;  %3733 = vmatprep.subr.bf16.mxu1 %v6116_v46 }
 0x1dc   :  { %v1390_v61 = vadd.f32 %v1389_v12, %v1388_v19 }
 0x1dd   :  { %1551 = vmatpush1.bf16.msra.mxu0 %v5007_v49  ;;  %3734 = vmatpush3.bf16.msra.mxu1 %v5027_v5 }
 0x1de   :  { %v1396_v31 = vmul.f32 %v5285_v13, %v1390_v61  ;;  %1552 = vmatprep.subr.bf16.mxu0 %v5010_v50  ;;  %3735 = vmatprep.subr.bf16.mxu1 %v6116_v46  ;;  %v5583_v13 = vld [vmem:[#allocation8 + $0x98] ss:$12 sps:$4 sm:$0xff]  }
 0x1e0   :  { %v5299_v21 = vadd.f32 %v1403_v8, %v1396_v31 }
 0x1e1   :  { %1553 = vmatpush1.bf16.msra.mxu0 %v5017_v55  ;;  %3736 = vmatpush3.bf16.msra.mxu1 %v5035_v9 }
 0x1e2   :  { %v1537_v4 = vpack.c.bf16 %v5299_v21, %v5299_v21  ;;  %1666 = vmatprep.subr.bf16.mxu0 %v4835_v51  ;;  %3741 = vmatprep.subr.bf16.mxu1 %v6116_v46  ;;  %v6120_v51 = vld [vmem:[#allocation15_spill] sm:$0xff] }
 0x1e4   :  { %1571 = vmatmul.mubr.bf16.vlgmr.msra.gmra.mrb[44].mxu0 %v1537_v4  ;;  %3738 = vmatmul.mubr.bf16.vlgmr.msra.gmra.mrb[28].mxu1 %v1537_v4 }
 0x1e5   :  { %1667 = vmatpush1.bf16.msra.mxu0 %v4837_v53  ;;  %3742 = vmatpush3.bf16.msra.mxu1 %v4856_v60  ;;  %v6121_v53 = vld [vmem:[#allocation21_spill] sm:$0xff] }
 0x1e6   :  { %1668 = vmatprep.subr.bf16.mxu0 %v4840_v54  ;;  %3743 = vmatprep.subr.bf16.mxu1 %v6116_v46  ;;  %v6122_v54 = vld [vmem:[#allocation16_spill] sm:$0xff]  ;;  %v6127_v60 = vld [vmem:[#allocation25_spill] sm:$0xff] }
 0x1e7   :  { %1698 = vmatprep.mubr.bf16.mxu0 %v6117_v20  ;;  %3757 = vmatprep.mubr.msk.bf16.mxu1 %vm4567_vm4, %v6116_v46 }
 0x1e9   :  { %1669 = vmatpush1.bf16.msra.mxu0 %v4844_v56  ;;  %3744 = vmatpush3.bf16.msra.mxu1 %v4869_v1  ;;  %v6123_v56 = vld [vmem:[#allocation17_spill] sm:$0xff]  ;;  %v6130_v1 = vld [vmem:[#allocation26_spill] sm:$0xff] }
 0x1ea   :  { %1670 = vmatprep.subr.bf16.mxu0 %v4848_v57  ;;  %3745 = vmatprep.subr.bf16.mxu1 %v6116_v46  ;;  %v6124_v57 = vld [vmem:[#allocation24_spill] sm:$0xff] }
 0x1ed   :  { %1671 = vmatpush1.bf16.msra.mxu0 %v4851_v58  ;;  %3746 = vmatpush3.bf16.msra.mxu1 %v4890_v7  ;;  %v6125_v58 = vld [vmem:[#allocation18_spill] sm:$0xff]  ;;  %v6131_v7 = vld [vmem:[#allocation23_spill] sm:$0xff] }
 0x1ee   :  { %1672 = vmatprep.subr.bf16.mxu0 %v4854_v59  ;;  %3747 = vmatprep.subr.bf16.mxu1 %v6116_v46  ;;  %v6126_v59 = vld [vmem:[#allocation19_spill] sm:$0xff] }
 0x1f1   :  { %1673 = vmatpush1.bf16.msra.mxu0 %v4861_v62  ;;  %3748 = vmatpush3.bf16.msra.mxu1 %v4900_v10  ;;  %v6128_v62 = vld [vmem:[#allocation20_spill] sm:$0xff] }
 0x1f2   :  { %1674 = vmatprep.subr.bf16.mxu0 %v4865_v63  ;;  %3749 = vmatprep.subr.bf16.mxu1 %v6116_v46  ;;  %v6129_v63 = vld [vmem:[#allocation22_spill] sm:$0xff] }
 0x1f5   :  { %1675 = vmatpush1.bf16.msra.mxu0 %v6120_v51  ;;  %3750 = vmatpush3.bf16.msra.mxu1 %v6121_v53 }
 0x1f6   :  { %1676 = vmatprep.subr.bf16.mxu0 %v6122_v54  ;;  %3751 = vmatprep.subr.bf16.mxu1 %v6116_v46  ;;  %v6134_v54 = vld [vmem:[#allocation35_spill] sm:$0xff] }
 0x1f9   :  { %1677 = vmatpush1.bf16.msra.mxu0 %v6123_v56  ;;  %3752 = vmatpush3.bf16.msra.mxu1 %v6124_v57 }
 0x1fa   :  { %1678 = vmatprep.subr.bf16.mxu0 %v6125_v58  ;;  %3753 = vmatprep.subr.bf16.mxu1 %v6116_v46 }
 0x1fd   :  { %1679 = vmatpush1.bf16.msra.mxu0 %v6126_v59  ;;  %3754 = vmatpush3.bf16.msra.mxu1 %v6127_v60  ;;  %v6135_v59 = vld [vmem:[#allocation67_spill] sm:$0xff] }
 0x1fe   :  { %1680 = vmatprep.subr.bf16.mxu0 %v6128_v62  ;;  %3755 = vmatprep.subr.bf16.mxu1 %v6116_v46 }
 0x201   :  { %1681 = vmatpush1.bf16.msra.mxu0 %v6129_v63  ;;  %3756 = vmatpush3.bf16.msra.mxu1 %v6130_v1 }
 0x202   :  { %1788 = vmatprep.subr.bf16.mxu0 %v6131_v7  ;;  %3761 = vmatprep.subr.bf16.mxu1 %v6116_v46  ;;  %v6136_v7 = vld [vmem:[#allocation68_spill] sm:$0xff] }
 0x297   :  { %v1450_v10 = vpop.f32.mrb[40].mxu0  ;;  %v1491_v15 = vpop.f32.mrb[24].mxu1 }
 0x298   :  { %v1497_v36 = vadd.f32 %v1450_v10, %v6132_v18  ;;  %v1452_v42 = vpop.f32.mrb[41].mxu0  ;;  %v3719_v37 = vpop.f32.mrb[25].mxu1  ;;  %v1511_v4 = vadd.f32 %v5237_v26, %v1491_v15 }
 0x299   :  { %v1504_v14 = vadd.f32 %v1452_v42, %v6133_v6  ;;  %v1454_v11 = vpop.f32.mrb[42].mxu0  ;;  %v1494_v41 = vpop.f32.mrb[26].mxu1 }
 0x29a   :  { %v3378_v24 = vmul.f32 -1.442695, %v1497_v36  ;;  %v1455_v25 = vpop.f32.mrb[43].mxu0  ;;  %v3720_v29 = vpop.f32.mrb[27].mxu1 }
 0x29b   :  { %v3379_v19 = vmul.f32 -1.442695, %v1504_v14  ;;  %v5349_v29 = vpop.permute.xlu1 %1528 }
 0x29c   :  { %4203 = vpow2.f32 %v3378_v24  ;;  %6137 = vst [vmem:[#allocation15_spill] sm:$0xff] %v5349_v29 }
 0x29d   :  { %4205 = vpow2.f32 %v3379_v19 }
 0x2a6   :  { %v4204_v12 = vpop.eup %4203 }
 0x2a7   :  { %v1501_v61 = vadd.f32 1.0, %v4204_v12  ;;  %v4206_v8 = vpop.eup %4205 }
 0x2a8   :  { %v1508_v31 = vadd.f32 1.0, %v4206_v8  ;;  %v1531_v8 = vmul.f32 %v5349_v29, %v5250_v3  ;;  %v5598_v29 = vld [vmem:[#allocation8 + $0xb0] ss:$12 sps:$4 sm:$0xff]  }
 0x2a9   :  { %4207 = vrcp.f32 %v1501_v61  ;;  %v5351_v61 = vpop.permute.xlu0 %1521 }
 0x2aa   :  { %4209 = vrcp.f32 %v1508_v31  ;;  %6138 = vst [vmem:[#allocation21_spill] sm:$0xff] %v5351_v61 }
 0x2b3   :  { %v4208_v51 = vpop.eup %4207 }
 0x2b4   :  { %v1512_v53 = vmul.f32 %v4208_v51, %v1511_v4  ;;  %v4210_v15 = vpop.eup %4209 }
 0x2b5   :  { %v1515_v11 = vsub.f32 1.0, %v4210_v15  ;;  %v1517_v25 = vmul.f32 %v4210_v15, %v5250_v3  ;;  %v5480_v15 = vld [vmem:[#allocation4 + $0xac] ss:$12 sps:$4 sm:$0xff]  }
 0x2b6   :  { %v1513_v56 = vadd.f32 %v1512_v53, %v6134_v54  ;;  %6151 = vst [vmem:[#allocation28_spill] sm:$0xff] %v5480_v15 }
 0x2b7   :  { %v1572_v57 = vpop.f32.mrb[44].mxu0  ;;  %v1613_v58 = vpop.f32.mrb[28].mxu1 }
 0x2b8   :  { %4211 = vtanh.f32 %v1513_v56  ;;  %v1619_v60 = vadd.f32 %v1572_v57, %v6135_v59  ;;  %v1574_v62 = vpop.f32.mrb[45].mxu0  ;;  %v3739_v63 = vpop.f32.mrb[29].mxu1  ;;  %v1633_v56 = vadd.f32 %v5257_v0, %v1613_v58  ;;  %v5440_v58 = vld [vmem:[#allocation4 + $0x4c] ss:$12 sps:$4 sm:$0xff]   ;;  %v5444_v59 = vld [vmem:[#allocation4 + $0x48] ss:$12 sps:$4 sm:$0xff]  }
 0x2b9   :  { %v1626_v10 = vadd.f32 %v1574_v62, %v6136_v7  ;;  %v1576_v18 = vpop.f32.mrb[46].mxu0  ;;  %v1616_v36 = vpop.f32.mrb[30].mxu1  ;;  %v5450_v62 = vld [vmem:[#allocation4 + $0x64] ss:$12 sps:$4 sm:$0xff]   ;;  %v5454_v63 = vld [vmem:[#allocation4 + $0x60] ss:$12 sps:$4 sm:$0xff]  }
 0x2ba   :  { %v3380_v42 = vmul.f32 -1.442695, %v1619_v60  ;;  %v1577_v37 = vpop.f32.mrb[47].mxu0  ;;  %v3740_v6 = vpop.f32.mrb[31].mxu1  ;;  %v5447_v60 = vld [vmem:[#allocation4 + $0x50] ss:$12 sps:$4 sm:$0xff]  }
 0x2bb   :  { %v3381_v14 = vmul.f32 -1.442695, %v1626_v10  ;;  %6142 = vst [vmem:[#allocation24_spill] sm:$0xff] %v5450_v62  ;;  %6143 = vst [vmem:[#allocation18_spill] sm:$0xff] %v5454_v63  ;;  %v5457_v7 = vld [vmem:[#allocation4 + $0x68] ss:$12 sps:$4 sm:$0xff]  }
 0x2bc   :  { %4213 = vpow2.f32 %v3380_v42  ;;  %6144 = vst [vmem:[#allocation19_spill] sm:$0xff] %v5457_v7  ;;  %v5460_v10 = vld [vmem:[#allocation4 + $0x7c] ss:$12 sps:$4 sm:$0xff]   ;;  %v5464_v18 = vld [vmem:[#allocation4 + $0x78] ss:$12 sps:$4 sm:$0xff]  }
 0x2bd   :  { %4215 = vpow2.f32 %v3381_v14  ;;  %6145 = vst [vmem:[#allocation25_spill] sm:$0xff] %v5460_v10  ;;  %6146 = vst [vmem:[#allocation20_spill] sm:$0xff] %v5464_v18  ;;  %v5467_v36 = vld [vmem:[#allocation4 + $0x80] ss:$12 sps:$4 sm:$0xff]   ;;  %v5474_v37 = vld [vmem:[#allocation4 + $0x90] ss:$12 sps:$4 sm:$0xff]  }
 0x2be   :  { %6147 = vst [vmem:[#allocation22_spill] sm:$0xff] %v5467_v36  ;;  %v5470_v42 = vld [vmem:[#allocation4 + $0x94] ss:$12 sps:$4 sm:$0xff]   ;;  %6149 = vst [vmem:[#allocation23_spill] sm:$0xff] %v5474_v37  ;;  %v5477_v6 = vld [vmem:[#allocation4 + $0x98] ss:$12 sps:$4 sm:$0xff]  }
 0x2bf   :  { %6148 = vst [vmem:[#allocation26_spill] sm:$0xff] %v5470_v42  ;;  %6150 = vst [vmem:[#allocation27_spill] sm:$0xff] %v5477_v6  ;;  %v5484_v14 = vld [vmem:[#allocation4 + $0xa8] ss:$12 sps:$4 sm:$0xff]  }
 0x2c0   :  { %6152 = vst [vmem:[#allocation35_spill] sm:$0xff] %v5484_v14 }
 0x2c2   :  { %v4212_v41 = vpop.eup %4211 }
 0x2c3   :  { %v1516_v24 = vmul.f32 %v4212_v41, %v1515_v11  ;;  %v5488_v11 = vld [vmem:[#allocation8 + $0x4] ss:$12 sps:$4 sm:$0xff]  }
 0x2c4   :  { %6153 = vst [vmem:[#allocation67_spill] sm:$0xff] %v5488_v11 }
 0x2c5   :  { %v1518_v19 = vadd.f32 %v1517_v25, %v1516_v24  ;;  %v6154_v25 = vld [vmem:[#allocation29_spill] sm:$0xff] }
 0x2c6   :  { %v4214_v12 = vpop.eup %4213 }
 0x2c7   :  { %v1623_v31 = vadd.f32 1.0, %v4214_v12  ;;  %v1524_v4 = vmul.f32 %v5351_v61, %v1518_v19  ;;  %v4216_v54 = vpop.eup %4215 }
 0x2c8   :  { %v1630_v3 = vadd.f32 1.0, %v4216_v54 }
 0x2c9   :  { %4217 = vrcp.f32 %v1623_v31  ;;  %v5356_v51 = vadd.f32 %v1531_v8, %v1524_v4  ;;  %v6155_v31 = vld [vmem:[#allocation30_spill] sm:$0xff] }
 0x2ca   :  { %4219 = vrcp.f32 %v1630_v3 }
 0x2cb   :  { %v1665_v53 = vpack.c.bf16 %v5356_v51, %v5356_v51 }
 0x2cd   :  { %1699 = vmatmul.mubr.bf16.vlgmr.msra.gmra.mrb[48].mxu0 %v1665_v53  ;;  %3758 = vmatmul.mubr.bf16.vlgmr.msra.gmra.mrb[32].mxu1 %v1665_v53 }
 0x2ce   :  { %1789 = vmatpush1.bf16.msra.mxu0 %v4935_v22  ;;  %3762 = vmatpush3.bf16.msra.mxu1 %v4967_v34 }
 0x2cf   :  { %1790 = vmatprep.subr.bf16.mxu0 %v4938_v23  ;;  %3763 = vmatprep.subr.bf16.mxu1 %v6116_v46  ;;  %v6139_v23 = vld [vmem:[#allocation63_spill] sm:$0xff] }
 0x2d0   :  { %1820 = vmatprep.mubr.bf16.mxu0 %v6117_v20  ;;  %3777 = vmatprep.mubr.msk.bf16.mxu1 %vm4567_vm4, %v6116_v46 }
 0x2d2   :  { %1791 = vmatpush1.bf16.msra.mxu0 %v4948_v27  ;;  %3764 = vmatpush3.bf16.msra.mxu1 %v4980_v39  ;;  %v5390_v39 = vpop.permute.xlu0 %1643 }
 0x2d3   :  { %v4218_v57 = vpop.eup %4217  ;;  %1792 = vmatprep.subr.bf16.mxu0 %v4952_v28  ;;  %3765 = vmatprep.subr.bf16.mxu1 %v6116_v46  ;;  %6140 = vst [vmem:[#allocation16_spill] sm:$0xff] %v5390_v39 }
 0x2d4   :  { %v1634_v22 = vmul.f32 %v4218_v57, %v1633_v56  ;;  %v4220_v27 = vpop.eup %4219 }
 0x2d5   :  { %v1637_v28 = vsub.f32 1.0, %v4220_v27 }
 0x2d6   :  { %v1635_v34 = vadd.f32 %v1634_v22, %v6139_v23  ;;  %1793 = vmatpush1.bf16.msra.mxu0 %v4960_v32  ;;  %3766 = vmatpush3.bf16.msra.mxu1 %v4993_v44 }
 0x2d7   :  { %1794 = vmatprep.subr.bf16.mxu0 %v4963_v33  ;;  %3767 = vmatprep.subr.bf16.mxu1 %v6116_v46 }
 0x2d8   :  { %4221 = vtanh.f32 %v1635_v34 }
 0x2da   :  { %1795 = vmatpush1.bf16.msra.mxu0 %v4971_v35  ;;  %3768 = vmatpush3.bf16.msra.mxu1 %v5003_v48  ;;  %v1639_v35 = vmul.f32 %v4220_v27, %v5299_v21  ;;  %v5407_v48 = vld [vmem:[#allocation4 + $0x4] ss:$12 sps:$4 sm:$0xff]  }
 0x2db   :  { %1796 = vmatprep.subr.bf16.mxu0 %v4975_v38  ;;  %3769 = vmatprep.subr.bf16.mxu1 %v6116_v46 }
 0x2de   :  { %1797 = vmatpush1.bf16.msra.mxu0 %v4986_v40  ;;  %3770 = vmatpush3.bf16.msra.mxu1 %v5013_v52  ;;  %v5392_v40 = vpop.permute.xlu1 %1650  ;;  %v5417_v52 = vld [vmem:[#allocation4 + $0x1c] ss:$12 sps:$4 sm:$0xff]  }
 0x2df   :  { %1798 = vmatprep.subr.bf16.mxu0 %v4990_v43  ;;  %3771 = vmatprep.subr.bf16.mxu1 %v6116_v46  ;;  %6141 = vst [vmem:[#allocation17_spill] sm:$0xff] %v5392_v40  ;;  %v1653_v43 = vmul.f32 %v5392_v40, %v5299_v21  ;;  %v5437_v21 = vld [vmem:[#allocation4 + $0x38] ss:$12 sps:$4 sm:$0xff]  }
 0x2e2   :  { %v4222_v32 = vpop.eup %4221  ;;  %1799 = vmatpush1.bf16.msra.mxu0 %v4997_v45  ;;  %3772 = vmatpush3.bf16.msra.mxu1 %v5021_v2  ;;  %v5427_v2 = vld [vmem:[#allocation4 + $0x20] ss:$12 sps:$4 sm:$0xff]  }
 0x2e3   :  { %v1638_v33 = vmul.f32 %v4222_v32, %v1637_v28  ;;  %1800 = vmatprep.subr.bf16.mxu0 %v5000_v47  ;;  %3773 = vmatprep.subr.bf16.mxu1 %v6116_v46 }
 0x2e5   :  { %v1640_v38 = vadd.f32 %v1639_v35, %v1638_v33  ;;  %v6156_v35 = vld [vmem:[#allocation32_spill] sm:$0xff] }
 0x2e6   :  { %1801 = vmatpush1.bf16.msra.mxu0 %v5007_v49  ;;  %3774 = vmatpush3.bf16.msra.mxu1 %v5027_v5  ;;  %v5411_v49 = vld [vmem:[#allocation4] ss:$12 sps:$4 sm:$0xff]  }
 0x2e7   :  { %1802 = vmatprep.subr.bf16.mxu0 %v5010_v50  ;;  %3775 = vmatprep.subr.bf16.mxu1 %v6116_v46  ;;  %v1646_v44 = vmul.f32 %v5390_v39, %v1640_v38  ;;  %v5414_v50 = vld [vmem:[#allocation4 + $0x8] ss:$12 sps:$4 sm:$0xff]  }
 0x2e8   :  { %v5430_v5 = vld [vmem:[#allocation4 + $0x34] ss:$12 sps:$4 sm:$0xff]  }
 0x2e9   :  { %v5401_v45 = vadd.f32 %v1653_v43, %v1646_v44 }
 0x2ea   :  { %1803 = vmatpush1.bf16.msra.mxu0 %v5017_v55  ;;  %3776 = vmatpush3.bf16.msra.mxu1 %v5035_v9  ;;  %v5424_v55 = vld [vmem:[#allocation4 + $0x18] ss:$12 sps:$4 sm:$0xff]   ;;  %v5434_v9 = vld [vmem:[#allocation4 + $0x30] ss:$12 sps:$4 sm:$0xff]  }
 0x2eb   :  { %v1787_v47 = vpack.c.bf16 %v5401_v45, %v5401_v45  ;;  %1916 = vmatprep.subr.bf16.mxu0 %v5407_v48  ;;  %3781 = vmatprep.subr.bf16.mxu1 %v6116_v46 }
 0x2ed   :  { %1821 = vmatmul.mubr.bf16.vlgmr.msra.gmra.mrb[52].mxu0 %v1787_v47  ;;  %3778 = vmatmul.mubr.bf16.vlgmr.msra.gmra.mrb[36].mxu1 %v1787_v47  ;;  %v6157_v47 = vld [vmem:[#allocation62_spill] sm:$0xff] }
 0x2ee   :  { %1917 = vmatpush1.bf16.msra.mxu0 %v5411_v49  ;;  %3782 = vmatpush3.bf16.msra.mxu1 %v5414_v50 }
 0x2ef   :  { %1918 = vmatprep.subr.bf16.mxu0 %v5417_v52  ;;  %3783 = vmatprep.subr.bf16.mxu1 %v6116_v46 }
 0x2f0   :  { %1948 = vmatprep.mubr.bf16.mxu0 %v6117_v20  ;;  %3797 = vmatprep.mubr.msk.bf16.mxu1 %vm4567_vm4, %v6116_v46 }
 0x2f2   :  { %1919 = vmatpush1.bf16.msra.mxu0 %v5424_v55  ;;  %3784 = vmatpush3.bf16.msra.mxu1 %v5427_v2 }
 0x2f3   :  { %1920 = vmatprep.subr.bf16.mxu0 %v5430_v5  ;;  %3785 = vmatprep.subr.bf16.mxu1 %v6116_v46 }
 0x2f6   :  { %1921 = vmatpush1.bf16.msra.mxu0 %v5434_v9  ;;  %3786 = vmatpush3.bf16.msra.mxu1 %v5437_v21 }
 0x2f7   :  { %1922 = vmatprep.subr.bf16.mxu0 %v5440_v58  ;;  %3787 = vmatprep.subr.bf16.mxu1 %v6116_v46 }
 0x2fa   :  { %1923 = vmatpush1.bf16.msra.mxu0 %v5444_v59  ;;  %3788 = vmatpush3.bf16.msra.mxu1 %v5447_v60 }
 0x2fb   :  { %1924 = vmatprep.subr.bf16.mxu0 %v5450_v62  ;;  %3789 = vmatprep.subr.bf16.mxu1 %v6116_v46 }
 0x2fe   :  { %1925 = vmatpush1.bf16.msra.mxu0 %v5454_v63  ;;  %3790 = vmatpush3.bf16.msra.mxu1 %v5457_v7 }
 0x2ff   :  { %1926 = vmatprep.subr.bf16.mxu0 %v5460_v10  ;;  %3791 = vmatprep.subr.bf16.mxu1 %v6116_v46 }
 0x302   :  { %1927 = vmatpush1.bf16.msra.mxu0 %v5464_v18  ;;  %3792 = vmatpush3.bf16.msra.mxu1 %v5467_v36 }
 0x303   :  { %1928 = vmatprep.subr.bf16.mxu0 %v5470_v42  ;;  %3793 = vmatprep.subr.bf16.mxu1 %v6116_v46 }
 0x306   :  { %1929 = vmatpush1.bf16.msra.mxu0 %v5474_v37  ;;  %3794 = vmatpush3.bf16.msra.mxu1 %v5477_v6 }
 0x307   :  { %1930 = vmatprep.subr.bf16.mxu0 %v5480_v15  ;;  %3795 = vmatprep.subr.bf16.mxu1 %v6116_v46 }
 0x30a   :  { %1931 = vmatpush1.bf16.msra.mxu0 %v5484_v14  ;;  %3796 = vmatpush3.bf16.msra.mxu1 %v6130_v1 }
 0x30b   :  { %2038 = vmatprep.subr.bf16.mxu0 %v5488_v11  ;;  %3801 = vmatprep.subr.bf16.mxu1 %v6116_v46 }
 0x3a0   :  { %v1700_v41 = vpop.f32.mrb[48].mxu0  ;;  %v1741_v24 = vpop.f32.mrb[32].mxu1 }
 0x3a1   :  { %v1747_v19 = vadd.f32 %v1700_v41, %v6154_v25  ;;  %v1702_v12 = vpop.f32.mrb[49].mxu0  ;;  %v3759_v8 = vpop.f32.mrb[33].mxu1  ;;  %v1761_v28 = vadd.f32 %v5237_v26, %v1741_v24 }
 0x3a2   :  { %v1754_v4 = vadd.f32 %v1702_v12, %v6155_v31  ;;  %v1704_v53 = vpop.f32.mrb[50].mxu0  ;;  %v1744_v54 = vpop.f32.mrb[34].mxu1  ;;  %v6158_v12 = vld [vmem:[#allocation64_spill] sm:$0xff] }
 0x3a3   :  { %v3384_v3 = vmul.f32 -1.442695, %v1747_v19  ;;  %v1705_v56 = vpop.f32.mrb[51].mxu0  ;;  %v3760_v57 = vpop.f32.mrb[35].mxu1 }
 0x3a4   :  { %v3385_v1 = vmul.f32 -1.442695, %v1754_v4 }
 0x3a5   :  { %4223 = vpow2.f32 %v3384_v3 }
 0x3a6   :  { %4225 = vpow2.f32 %v3385_v1 }
 0x3af   :  { %v4224_v22 = vpop.eup %4223 }
 0x3b0   :  { %v1751_v23 = vadd.f32 1.0, %v4224_v22  ;;  %v4226_v34 = vpop.eup %4225 }
 0x3b1   :  { %v1758_v27 = vadd.f32 1.0, %v4226_v34 }
 0x3b2   :  { %4227 = vrcp.f32 %v1751_v23 }
 0x3b3   :  { %4229 = vrcp.f32 %v1758_v27 }
 0x3bc   :  { %v4228_v32 = vpop.eup %4227 }
 0x3bd   :  { %v1762_v33 = vmul.f32 %v4228_v32, %v1761_v28  ;;  %v4230_v24 = vpop.eup %4229  ;;  %v5499_v28 = vpop.permute.xlu0 %1771 }
 0x3be   :  { %v1765_v57 = vsub.f32 1.0, %v4230_v24  ;;  %v1767_v23 = vmul.f32 %v4230_v24, %v5356_v51  ;;  %6159 = vst [vmem:[#allocation68_spill] sm:$0xff] %v5499_v28  ;;  %v5501_v32 = vpop.permute.xlu1 %1778  ;;  %v6161_v24 = vld [vmem:[#allocation66_spill] sm:$0xff] }
 0x3bf   :  { %v1763_v38 = vadd.f32 %v1762_v33, %v6156_v35  ;;  %6160 = vst [vmem:[#allocation63_spill] sm:$0xff] %v5501_v32 }
 0x3c0   :  { %v1822_v43 = vpop.f32.mrb[52].mxu0  ;;  %v1863_v44 = vpop.f32.mrb[36].mxu1 }
 0x3c1   :  { %4231 = vtanh.f32 %v1763_v38  ;;  %v1869_v41 = vadd.f32 %v1822_v43, %v6157_v47  ;;  %v1824_v25 = vpop.f32.mrb[53].mxu0  ;;  %v3779_v19 = vpop.f32.mrb[37].mxu1  ;;  %v1781_v38 = vmul.f32 %v5501_v32, %v5356_v51  ;;  %v6166_v32 = vld [vmem:[#allocation33_spill] sm:$0xff] }
 0x3c2   :  { %v1876_v8 = vadd.f32 %v1824_v25, %v6158_v12  ;;  %v1826_v31 = vpop.f32.mrb[54].mxu0  ;;  %v1866_v4 = vpop.f32.mrb[38].mxu1  ;;  %v5510_v25 = vld [vmem:[#allocation8] ss:$12 sps:$4 sm:$0xff]   ;;  %v5513_v19 = vld [vmem:[#allocation8 + $0x8] ss:$12 sps:$4 sm:$0xff]  }
 0x3c3   :  { %v3386_v53 = vmul.f32 -1.442695, %v1869_v41  ;;  %v1827_v54 = vpop.f32.mrb[55].mxu0  ;;  %v3780_v3 = vpop.f32.mrb[39].mxu1  ;;  %v5516_v12 = vld [vmem:[#allocation8 + $0x1c] ss:$12 sps:$4 sm:$0xff]  }
 0x3c4   :  { %v3387_v56 = vmul.f32 -1.442695, %v1876_v8  ;;  %v1883_v8 = vadd.f32 %v5257_v0, %v1863_v44  ;;  %v5524_v31 = vld [vmem:[#allocation8 + $0x18] ss:$12 sps:$4 sm:$0xff]   ;;  %v5527_v4 = vld [vmem:[#allocation8 + $0x20] ss:$12 sps:$4 sm:$0xff]   ;;  %v5576_v16 = vpop.permute.xlu0 %1893  ;;  %v5578_v17 = vpop.permute.xlu1 %1900 }
 0x3c5   :  { %4233 = vpow2.f32 %v3386_v53  ;;  %v5530_v54 = vld [vmem:[#allocation8 + $0x34] ss:$12 sps:$4 sm:$0xff]   ;;  %v5535_v44 = vld [vmem:[#allocation8 + $0x30] ss:$12 sps:$4 sm:$0xff]   ;;  %6162 = vst [vmem:[#allocation29_spill] sm:$0xff] %v5576_v16  ;;  %6163 = vst [vmem:[#allocation30_spill] sm:$0xff] %v5578_v17 }
 0x3c6   :  { %4235 = vpow2.f32 %v3387_v56 }
 0x3cb   :  { %v4232_v1 = vpop.eup %4231 }
 0x3cc   :  { %v1766_v22 = vmul.f32 %v4232_v1, %v1765_v57  ;;  %v5538_v57 = vld [vmem:[#allocation8 + $0x38] ss:$12 sps:$4 sm:$0xff]  }
 0x3cd   :  { %v5541_v1 = vld [vmem:[#allocation8 + $0x4c] ss:$12 sps:$4 sm:$0xff]  }
 0x3ce   :  { %v1768_v34 = vadd.f32 %v1767_v23, %v1766_v22  ;;  %v5545_v22 = vld [vmem:[#allocation8 + $0x48] ss:$12 sps:$4 sm:$0xff]   ;;  %v5548_v23 = vld [vmem:[#allocation8 + $0x50] ss:$12 sps:$4 sm:$0xff]  }
 0x3cf   :  { %v4234_v27 = vpop.eup %4233 }
 0x3d0   :  { %v1873_v33 = vadd.f32 1.0, %v4234_v27  ;;  %v1774_v35 = vmul.f32 %v5499_v28, %v1768_v34  ;;  %v4236_v41 = vpop.eup %4235  ;;  %v5551_v34 = vld [vmem:[#allocation8 + $0x64] ss:$12 sps:$4 sm:$0xff]  }
 0x3d1   :  { %v1880_v51 = vadd.f32 1.0, %v4236_v41 }
 0x3d2   :  { %4237 = vrcp.f32 %v1873_v33  ;;  %v5506_v43 = vadd.f32 %v1781_v38, %v1774_v35  ;;  %v5555_v33 = vld [vmem:[#allocation8 + $0x60] ss:$12 sps:$4 sm:$0xff]   ;;  %v5558_v35 = vld [vmem:[#allocation8 + $0x68] ss:$12 sps:$4 sm:$0xff]  }
 0x3d3   :  { %4239 = vrcp.f32 %v1880_v51  ;;  %v5561_v38 = vld [vmem:[#allocation8 + $0x7c] ss:$12 sps:$4 sm:$0xff]   ;;  %v5565_v51 = vld [vmem:[#allocation8 + $0x78] ss:$12 sps:$4 sm:$0xff]  }
 0x3d4   :  { %v1915_v47 = vpack.c.bf16 %v5506_v43, %v5506_v43 }
 0x3d6   :  { %1949 = vmatmul.mubr.bf16.vlgmr.msra.gmra.mrb[56].mxu0 %v1915_v47  ;;  %3798 = vmatmul.mubr.bf16.vlgmr.msra.gmra.mrb[40].mxu1 %v1915_v47 }
 0x3d7   :  { %2039 = vmatpush1.bf16.msra.mxu0 %v5510_v25  ;;  %3802 = vmatpush3.bf16.msra.mxu1 %v5513_v19 }
 0x3d8   :  { %2040 = vmatprep.subr.bf16.mxu0 %v5516_v12  ;;  %3803 = vmatprep.subr.bf16.mxu1 %v6116_v46 }
 0x3d9   :  { %2070 = vmatprep.mubr.bf16.mxu0 %v6117_v20  ;;  %3817 = vmatprep.mubr.msk.bf16.mxu1 %vm4567_vm4, %v6116_v46 }
 0x3db   :  { %2041 = vmatpush1.bf16.msra.mxu0 %v5524_v31  ;;  %3804 = vmatpush3.bf16.msra.mxu1 %v5527_v4 }
 0x3dc   :  { %v4238_v53 = vpop.eup %4237  ;;  %2042 = vmatprep.subr.bf16.mxu0 %v5530_v54  ;;  %3805 = vmatprep.subr.bf16.mxu1 %v6116_v46 }
 0x3dd   :  { %v1884_v3 = vmul.f32 %v4238_v53, %v1883_v8  ;;  %v4240_v27 = vpop.eup %4239  ;;  %v5568_v8 = vld [vmem:[#allocation8 + $0x80] ss:$12 sps:$4 sm:$0xff]  }
 0x3de   :  { %v1887_v47 = vsub.f32 1.0, %v4240_v27 }
 0x3df   :  { %v1885_v56 = vadd.f32 %v1884_v3, %v6161_v24  ;;  %2043 = vmatpush1.bf16.msra.mxu0 %v5535_v44  ;;  %3806 = vmatpush3.bf16.msra.mxu1 %v5538_v57  ;;  %v1889_v3 = vmul.f32 %v4240_v27, %v5401_v45  ;;  %v5572_v24 = vld [vmem:[#allocation8 + $0x94] ss:$12 sps:$4 sm:$0xff]   ;;  %v5586_v27 = vld [vmem:[#allocation8 + $0xac] ss:$12 sps:$4 sm:$0xff]  }
 0x3e0   :  { %2044 = vmatprep.subr.bf16.mxu0 %v5541_v1  ;;  %3807 = vmatprep.subr.bf16.mxu1 %v6116_v46 }
 0x3e1   :  { %4241 = vtanh.f32 %v1885_v56 }
 0x3e3   :  { %2045 = vmatpush1.bf16.msra.mxu0 %v5545_v22  ;;  %3808 = vmatpush3.bf16.msra.mxu1 %v5548_v23 }
 0x3e4   :  { %2046 = vmatprep.subr.bf16.mxu0 %v5551_v34  ;;  %3809 = vmatprep.subr.bf16.mxu1 %v6116_v46 }
 0x3e7   :  { %2047 = vmatpush1.bf16.msra.mxu0 %v5555_v33  ;;  %3810 = vmatpush3.bf16.msra.mxu1 %v5558_v35 }
 0x3e8   :  { %2048 = vmatprep.subr.bf16.mxu0 %v5561_v38  ;;  %3811 = vmatprep.subr.bf16.mxu1 %v6116_v46 }
 0x3eb   :  { %v4242_v41 = vpop.eup %4241  ;;  %2049 = vmatpush1.bf16.msra.mxu0 %v5565_v51  ;;  %3812 = vmatpush3.bf16.msra.mxu1 %v5568_v8 }
 0x3ec   :  { %v1888_v53 = vmul.f32 %v4242_v41, %v1887_v47  ;;  %2050 = vmatprep.subr.bf16.mxu0 %v5572_v24  ;;  %3813 = vmatprep.subr.bf16.mxu1 %v6116_v46  ;;  %v1903_v41 = vmul.f32 %v5578_v17, %v5401_v45 }
 0x3ee   :  { %v1890_v56 = vadd.f32 %v1889_v3, %v1888_v53  ;;  %v5595_v3 = vld [vmem:[#allocation8 + $0xa8] ss:$12 sps:$4 sm:$0xff]  }
 0x3ef   :  { %2051 = vmatpush1.bf16.msra.mxu0 %v5580_v30  ;;  %3814 = vmatpush3.bf16.msra.mxu1 %v5583_v13 }
 0x3f0   :  { %2052 = vmatprep.subr.bf16.mxu0 %v5586_v27  ;;  %3815 = vmatprep.subr.bf16.mxu1 %v6116_v46  ;;  %v1896_v47 = vmul.f32 %v5576_v16, %v1890_v56 }
 0x3f2   :  { %v5593_v53 = vadd.f32 %v1903_v41, %v1896_v47  ;;  %v6165_v47 = vld [vmem:[#allocation31_spill] sm:$0xff] }
 0x3f3   :  { %2053 = vmatpush1.bf16.msra.mxu0 %v5595_v3  ;;  %3816 = vmatpush3.bf16.msra.mxu1 %v5598_v29 }
 0x3f4   :  { %v2037_v61 = vpack.c.bf16 %v5593_v53, %v5593_v53  ;;  %2160 = vmatprep.subr.bf16.mxu0 %v5407_v48  ;;  %3821 = vmatprep.subr.bf16.mxu1 %v6116_v46 }
 0x3f6   :  { %2071 = vmatmul.mubr.bf16.vlgmr.msra.gmra.mrb[60].mxu0 %v2037_v61  ;;  %3818 = vmatmul.mubr.bf16.vlgmr.msra.gmra.mrb[44].mxu1 %v2037_v61  ;;  %v5637_v61 = vld [vmem:[#allocation4 + $0xb0] ss:$12 sps:$4 sm:$0xff]  }
 0x3f7   :  { %2161 = vmatpush1.bf16.msra.mxu0 %v5411_v49  ;;  %3822 = vmatpush3.bf16.msra.mxu1 %v5414_v50  ;;  %6164 = vst [vmem:[#allocation32_spill] sm:$0xff] %v5637_v61 }
 0x3f8   :  { %2162 = vmatprep.subr.bf16.mxu0 %v5417_v52  ;;  %3823 = vmatprep.subr.bf16.mxu1 %v6116_v46 }
 0x3f9   :  { %2192 = vmatprep.mubr.bf16.mxu0 %v6117_v20  ;;  %3837 = vmatprep.mubr.msk.bf16.mxu1 %vm4567_vm4, %v6116_v46 }
 0x3fb   :  { %2163 = vmatpush1.bf16.msra.mxu0 %v5424_v55  ;;  %3824 = vmatpush3.bf16.msra.mxu1 %v5427_v2 }
 0x3fc   :  { %2164 = vmatprep.subr.bf16.mxu0 %v5430_v5  ;;  %3825 = vmatprep.subr.bf16.mxu1 %v6116_v46 }
 0x3ff   :  { %2165 = vmatpush1.bf16.msra.mxu0 %v5434_v9  ;;  %3826 = vmatpush3.bf16.msra.mxu1 %v5437_v21 }
 0x400   :  { %2166 = vmatprep.subr.bf16.mxu0 %v5440_v58  ;;  %3827 = vmatprep.subr.bf16.mxu1 %v6116_v46 }
 0x403   :  { %2167 = vmatpush1.bf16.msra.mxu0 %v5444_v59  ;;  %3828 = vmatpush3.bf16.msra.mxu1 %v5447_v60 }
 0x404   :  { %2168 = vmatprep.subr.bf16.mxu0 %v5450_v62  ;;  %3829 = vmatprep.subr.bf16.mxu1 %v6116_v46 }
 0x407   :  { %2169 = vmatpush1.bf16.msra.mxu0 %v5454_v63  ;;  %3830 = vmatpush3.bf16.msra.mxu1 %v5457_v7 }
 0x408   :  { %2170 = vmatprep.subr.bf16.mxu0 %v5460_v10  ;;  %3831 = vmatprep.subr.bf16.mxu1 %v6116_v46 }
 0x40b   :  { %2171 = vmatpush1.bf16.msra.mxu0 %v5464_v18  ;;  %3832 = vmatpush3.bf16.msra.mxu1 %v5467_v36 }
 0x40c   :  { %2172 = vmatprep.subr.bf16.mxu0 %v5470_v42  ;;  %3833 = vmatprep.subr.bf16.mxu1 %v6116_v46 }
 0x40f   :  { %2173 = vmatpush1.bf16.msra.mxu0 %v5474_v37  ;;  %3834 = vmatpush3.bf16.msra.mxu1 %v5477_v6 }
 0x410   :  { %2174 = vmatprep.subr.bf16.mxu0 %v5480_v15  ;;  %3835 = vmatprep.subr.bf16.mxu1 %v6116_v46 }
 0x413   :  { %2175 = vmatpush1.bf16.msra.mxu0 %v5484_v14  ;;  %3836 = vmatpush3.bf16.msra.mxu1 %v5637_v61 }
 0x414   :  { %2271 = vmatprep.subr.bf16.mxu0 %v5488_v11  ;;  %3841 = vmatprep.subr.bf16.mxu1 %v6116_v46 }
 0x4a9   :  { %v1950_v45 = vpop.f32.mrb[56].mxu0  ;;  %v1991_v56 = vpop.f32.mrb[40].mxu1 }
 0x4aa   :  { %v1997_v41 = vadd.f32 %v1950_v45, %v6165_v47  ;;  %v1952_v40 = vpop.f32.mrb[57].mxu0  ;;  %v3799_v39 = vpop.f32.mrb[41].mxu1  ;;  %v2011_v18 = vadd.f32 %v5237_v26, %v1991_v56 }
 0x4ab   :  { %v2004_v28 = vadd.f32 %v1952_v40, %v6166_v32  ;;  %v1954_v17 = vpop.f32.mrb[58].mxu0  ;;  %v1994_v16 = vpop.f32.mrb[42].mxu1  ;;  %v6167_v39 = vld [vmem:[#allocation34_spill] sm:$0xff] }
 0x4ac   :  { %v3390_v15 = vmul.f32 -1.442695, %v1997_v41  ;;  %v1955_v14 = vpop.f32.mrb[59].mxu0  ;;  %v3800_v6 = vpop.f32.mrb[43].mxu1 }
 0x4ad   :  { %v3391_v37 = vmul.f32 -1.442695, %v2004_v28  ;;  %v6168_v14 = vld [vmem:[#allocation60_spill] sm:$0xff] }
 0x4ae   :  { %4243 = vpow2.f32 %v3390_v15 }
 0x4af   :  { %4245 = vpow2.f32 %v3391_v37  ;;  %v6169_v37 = vld [vmem:[#allocation61_spill] sm:$0xff] }
 0x4b8   :  { %v4244_v61 = vpop.eup %4243 }
 0x4b9   :  { %v2001_v11 = vadd.f32 1.0, %v4244_v61  ;;  %v4246_v42 = vpop.eup %4245 }
 0x4ba   :  { %v2008_v36 = vadd.f32 1.0, %v4246_v42 }
 0x4bb   :  { %4247 = vrcp.f32 %v2001_v11 }
 0x4bc   :  { %4249 = vrcp.f32 %v2008_v36 }
 0x4c5   :  { %v4248_v45 = vpop.eup %4247 }
 0x4c6   :  { %v2012_v47 = vmul.f32 %v4248_v45, %v2011_v18  ;;  %v4250_v26 = vpop.eup %4249 }
 0x4c7   :  { %v2015_v36 = vsub.f32 1.0, %v4250_v26 }
 0x4c8   :  { %v2013_v40 = vadd.f32 %v2012_v47, %v6167_v39  ;;  %v2017_v47 = vmul.f32 %v4250_v26, %v5506_v43 }
 0x4c9   :  { %v2072_v17 = vpop.f32.mrb[60].mxu0  ;;  %v2113_v16 = vpop.f32.mrb[44].mxu1 }
 0x4ca   :  { %4251 = vtanh.f32 %v2013_v40  ;;  %v2119_v6 = vadd.f32 %v2072_v17, %v6168_v14  ;;  %v2074_v15 = vpop.f32.mrb[61].mxu0  ;;  %v3819_v28 = vpop.f32.mrb[45].mxu1 }
 0x4cb   :  { %v2126_v32 = vadd.f32 %v2074_v15, %v6169_v37  ;;  %v2076_v61 = vpop.f32.mrb[62].mxu0  ;;  %v2116_v11 = vpop.f32.mrb[46].mxu1 }
 0x4cc   :  { %v3392_v41 = vmul.f32 -1.442695, %v2119_v6  ;;  %v2077_v42 = vpop.f32.mrb[63].mxu0  ;;  %v3820_v10 = vpop.f32.mrb[47].mxu1 }
 0x4cd   :  { %v3393_v18 = vmul.f32 -1.442695, %v2126_v32  ;;  %v5649_v17 = vpop.permute.xlu0 %2021  ;;  %v5651_v14 = vpop.permute.xlu1 %2028  ;;  %v6170_v42 = vld [vmem:[#allocation65_spill] sm:$0xff] }
 0x4ce   :  { %4253 = vpow2.f32 %v3392_v41  ;;  %v2031_v10 = vmul.f32 %v5651_v14, %v5506_v43  ;;  %v2133_v43 = vadd.f32 %v5257_v0, %v2113_v16 }
 0x4cf   :  { %4255 = vpow2.f32 %v3393_v18 }
 0x4d4   :  { %v4252_v56 = vpop.eup %4251 }
 0x4d5   :  { %v2016_v45 = vmul.f32 %v4252_v56, %v2015_v36 }
 0x4d7   :  { %v2018_v39 = vadd.f32 %v2017_v47, %v2016_v45  ;;  %v5690_v47 = vpop.permute.xlu0 %2143 }
 0x4d8   :  { %v4254_v40 = vpop.eup %4253 }
 0x4d9   :  { %v2123_v15 = vadd.f32 1.0, %v4254_v40  ;;  %v2024_v6 = vmul.f32 %v5649_v17, %v2018_v39  ;;  %v4256_v32 = vpop.eup %4255  ;;  %v5692_v39 = vpop.permute.xlu1 %2150 }
 0x4da   :  { %v2130_v61 = vadd.f32 1.0, %v4256_v32  ;;  %v6173_v32 = vld [vmem:[#allocation22_spill] sm:$0xff] }
 0x4db   :  { %4257 = vrcp.f32 %v2123_v15  ;;  %v5656_v28 = vadd.f32 %v2031_v10, %v2024_v6  ;;  %v2153_v15 = vmul.f32 %v5692_v39, %v5593_v53 }
 0x4dc   :  { %4259 = vrcp.f32 %v2130_v61  ;;  %v6174_v61 = vld [vmem:[#allocation26_spill] sm:$0xff] }
 0x4dd   :  { %v2159_v37 = vpack.c.bf16 %v5656_v28, %v5656_v28 }
 0x4df   :  { %2193 = vmatmul.mubr.bf16.vlgmr.msra.gmra.mrb[64].mxu0 %v2159_v37  ;;  %3838 = vmatmul.mubr.bf16.vlgmr.msra.gmra.mrb[48].mxu1 %v2159_v37  ;;  %v6172_v37 = vld [vmem:[#allocation20_spill] sm:$0xff] }
 0x4e0   :  { %2272 = vmatpush1.bf16.msra.mxu0 %v5510_v25  ;;  %3842 = vmatpush3.bf16.msra.mxu1 %v5513_v19 }
 0x4e1   :  { %2273 = vmatprep.subr.bf16.mxu0 %v5516_v12  ;;  %3843 = vmatprep.subr.bf16.mxu1 %v6116_v46 }
 0x4e2   :  { %2303 = vmatprep.mubr.bf16.mxu0 %v6117_v20  ;;  %3857 = vmatprep.mubr.msk.bf16.mxu1 %vm4567_vm4, %v6116_v46 }
 0x4e4   :  { %2274 = vmatpush1.bf16.msra.mxu0 %v5524_v31  ;;  %3844 = vmatpush3.bf16.msra.mxu1 %v5527_v4 }
 0x4e5   :  { %v4258_v11 = vpop.eup %4257  ;;  %2275 = vmatprep.subr.bf16.mxu0 %v5530_v54  ;;  %3845 = vmatprep.subr.bf16.mxu1 %v6116_v46 }
 0x4e6   :  { %v2134_v41 = vmul.f32 %v4258_v11, %v2133_v43  ;;  %v4260_v0 = vpop.eup %4259  ;;  %v6175_v43 = vld [vmem:[#allocation23_spill] sm:$0xff] }
 0x4e7   :  { %v2137_v16 = vsub.f32 1.0, %v4260_v0  ;;  %v2139_v56 = vmul.f32 %v4260_v0, %v5593_v53  ;;  %v6171_v53 = vld [vmem:[#allocation25_spill] sm:$0xff]  ;;  %v6176_v11 = vld [vmem:[#allocation27_spill] sm:$0xff] }
 0x4e8   :  { %v2135_v26 = vadd.f32 %v2134_v41, %v6170_v42  ;;  %2276 = vmatpush1.bf16.msra.mxu0 %v5535_v44  ;;  %3846 = vmatpush3.bf16.msra.mxu1 %v5538_v57  ;;  %v6177_v41 = vld [vmem:[#allocation28_spill] sm:$0xff]  ;;  %v6178_v42 = vld [vmem:[#allocation35_spill] sm:$0xff] }
 0x4e9   :  { %2277 = vmatprep.subr.bf16.mxu0 %v5541_v1  ;;  %3847 = vmatprep.subr.bf16.mxu1 %v6116_v46  ;;  %v6180_v0 = vld [vmem:[#allocation67_spill] sm:$0xff] }
 0x4ea   :  { %4261 = vtanh.f32 %v2135_v26  ;;  %v6179_v26 = vld [vmem:[#allocation32_spill] sm:$0xff] }
 0x4ec   :  { %2278 = vmatpush1.bf16.msra.mxu0 %v5545_v22  ;;  %3848 = vmatpush3.bf16.msra.mxu1 %v5548_v23 }
 0x4ed   :  { %2279 = vmatprep.subr.bf16.mxu0 %v5551_v34  ;;  %3849 = vmatprep.subr.bf16.mxu1 %v6116_v46 }
 0x4f0   :  { %2280 = vmatpush1.bf16.msra.mxu0 %v5555_v33  ;;  %3850 = vmatpush3.bf16.msra.mxu1 %v5558_v35 }
 0x4f1   :  { %2281 = vmatprep.subr.bf16.mxu0 %v5561_v38  ;;  %3851 = vmatprep.subr.bf16.mxu1 %v6116_v46 }
 0x4f4   :  { %v4262_v18 = vpop.eup %4261  ;;  %2282 = vmatpush1.bf16.msra.mxu0 %v5565_v51  ;;  %3852 = vmatpush3.bf16.msra.mxu1 %v5568_v8 }
 0x4f5   :  { %v2138_v36 = vmul.f32 %v4262_v18, %v2137_v16  ;;  %2283 = vmatprep.subr.bf16.mxu0 %v5572_v24  ;;  %3853 = vmatprep.subr.bf16.mxu1 %v6116_v46 }
 0x4f7   :  { %v2140_v45 = vadd.f32 %v2139_v56, %v2138_v36  ;;  %v6181_v36 = vld [vmem:[#allocation36_spill] sm:$0xff] }
 0x4f8   :  { %2284 = vmatpush1.bf16.msra.mxu0 %v5580_v30  ;;  %3854 = vmatpush3.bf16.msra.mxu1 %v5583_v13 }
 0x4f9   :  { %2285 = vmatprep.subr.bf16.mxu0 %v5586_v27  ;;  %3855 = vmatprep.subr.bf16.mxu1 %v6116_v46  ;;  %v2146_v40 = vmul.f32 %v5690_v47, %v2140_v45 }
 0x4fb   :  { %v5701_v6 = vadd.f32 %v2153_v15, %v2146_v40  ;;  %v6182_v15 = vld [vmem:[#allocation37_spill] sm:$0xff] }
 0x4fc   :  { %2286 = vmatpush1.bf16.msra.mxu0 %v5595_v3  ;;  %3856 = vmatpush3.bf16.msra.mxu1 %v5598_v29 }
 0x4fd   :  { %v2270_v10 = vpack.c.bf16 %v5701_v6, %v5701_v6  ;;  %2382 = vmatprep.subr.bf16.mxu0 %v5407_v48  ;;  %3861 = vmatprep.subr.bf16.mxu1 %v6116_v46 }
 0x4ff   :  { %2304 = vmatmul.mubr.bf16.vlgmr.msra.gmra.mrb[68].mxu0 %v2270_v10  ;;  %3858 = vmatmul.mubr.bf16.vlgmr.msra.gmra.mrb[52].mxu1 %v2270_v10 }
 0x500   :  { %2383 = vmatpush1.bf16.msra.mxu0 %v5411_v49  ;;  %3862 = vmatpush3.bf16.msra.mxu1 %v5414_v50 }
 0x501   :  { %2384 = vmatprep.subr.bf16.mxu0 %v5417_v52  ;;  %3863 = vmatprep.subr.bf16.mxu1 %v6116_v46 }
 0x502   :  { %2414 = vmatprep.mubr.bf16.mxu0 %v6117_v20  ;;  %3877 = vmatprep.mubr.msk.bf16.mxu1 %vm4567_vm4, %v6116_v46 }
 0x504   :  { %2385 = vmatpush1.bf16.msra.mxu0 %v5424_v55  ;;  %3864 = vmatpush3.bf16.msra.mxu1 %v5427_v2 }
 0x505   :  { %2386 = vmatprep.subr.bf16.mxu0 %v5430_v5  ;;  %3865 = vmatprep.subr.bf16.mxu1 %v6116_v46 }
 0x508   :  { %2387 = vmatpush1.bf16.msra.mxu0 %v5434_v9  ;;  %3866 = vmatpush3.bf16.msra.mxu1 %v5437_v21 }
 0x509   :  { %2388 = vmatprep.subr.bf16.mxu0 %v5440_v58  ;;  %3867 = vmatprep.subr.bf16.mxu1 %v6116_v46 }
 0x50c   :  { %2389 = vmatpush1.bf16.msra.mxu0 %v5444_v59  ;;  %3868 = vmatpush3.bf16.msra.mxu1 %v5447_v60 }
 0x50d   :  { %2390 = vmatprep.subr.bf16.mxu0 %v5450_v62  ;;  %3869 = vmatprep.subr.bf16.mxu1 %v6116_v46 }
 0x510   :  { %2391 = vmatpush1.bf16.msra.mxu0 %v5454_v63  ;;  %3870 = vmatpush3.bf16.msra.mxu1 %v5457_v7 }
 0x511   :  { %2392 = vmatprep.subr.bf16.mxu0 %v6171_v53  ;;  %3871 = vmatprep.subr.bf16.mxu1 %v6116_v46 }
 0x514   :  { %2393 = vmatpush1.bf16.msra.mxu0 %v6172_v37  ;;  %3872 = vmatpush3.bf16.msra.mxu1 %v6173_v32 }
 0x515   :  { %2394 = vmatprep.subr.bf16.mxu0 %v6174_v61  ;;  %3873 = vmatprep.subr.bf16.mxu1 %v6116_v46 }
 0x518   :  { %2395 = vmatpush1.bf16.msra.mxu0 %v6175_v43  ;;  %3874 = vmatpush3.bf16.msra.mxu1 %v6176_v11 }
 0x519   :  { %2396 = vmatprep.subr.bf16.mxu0 %v6177_v41  ;;  %3875 = vmatprep.subr.bf16.mxu1 %v6116_v46 }
 0x51c   :  { %2397 = vmatpush1.bf16.msra.mxu0 %v6178_v42  ;;  %3876 = vmatpush3.bf16.msra.mxu1 %v6179_v26 }
 0x51d   :  { %2493 = vmatprep.subr.bf16.mxu0 %v6180_v0  ;;  %3881 = vmatprep.subr.bf16.mxu1 %v6116_v46 }
 0x5b2   :  { %v2194_v16 = vpop.f32.mrb[64].mxu0  ;;  %v2235_v18 = vpop.f32.mrb[48].mxu1 }
 0x5b3   :  { %v2241_v56 = vadd.f32 %v2194_v16, %v6181_v36  ;;  %v2196_v45 = vpop.f32.mrb[65].mxu0  ;;  %v3839_v40 = vpop.f32.mrb[49].mxu1  ;;  %v5749_v16 = vld [vmem:[%s5999_s5] ss:$0 sm:$0xff] }
 0x5b4   :  { %v2248_v10 = vadd.f32 %v2196_v45, %v6182_v15  ;;  %v2198_v11 = vpop.f32.mrb[66].mxu0  ;;  %v2238_v41 = vpop.f32.mrb[50].mxu1  ;;  %v2255_v36 = vadd.f32 %v5749_v16, %v2235_v18 }
 0x5b5   :  { %v3394_v43 = vmul.f32 -1.442695, %v2241_v56  ;;  %v2199_v61 = vpop.f32.mrb[67].mxu0  ;;  %v3840_v32 = vpop.f32.mrb[51].mxu1 }
 0x5b6   :  { %v3395_v42 = vmul.f32 -1.442695, %v2248_v10  ;;  %v6183_v61 = vld [vmem:[#allocation41_spill] sm:$0xff] }
 0x5b7   :  { %4263 = vpow2.f32 %v3394_v43 }
 0x5b8   :  { %4265 = vpow2.f32 %v3395_v42  ;;  %v6184_v42 = vld [vmem:[#allocation54_spill] sm:$0xff] }
 0x5c1   :  { %v4264_v26 = vpop.eup %4263 }
 0x5c2   :  { %v2245_v0 = vadd.f32 1.0, %v4264_v26  ;;  %v4266_v37 = vpop.eup %4265 }
 0x5c3   :  { %v2252_v53 = vadd.f32 1.0, %v4266_v37  ;;  %v6185_v37 = vld [vmem:[#allocation56_spill] sm:$0xff] }
 0x5c4   :  { %4267 = vrcp.f32 %v2245_v0 }
 0x5c5   :  { %4269 = vrcp.f32 %v2252_v53 }
 0x5ce   :  { %v4268_v11 = vpop.eup %4267 }
 0x5cf   :  { %v2256_v41 = vmul.f32 %v4268_v11, %v2255_v36  ;;  %v4270_v18 = vpop.eup %4269 }
 0x5d0   :  { %v2259_v53 = vsub.f32 1.0, %v4270_v18 }
 0x5d1   :  { %v2257_v32 = vadd.f32 %v2256_v41, %v6183_v61  ;;  %v2261_v61 = vmul.f32 %v4270_v18, %v5656_v28 }
 0x5d2   :  { %v2305_v43 = vpop.f32.mrb[68].mxu0  ;;  %v2346_v56 = vpop.f32.mrb[52].mxu1 }
 0x5d3   :  { %4271 = vtanh.f32 %v2257_v32  ;;  %v2352_v26 = vadd.f32 %v2305_v43, %v6184_v42  ;;  %v2307_v0 = vpop.f32.mrb[69].mxu0  ;;  %v3859_v45 = vpop.f32.mrb[53].mxu1 }
 0x5d4   :  { %v2359_v40 = vadd.f32 %v2307_v0, %v6185_v37  ;;  %v2309_v15 = vpop.f32.mrb[70].mxu0  ;;  %v2349_v10 = vpop.f32.mrb[54].mxu1  ;;  %v2264_v0 = vmul.f32 %v5692_v39, %v5656_v28  ;;  %v5773_v28 = vld [vmem:[%s6003_s9] ss:$0 sm:$0xff] }
 0x5d5   :  { %v3396_v7 = vmul.f32 -1.442695, %v2352_v26  ;;  %v2310_v63 = vpop.f32.mrb[71].mxu0  ;;  %v3860_v62 = vpop.f32.mrb[55].mxu1  ;;  %v2366_v39 = vadd.f32 %v5773_v28, %v2346_v56 }
 0x5d6   :  { %v3397_v36 = vmul.f32 -1.442695, %v2359_v40  ;;  %v6186_v40 = vld [vmem:[#allocation58_spill] sm:$0xff] }
 0x5d7   :  { %4273 = vpow2.f32 %v3396_v7 }
 0x5d8   :  { %4275 = vpow2.f32 %v3397_v36 }
 0x5dd   :  { %v4272_v11 = vpop.eup %4271 }
 0x5de   :  { %v2260_v41 = vmul.f32 %v4272_v11, %v2259_v53 }
 0x5e0   :  { %v2262_v32 = vadd.f32 %v2261_v61, %v2260_v41  ;;  %v2375_v61 = vmul.f32 %v5701_v6, %v5651_v14 }
 0x5e1   :  { %v4274_v43 = vpop.eup %4273 }
 0x5e2   :  { %v2356_v42 = vadd.f32 1.0, %v4274_v43  ;;  %v2263_v45 = vmul.f32 %v2262_v32, %v5690_v47  ;;  %v4276_v7 = vpop.eup %4275 }
 0x5e3   :  { %v2363_v47 = vadd.f32 1.0, %v4276_v7  ;;  %v6201_v7 = vld [vmem:[#allocation40_spill] sm:$0xff] }
 0x5e4   :  { %4277 = vrcp.f32 %v2356_v42  ;;  %v5759_v63 = vadd.f32 %v2264_v0, %v2263_v45  ;;  %v6200_v42 = vld [vmem:[#allocation38_spill] sm:$0xff] }
 0x5e5   :  { %4279 = vrcp.f32 %v2363_v47 }
 0x5e6   :  { %v2381_v62 = vpack.c.bf16 %v5759_v63, %v5759_v63 }
 0x5e8   :  { %2415 = vmatmul.mubr.bf16.vlgmr.msra.gmra.mrb[72].mxu0 %v2381_v62  ;;  %3878 = vmatmul.mubr.bf16.vlgmr.msra.gmra.mrb[56].mxu1 %v2381_v62 }
 0x5e9   :  { %2494 = vmatpush1.bf16.msra.mxu0 %v5510_v25  ;;  %3882 = vmatpush3.bf16.msra.mxu1 %v5513_v19 }
 0x5ea   :  { %2495 = vmatprep.subr.bf16.mxu0 %v5516_v12  ;;  %3883 = vmatprep.subr.bf16.mxu1 %v6116_v46 }
 0x5eb   :  { %2525 = vmatprep.mubr.bf16.mxu0 %v6117_v20  ;;  %3897 = vmatprep.mubr.msk.bf16.mxu1 %vm4567_vm4, %v6116_v46 }
 0x5ed   :  { %2496 = vmatpush1.bf16.msra.mxu0 %v5524_v31  ;;  %3884 = vmatpush3.bf16.msra.mxu1 %v5527_v4 }
 0x5ee   :  { %v4278_v26 = vpop.eup %4277  ;;  %2497 = vmatprep.subr.bf16.mxu0 %v5530_v54  ;;  %3885 = vmatprep.subr.bf16.mxu1 %v6116_v46 }
 0x5ef   :  { %v2367_v37 = vmul.f32 %v4278_v26, %v2366_v39  ;;  %v4280_v56 = vpop.eup %4279 }
 0x5f0   :  { %v2370_v10 = vsub.f32 1.0, %v4280_v56  ;;  %v2372_v53 = vmul.f32 %v4280_v56, %v5701_v6 }
 0x5f1   :  { %v2368_v15 = vadd.f32 %v2367_v37, %v6186_v40  ;;  %2498 = vmatpush1.bf16.msra.mxu0 %v5535_v44  ;;  %3886 = vmatpush3.bf16.msra.mxu1 %v5538_v57 }
 0x5f2   :  { %2499 = vmatprep.subr.bf16.mxu0 %v5541_v1  ;;  %3887 = vmatprep.subr.bf16.mxu1 %v6116_v46 }
 0x5f3   :  { %4281 = vtanh.f32 %v2368_v15 }
 0x5f5   :  { %2500 = vmatpush1.bf16.msra.mxu0 %v5545_v22  ;;  %3888 = vmatpush3.bf16.msra.mxu1 %v5548_v23 }
 0x5f6   :  { %2501 = vmatprep.subr.bf16.mxu0 %v5551_v34  ;;  %3889 = vmatprep.subr.bf16.mxu1 %v6116_v46 }
 0x5f9   :  { %2502 = vmatpush1.bf16.msra.mxu0 %v5555_v33  ;;  %3890 = vmatpush3.bf16.msra.mxu1 %v5558_v35 }
 0x5fa   :  { %2503 = vmatprep.subr.bf16.mxu0 %v5561_v38  ;;  %3891 = vmatprep.subr.bf16.mxu1 %v6116_v46 }
 0x5fd   :  { %v4282_v18 = vpop.eup %4281  ;;  %2504 = vmatpush1.bf16.msra.mxu0 %v5565_v51  ;;  %3892 = vmatpush3.bf16.msra.mxu1 %v5568_v8 }
 0x5fe   :  { %v2371_v36 = vmul.f32 %v4282_v18, %v2370_v10  ;;  %2505 = vmatprep.subr.bf16.mxu0 %v5572_v24  ;;  %3893 = vmatprep.subr.bf16.mxu1 %v6116_v46 }
 0x600   :  { %v2373_v11 = vadd.f32 %v2372_v53, %v2371_v36 }
 0x601   :  { %2506 = vmatpush1.bf16.msra.mxu0 %v5580_v30  ;;  %3894 = vmatpush3.bf16.msra.mxu1 %v5583_v13 }
 0x602   :  { %2507 = vmatprep.subr.bf16.mxu0 %v5586_v27  ;;  %3895 = vmatprep.subr.bf16.mxu1 %v6116_v46  ;;  %v2374_v41 = vmul.f32 %v2373_v11, %v5649_v17  ;;  %v6199_v17 = vld [vmem:[#allocation67_spill] sm:$0xff] }
 0x604   :  { %v5805_v32 = vadd.f32 %v2375_v61, %v2374_v41 }
 0x605   :  { %2508 = vmatpush1.bf16.msra.mxu0 %v5595_v3  ;;  %3896 = vmatpush3.bf16.msra.mxu1 %v5598_v29 }
 0x606   :  { %v2492_v43 = vpack.c.bf16 %v5805_v32, %v5805_v32  ;;  %2604 = vmatprep.subr.bf16.mxu0 %v5407_v48  ;;  %3901 = vmatprep.subr.bf16.mxu1 %v6116_v46  ;;  %v6187_v48 = vld [vmem:[#allocation24_spill] sm:$0xff] }
 0x608   :  { %2526 = vmatmul.mubr.bf16.vlgmr.msra.gmra.mrb[76].mxu0 %v2492_v43  ;;  %3898 = vmatmul.mubr.bf16.vlgmr.msra.gmra.mrb[60].mxu1 %v2492_v43  ;;  %v6202_v43 = vld [vmem:[#allocation43_spill] sm:$0xff] }
 0x609   :  { %2605 = vmatpush1.bf16.msra.mxu0 %v5411_v49  ;;  %3902 = vmatpush3.bf16.msra.mxu1 %v5414_v50  ;;  %v6188_v49 = vld [vmem:[#allocation18_spill] sm:$0xff]  ;;  %v6189_v50 = vld [vmem:[#allocation19_spill] sm:$0xff] }
 0x60a   :  { %2606 = vmatprep.subr.bf16.mxu0 %v5417_v52  ;;  %3903 = vmatprep.subr.bf16.mxu1 %v6116_v46  ;;  %v6190_v52 = vld [vmem:[#allocation25_spill] sm:$0xff] }
 0x60b   :  { %2636 = vmatprep.mubr.bf16.mxu0 %v6117_v20  ;;  %3917 = vmatprep.mubr.msk.bf16.mxu1 %vm4567_vm4, %v6116_v46 }
 0x60d   :  { %2607 = vmatpush1.bf16.msra.mxu0 %v5424_v55  ;;  %3904 = vmatpush3.bf16.msra.mxu1 %v5427_v2  ;;  %v6191_v55 = vld [vmem:[#allocation20_spill] sm:$0xff]  ;;  %v6192_v2 = vld [vmem:[#allocation22_spill] sm:$0xff] }
 0x60e   :  { %2608 = vmatprep.subr.bf16.mxu0 %v5430_v5  ;;  %3905 = vmatprep.subr.bf16.mxu1 %v6116_v46  ;;  %v6193_v5 = vld [vmem:[#allocation26_spill] sm:$0xff] }
 0x611   :  { %2609 = vmatpush1.bf16.msra.mxu0 %v5434_v9  ;;  %3906 = vmatpush3.bf16.msra.mxu1 %v5437_v21  ;;  %v6194_v9 = vld [vmem:[#allocation23_spill] sm:$0xff] }
 0x612   :  { %2610 = vmatprep.subr.bf16.mxu0 %v5440_v58  ;;  %3907 = vmatprep.subr.bf16.mxu1 %v6116_v46  ;;  %v6195_v21 = vld [vmem:[#allocation27_spill] sm:$0xff]  ;;  %v6196_v58 = vld [vmem:[#allocation28_spill] sm:$0xff] }
 0x615   :  { %2611 = vmatpush1.bf16.msra.mxu0 %v5444_v59  ;;  %3908 = vmatpush3.bf16.msra.mxu1 %v5447_v60  ;;  %v6197_v59 = vld [vmem:[#allocation35_spill] sm:$0xff]  ;;  %v6198_v60 = vld [vmem:[#allocation32_spill] sm:$0xff] }
 0x616   :  { %2612 = vmatprep.subr.bf16.mxu0 %v6187_v48  ;;  %3909 = vmatprep.subr.bf16.mxu1 %v6116_v46 }
 0x619   :  { %2613 = vmatpush1.bf16.msra.mxu0 %v6188_v49  ;;  %3910 = vmatpush3.bf16.msra.mxu1 %v6189_v50 }
 0x61a   :  { %2614 = vmatprep.subr.bf16.mxu0 %v6190_v52  ;;  %3911 = vmatprep.subr.bf16.mxu1 %v6116_v46  ;;  %v6203_v52 = vld [vmem:[#allocation52_spill] sm:$0xff] }
 0x61d   :  { %2615 = vmatpush1.bf16.msra.mxu0 %v6191_v55  ;;  %3912 = vmatpush3.bf16.msra.mxu1 %v6192_v2 }
 0x61e   :  { %2616 = vmatprep.subr.bf16.mxu0 %v6193_v5  ;;  %3913 = vmatprep.subr.bf16.mxu1 %v6116_v46 }
 0x621   :  { %2617 = vmatpush1.bf16.msra.mxu0 %v6194_v9  ;;  %3914 = vmatpush3.bf16.msra.mxu1 %v6195_v21  ;;  %v6204_v9 = vld [vmem:[#allocation53_spill] sm:$0xff] }
 0x622   :  { %2618 = vmatprep.subr.bf16.mxu0 %v6196_v58  ;;  %3915 = vmatprep.subr.bf16.mxu1 %v6116_v46 }
 0x625   :  { %2619 = vmatpush1.bf16.msra.mxu0 %v6197_v59  ;;  %3916 = vmatpush3.bf16.msra.mxu1 %v6198_v60 }
 0x626   :  { %2715 = vmatprep.subr.bf16.mxu0 %v6199_v17  ;;  %3921 = vmatprep.subr.bf16.mxu1 %v6116_v46 }
 0x6bb   :  { %v2416_v14 = vpop.f32.mrb[72].mxu0  ;;  %v2457_v6 = vpop.f32.mrb[56].mxu1 }
 0x6bc   :  { %v2463_v45 = vadd.f32 %v2416_v14, %v6200_v42  ;;  %v2418_v0 = vpop.f32.mrb[73].mxu0  ;;  %v3879_v62 = vpop.f32.mrb[57].mxu1  ;;  %v2477_v11 = vadd.f32 %v5749_v16, %v2457_v6 }
 0x6bd   :  { %v2470_v47 = vadd.f32 %v2418_v0, %v6201_v7  ;;  %v2420_v39 = vpop.f32.mrb[74].mxu0  ;;  %v2460_v26 = vpop.f32.mrb[58].mxu1 }
 0x6be   :  { %v3398_v37 = vmul.f32 -1.442695, %v2463_v45  ;;  %v2421_v40 = vpop.f32.mrb[75].mxu0  ;;  %v3880_v15 = vpop.f32.mrb[59].mxu1 }
 0x6bf   :  { %v3399_v56 = vmul.f32 -1.442695, %v2470_v47  ;;  %v6205_v40 = vld [vmem:[#allocation29_spill] sm:$0xff] }
 0x6c0   :  { %4283 = vpow2.f32 %v3398_v37 }
 0x6c1   :  { %4285 = vpow2.f32 %v3399_v56  ;;  %v6206_v56 = vld [vmem:[#allocation30_spill] sm:$0xff] }
 0x6ca   :  { %v4284_v10 = vpop.eup %4283 }
 0x6cb   :  { %v2467_v18 = vadd.f32 1.0, %v4284_v10  ;;  %v4286_v36 = vpop.eup %4285  ;;  %v2486_v10 = vmul.f32 %v5759_v63, %v6206_v56 }
 0x6cc   :  { %v2474_v53 = vadd.f32 1.0, %v4286_v36 }
 0x6cd   :  { %4287 = vrcp.f32 %v2467_v18 }
 0x6ce   :  { %4289 = vrcp.f32 %v2474_v53 }
 0x6d7   :  { %v4288_v41 = vpop.eup %4287 }
 0x6d8   :  { %v2478_v61 = vmul.f32 %v4288_v41, %v2477_v11  ;;  %v4290_v6 = vpop.eup %4289 }
 0x6d9   :  { %v2481_v0 = vsub.f32 1.0, %v4290_v6  ;;  %v2483_v47 = vmul.f32 %v4290_v6, %v5759_v63 }
 0x6da   :  { %v2479_v48 = vadd.f32 %v2478_v61, %v6202_v43  ;;  %v4402_v61 = vld [vmem:[#allocation4 + $0x4c] ss:$12 sps:$4 sm:$0xff]   ;;  %v4403_v43 = vld [vmem:[#allocation4 + $0x48] ss:$12 sps:$4 sm:$0xff]  }
 0x6db   :  { %v2527_v49 = vpop.f32.mrb[76].mxu0  ;;  %v2568_v50 = vpop.f32.mrb[60].mxu1 }
 0x6dc   :  { %4291 = vtanh.f32 %v2479_v48  ;;  %v2574_v55 = vadd.f32 %v2527_v49, %v6203_v52  ;;  %v2529_v2 = vpop.f32.mrb[77].mxu0  ;;  %v3899_v5 = vpop.f32.mrb[61].mxu1  ;;  %v2588_v63 = vadd.f32 %v5773_v28, %v2568_v50  ;;  %v4404_v48 = vld [vmem:[#allocation4 + $0x50] ss:$12 sps:$4 sm:$0xff]   ;;  %v4406_v50 = vld [vmem:[#allocation4 + $0x60] ss:$12 sps:$4 sm:$0xff]  }
 0x6dd   :  { %v2581_v21 = vadd.f32 %v2529_v2, %v6204_v9  ;;  %v2531_v58 = vpop.f32.mrb[78].mxu0  ;;  %v2571_v59 = vpop.f32.mrb[62].mxu1  ;;  %v4405_v49 = vld [vmem:[#allocation4 + $0x64] ss:$12 sps:$4 sm:$0xff]   ;;  %v4407_v52 = vld [vmem:[#allocation4 + $0x68] ss:$12 sps:$4 sm:$0xff]  }
 0x6de   :  { %v3400_v17 = vmul.f32 -1.442695, %v2574_v55  ;;  %v2532_v14 = vpop.f32.mrb[79].mxu0  ;;  %v3900_v42 = vpop.f32.mrb[63].mxu1  ;;  %v4408_v55 = vld [vmem:[#allocation4 + $0x7c] ss:$12 sps:$4 sm:$0xff]  }
 0x6df   :  { %v3401_v45 = vmul.f32 -1.442695, %v2581_v21  ;;  %v4409_v2 = vld [vmem:[#allocation4 + $0x78] ss:$12 sps:$4 sm:$0xff]   ;;  %v4410_v5 = vld [vmem:[#allocation4 + $0x80] ss:$12 sps:$4 sm:$0xff]  }
 0x6e0   :  { %4293 = vpow2.f32 %v3400_v17  ;;  %v4411_v9 = vld [vmem:[#allocation4 + $0x94] ss:$12 sps:$4 sm:$0xff]   ;;  %v4412_v21 = vld [vmem:[#allocation4 + $0x90] ss:$12 sps:$4 sm:$0xff]   ;;  %v4413_v58 = vld [vmem:[#allocation4 + $0x98] ss:$12 sps:$4 sm:$0xff]  }
 0x6e1   :  { %4295 = vpow2.f32 %v3401_v45  ;;  %v4414_v59 = vld [vmem:[#allocation4 + $0xac] ss:$12 sps:$4 sm:$0xff]   ;;  %v4415_v17 = vld [vmem:[#allocation4 + $0xa8] ss:$12 sps:$4 sm:$0xff]   ;;  %v4416_v14 = vld [vmem:[#allocation8 + $0x4] ss:$12 sps:$4 sm:$0xff]  }
 0x6e2   :  { %v6210_v45 = vld [vmem:[#allocation44_spill] sm:$0xff] }
 0x6e6   :  { %v4292_v62 = vpop.eup %4291 }
 0x6e7   :  { %v2482_v7 = vmul.f32 %v4292_v62, %v2481_v0 }
 0x6e9   :  { %v2484_v39 = vadd.f32 %v2483_v47, %v2482_v7  ;;  %v6211_v47 = vld [vmem:[#allocation45_spill] sm:$0xff] }
 0x6ea   :  { %v4294_v26 = vpop.eup %4293 }
 0x6eb   :  { %v2578_v37 = vadd.f32 1.0, %v4294_v26  ;;  %v2485_v15 = vmul.f32 %v2484_v39, %v6205_v40  ;;  %v4296_v53 = vpop.eup %4295 }
 0x6ec   :  { %v2585_v11 = vadd.f32 1.0, %v4296_v53 }
 0x6ed   :  { %4297 = vrcp.f32 %v2578_v37  ;;  %v5858_v18 = vadd.f32 %v2486_v10, %v2485_v15 }
 0x6ee   :  { %4299 = vrcp.f32 %v2585_v11 }
 0x6ef   :  { %v2603_v36 = vpack.c.bf16 %v5858_v18, %v5858_v18 }
 0x6f1   :  { %2637 = vmatmul.mubr.bf16.vlgmr.msra.gmra.mrb[80].mxu0 %v2603_v36  ;;  %3918 = vmatmul.mubr.bf16.vlgmr.msra.gmra.mrb[64].mxu1 %v2603_v36 }
 0x6f2   :  { %2716 = vmatpush1.bf16.msra.mxu0 %v5510_v25  ;;  %3922 = vmatpush3.bf16.msra.mxu1 %v5513_v19  ;;  %v6207_v19 = vld [vmem:[#allocation55_spill] sm:$0xff] }
 0x6f3   :  { %2717 = vmatprep.subr.bf16.mxu0 %v5516_v12  ;;  %3923 = vmatprep.subr.bf16.mxu1 %v6116_v46 }
 0x6f4   :  { %2747 = vmatprep.mubr.bf16.mxu0 %v6117_v20  ;;  %3937 = vmatprep.mubr.msk.bf16.mxu1 %vm4567_vm4, %v6116_v46 }
 0x6f6   :  { %2718 = vmatpush1.bf16.msra.mxu0 %v5524_v31  ;;  %3924 = vmatpush3.bf16.msra.mxu1 %v5527_v4 }
 0x6f7   :  { %v4298_v41 = vpop.eup %4297  ;;  %2719 = vmatprep.subr.bf16.mxu0 %v5530_v54  ;;  %3925 = vmatprep.subr.bf16.mxu1 %v6116_v46 }
 0x6f8   :  { %v2589_v25 = vmul.f32 %v4298_v41, %v2588_v63  ;;  %v4300_v31 = vpop.eup %4299 }
 0x6f9   :  { %v2592_v4 = vsub.f32 1.0, %v4300_v31 }
 0x6fa   :  { %v2590_v12 = vadd.f32 %v2589_v25, %v6207_v19  ;;  %2720 = vmatpush1.bf16.msra.mxu0 %v5535_v44  ;;  %3926 = vmatpush3.bf16.msra.mxu1 %v5538_v57  ;;  %v2594_v57 = vmul.f32 %v4300_v31, %v5805_v32  ;;  %v6212_v19 = vld [vmem:[#allocation39_spill] sm:$0xff] }
 0x6fb   :  { %2721 = vmatprep.subr.bf16.mxu0 %v5541_v1  ;;  %3927 = vmatprep.subr.bf16.mxu1 %v6116_v46 }
 0x6fc   :  { %4301 = vtanh.f32 %v2590_v12 }
 0x6fe   :  { %2722 = vmatpush1.bf16.msra.mxu0 %v5545_v22  ;;  %3928 = vmatpush3.bf16.msra.mxu1 %v5548_v23  ;;  %v6208_v22 = vld [vmem:[#allocation68_spill] sm:$0xff] }
 0x6ff   :  { %2723 = vmatprep.subr.bf16.mxu0 %v5551_v34  ;;  %3929 = vmatprep.subr.bf16.mxu1 %v6116_v46  ;;  %v6209_v34 = vld [vmem:[#allocation63_spill] sm:$0xff] }
 0x702   :  { %2724 = vmatpush1.bf16.msra.mxu0 %v5555_v33  ;;  %3930 = vmatpush3.bf16.msra.mxu1 %v5558_v35  ;;  %v2597_v33 = vmul.f32 %v5805_v32, %v6209_v34  ;;  %v4401_v32 = vld [vmem:[#allocation4 + $0x38] ss:$12 sps:$4 sm:$0xff]  }
 0x703   :  { %2725 = vmatprep.subr.bf16.mxu0 %v5561_v38  ;;  %3931 = vmatprep.subr.bf16.mxu1 %v6116_v46  ;;  %v4393_v38 = vld [vmem:[#allocation4 + $0x4] ss:$12 sps:$4 sm:$0xff]  }
 0x706   :  { %v4302_v54 = vpop.eup %4301  ;;  %2726 = vmatpush1.bf16.msra.mxu0 %v5565_v51  ;;  %3932 = vmatpush3.bf16.msra.mxu1 %v5568_v8  ;;  %v4395_v51 = vld [vmem:[#allocation4 + $0x8] ss:$12 sps:$4 sm:$0xff]  }
 0x707   :  { %v2593_v44 = vmul.f32 %v4302_v54, %v2592_v4  ;;  %2727 = vmatprep.subr.bf16.mxu0 %v5572_v24  ;;  %3933 = vmatprep.subr.bf16.mxu1 %v6116_v46  ;;  %v4396_v8 = vld [vmem:[#allocation4 + $0x1c] ss:$12 sps:$4 sm:$0xff]   ;;  %v4398_v24 = vld [vmem:[#allocation4 + $0x20] ss:$12 sps:$4 sm:$0xff]  }
 0x708   :  { %v6213_v54 = vld [vmem:[#allocation50_spill] sm:$0xff] }
 0x709   :  { %v2595_v1 = vadd.f32 %v2594_v57, %v2593_v44 }
 0x70a   :  { %2728 = vmatpush1.bf16.msra.mxu0 %v5580_v30  ;;  %3934 = vmatpush3.bf16.msra.mxu1 %v5583_v13  ;;  %v4394_v13 = vld [vmem:[#allocation4] ss:$12 sps:$4 sm:$0xff]  }
 0x70b   :  { %2729 = vmatprep.subr.bf16.mxu0 %v5586_v27  ;;  %3935 = vmatprep.subr.bf16.mxu1 %v6116_v46  ;;  %v2596_v23 = vmul.f32 %v2595_v1, %v6208_v22  ;;  %v4399_v27 = vld [vmem:[#allocation4 + $0x34] ss:$12 sps:$4 sm:$0xff]  }
 0x70c   :  { %v6214_v22 = vld [vmem:[#allocation51_spill] sm:$0xff] }
 0x70d   :  { %v5899_v35 = vadd.f32 %v2597_v33, %v2596_v23 }
 0x70e   :  { %2730 = vmatpush1.bf16.msra.mxu0 %v5595_v3  ;;  %3936 = vmatpush3.bf16.msra.mxu1 %v5598_v29  ;;  %v4397_v29 = vld [vmem:[#allocation4 + $0x18] ss:$12 sps:$4 sm:$0xff]   ;;  %v4400_v3 = vld [vmem:[#allocation4 + $0x30] ss:$12 sps:$4 sm:$0xff]  }
 0x70f   :  { %v2714_v30 = vpack.c.bf16 %v5899_v35, %v5899_v35  ;;  %2826 = vmatprep.subr.bf16.mxu0 %v4393_v38  ;;  %3941 = vmatprep.subr.bf16.mxu1 %v6116_v46 }
 0x711   :  { %2748 = vmatmul.mubr.bf16.vlgmr.msra.gmra.mrb[84].mxu0 %v2714_v30  ;;  %3938 = vmatmul.mubr.bf16.vlgmr.msra.gmra.mrb[68].mxu1 %v2714_v30 }
 0x712   :  { %2827 = vmatpush1.bf16.msra.mxu0 %v4394_v13  ;;  %3942 = vmatpush3.bf16.msra.mxu1 %v4395_v51 }
 0x713   :  { %2828 = vmatprep.subr.bf16.mxu0 %v4396_v8  ;;  %3943 = vmatprep.subr.bf16.mxu1 %v6116_v46 }
 0x714   :  { %2858 = vmatprep.mubr.bf16.mxu0 %v6117_v20  ;;  %3957 = vmatprep.mubr.msk.bf16.mxu1 %vm4567_vm4, %v6116_v46 }
 0x716   :  { %2829 = vmatpush1.bf16.msra.mxu0 %v4397_v29  ;;  %3944 = vmatpush3.bf16.msra.mxu1 %v4398_v24 }
 0x717   :  { %2830 = vmatprep.subr.bf16.mxu0 %v4399_v27  ;;  %3945 = vmatprep.subr.bf16.mxu1 %v6116_v46 }
 0x71a   :  { %2831 = vmatpush1.bf16.msra.mxu0 %v4400_v3  ;;  %3946 = vmatpush3.bf16.msra.mxu1 %v4401_v32 }
 0x71b   :  { %2832 = vmatprep.subr.bf16.mxu0 %v4402_v61  ;;  %3947 = vmatprep.subr.bf16.mxu1 %v6116_v46 }
 0x71e   :  { %2833 = vmatpush1.bf16.msra.mxu0 %v4403_v43  ;;  %3948 = vmatpush3.bf16.msra.mxu1 %v4404_v48  ;;  %v6215_v48 = vld [vmem:[#allocation16_spill] sm:$0xff] }
 0x71f   :  { %2834 = vmatprep.subr.bf16.mxu0 %v4405_v49  ;;  %3949 = vmatprep.subr.bf16.mxu1 %v6116_v46 }
 0x722   :  { %2835 = vmatpush1.bf16.msra.mxu0 %v4406_v50  ;;  %3950 = vmatpush3.bf16.msra.mxu1 %v4407_v52  ;;  %v6216_v50 = vld [vmem:[#allocation17_spill] sm:$0xff] }
 0x723   :  { %2836 = vmatprep.subr.bf16.mxu0 %v4408_v55  ;;  %3951 = vmatprep.subr.bf16.mxu1 %v6116_v46  ;;  %v2708_v52 = vmul.f32 %v5858_v18, %v6216_v50  ;;  %v4182_v50 = vld [vmem:[#allocation11 + $0x38] sm:$0xff]  }
 0x726   :  { %2837 = vmatpush1.bf16.msra.mxu0 %v4409_v2  ;;  %3952 = vmatpush3.bf16.msra.mxu1 %v4410_v5 }
 0x727   :  { %2838 = vmatprep.subr.bf16.mxu0 %v4411_v9  ;;  %3953 = vmatprep.subr.bf16.mxu1 %v6116_v46  ;;  %v4417_v9 = vld [vmem:[#allocation8] ss:$12 sps:$4 sm:$0xff]  }
 0x72a   :  { %2839 = vmatpush1.bf16.msra.mxu0 %v4412_v21  ;;  %3954 = vmatpush3.bf16.msra.mxu1 %v4413_v58  ;;  %v4418_v21 = vld [vmem:[#allocation8 + $0x8] ss:$12 sps:$4 sm:$0xff]  }
 0x72b   :  { %2840 = vmatprep.subr.bf16.mxu0 %v4414_v59  ;;  %3955 = vmatprep.subr.bf16.mxu1 %v6116_v46  ;;  %v4419_v58 = vld [vmem:[#allocation8 + $0x1c] ss:$12 sps:$4 sm:$0xff]  }
 0x72e   :  { %2841 = vmatpush1.bf16.msra.mxu0 %v4415_v17  ;;  %3956 = vmatpush3.bf16.msra.mxu1 %v6198_v60  ;;  %v4420_v17 = vld [vmem:[#allocation8 + $0x18] ss:$12 sps:$4 sm:$0xff]  }
 0x72f   :  { %2936 = vmatprep.subr.bf16.mxu0 %v4416_v14  ;;  %3961 = vmatprep.subr.bf16.mxu1 %v6116_v46  ;;  %v4421_v14 = vld [vmem:[#allocation8 + $0x20] ss:$12 sps:$4 sm:$0xff]  }
 0x7c4   :  { %v2638_v42 = vpop.f32.mrb[80].mxu0  ;;  %v2679_v6 = vpop.f32.mrb[64].mxu1 }
 0x7c5   :  { %v2685_v0 = vadd.f32 %v2638_v42, %v6210_v45  ;;  %v2640_v62 = vpop.f32.mrb[81].mxu0  ;;  %v3919_v7 = vpop.f32.mrb[65].mxu1  ;;  %v2699_v63 = vadd.f32 %v5749_v16, %v2679_v6  ;;  %v4422_v6 = vld [vmem:[#allocation8 + $0x34] ss:$12 sps:$4 sm:$0xff]  }
 0x7c6   :  { %v2692_v39 = vadd.f32 %v2640_v62, %v6211_v47  ;;  %v2642_v26 = vpop.f32.mrb[82].mxu0  ;;  %v2682_v37 = vpop.f32.mrb[66].mxu1  ;;  %v4423_v7 = vld [vmem:[#allocation8 + $0x30] ss:$12 sps:$4 sm:$0xff]   ;;  %v4425_v47 = vld [vmem:[#allocation8 + $0x4c] ss:$12 sps:$4 sm:$0xff]  }
 0x7c7   :  { %v3402_v40 = vmul.f32 -1.442695, %v2685_v0  ;;  %v2643_v15 = vpop.f32.mrb[83].mxu0  ;;  %v3920_v56 = vpop.f32.mrb[67].mxu1  ;;  %v6217_v0 = vld [vmem:[#allocation59_spill] sm:$0xff] }
 0x7c8   :  { %v3403_v10 = vmul.f32 -1.442695, %v2692_v39  ;;  %v4426_v39 = vld [vmem:[#allocation8 + $0x48] ss:$12 sps:$4 sm:$0xff]   ;;  %v4427_v26 = vld [vmem:[#allocation8 + $0x50] ss:$12 sps:$4 sm:$0xff]  }
 0x7c9   :  { %4303 = vpow2.f32 %v3402_v40  ;;  %v4428_v37 = vld [vmem:[#allocation8 + $0x64] ss:$12 sps:$4 sm:$0xff]   ;;  %v4429_v15 = vld [vmem:[#allocation8 + $0x60] ss:$12 sps:$4 sm:$0xff]   ;;  %v4430_v56 = vld [vmem:[#allocation8 + $0x68] ss:$12 sps:$4 sm:$0xff]  }
 0x7ca   :  { %4305 = vpow2.f32 %v3403_v10  ;;  %v4431_v10 = vld [vmem:[#allocation8 + $0x7c] ss:$12 sps:$4 sm:$0xff]  }
 0x7d3   :  { %v4304_v60 = vpop.eup %4303 }
 0x7d4   :  { %v2689_v36 = vadd.f32 1.0, %v4304_v60  ;;  %v4306_v53 = vpop.eup %4305 }
 0x7d5   :  { %v2696_v11 = vadd.f32 1.0, %v4306_v53  ;;  %v4432_v53 = vld [vmem:[#allocation8 + $0x78] ss:$12 sps:$4 sm:$0xff]  }
 0x7d6   :  { %4307 = vrcp.f32 %v2689_v36 }
 0x7d7   :  { %4309 = vrcp.f32 %v2696_v11  ;;  %v4433_v11 = vld [vmem:[#allocation8 + $0x80] ss:$12 sps:$4 sm:$0xff]  }
 0x7e0   :  { %v4308_v41 = vpop.eup %4307 }
 0x7e1   :  { %v2700_v25 = vmul.f32 %v4308_v41, %v2699_v63  ;;  %v4310_v51 = vpop.eup %4309 }
 0x7e2   :  { %v2703_v29 = vsub.f32 1.0, %v4310_v51  ;;  %v2705_v3 = vmul.f32 %v4310_v51, %v5858_v18  ;;  %v4171_v51 = vld [vmem:[#allocation9 + $0x20] sm:$0xff]  }
 0x7e3   :  { %v2701_v12 = vadd.f32 %v2700_v25, %v6212_v19  ;;  %v4434_v25 = vld [vmem:[#allocation8 + $0x94] ss:$12 sps:$4 sm:$0xff]  }
 0x7e4   :  { %v2749_v31 = vpop.f32.mrb[84].mxu0  ;;  %v2790_v4 = vpop.f32.mrb[68].mxu1 }
 0x7e5   :  { %4311 = vtanh.f32 %v2701_v12  ;;  %v2796_v44 = vadd.f32 %v2749_v31, %v6213_v54  ;;  %v2751_v57 = vpop.f32.mrb[85].mxu0  ;;  %v3939_v1 = vpop.f32.mrb[69].mxu1  ;;  %v2810_v18 = vadd.f32 %v5773_v28, %v2790_v4  ;;  %v4435_v12 = vld [vmem:[#allocation8 + $0x90] ss:$12 sps:$4 sm:$0xff]   ;;  %v4436_v31 = vld [vmem:[#allocation8 + $0x98] ss:$12 sps:$4 sm:$0xff]  }
 0x7e6   :  { %v2803_v23 = vadd.f32 %v2751_v57, %v6214_v22  ;;  %v2753_v34 = vpop.f32.mrb[86].mxu0  ;;  %v2793_v33 = vpop.f32.mrb[70].mxu1  ;;  %v4437_v4 = vld [vmem:[#allocation8 + $0xac] ss:$12 sps:$4 sm:$0xff]   ;;  %v6218_v54 = vld [vmem:[#allocation21_spill] sm:$0xff]  ;;  %v6219_v57 = vld [vmem:[#allocation15_spill] sm:$0xff] }
 0x7e7   :  { %v3404_v30 = vmul.f32 -1.442695, %v2796_v44  ;;  %v2754_v38 = vpop.f32.mrb[87].mxu0  ;;  %v3940_v13 = vpop.f32.mrb[71].mxu1  ;;  %v2819_v1 = vmul.f32 %v5899_v35, %v6219_v57  ;;  %v4439_v34 = vld [vmem:[#allocation8 + $0xb0] ss:$12 sps:$4 sm:$0xff]  }
 0x7e8   :  { %v3405_v8 = vmul.f32 -1.442695, %v2803_v23  ;;  %v4438_v23 = vld [vmem:[#allocation8 + $0xa8] ss:$12 sps:$4 sm:$0xff]   ;;  %v4170_v13 = vld [vmem:[#allocation9 + $0x18] sm:$0xff]  }
 0x7e9   :  { %4313 = vpow2.f32 %v3404_v30  ;;  %v4168_v30 = vld [vmem:[#allocation9 + $0x8] sm:$0xff]   ;;  %v4169_v38 = vld [vmem:[#allocation9 + $0x10] sm:$0xff]  }
 0x7ea   :  { %4315 = vpow2.f32 %v3405_v8  ;;  %v4172_v8 = vld [vmem:[#allocation9 + $0x28] sm:$0xff]  }
 0x7ef   :  { %v4312_v24 = vpop.eup %4311 }
 0x7f0   :  { %v2704_v27 = vmul.f32 %v4312_v24, %v2703_v29  ;;  %v4173_v29 = vld [vmem:[#allocation9 + $0x30] sm:$0xff]   ;;  %v4174_v24 = vld [vmem:[#allocation9 + $0x38] sm:$0xff]  }
 0x7f2   :  { %v2706_v32 = vadd.f32 %v2705_v3, %v2704_v27  ;;  %v4175_v27 = vld [vmem:[#allocation11] sm:$0xff]   ;;  %v4176_v3 = vld [vmem:[#allocation11 + $0x8] sm:$0xff]  }
 0x7f3   :  { %v4314_v61 = vpop.eup %4313 }
 0x7f4   :  { %v2800_v43 = vadd.f32 1.0, %v4314_v61  ;;  %v2707_v49 = vmul.f32 %v2706_v32, %v6215_v48  ;;  %v4316_v5 = vpop.eup %4315  ;;  %v4177_v32 = vld [vmem:[#allocation11 + $0x10] sm:$0xff]   ;;  %v4178_v61 = vld [vmem:[#allocation11 + $0x18] sm:$0xff]   ;;  %v4180_v48 = vld [vmem:[#allocation11 + $0x28] sm:$0xff]  }
 0x7f5   :  { %v2807_v59 = vadd.f32 1.0, %v4316_v5  ;;  %v6220_v5 = vld [vmem:[#allocation46_spill] sm:$0xff] }
 0x7f6   :  { %4317 = vrcp.f32 %v2800_v43  ;;  %v5928_v55 = vadd.f32 %v2708_v52, %v2707_v49  ;;  %v4179_v43 = vld [vmem:[#allocation11 + $0x20] sm:$0xff]   ;;  %v4181_v49 = vld [vmem:[#allocation11 + $0x30] sm:$0xff]  }
 0x7f7   :  { %4319 = vrcp.f32 %v2807_v59  ;;  %v6221_v59 = vld [vmem:[#allocation47_spill] sm:$0xff] }
 0x7f8   :  { %v2825_v2 = vpack.c.bf16 %v5928_v55, %v5928_v55 }
 0x7fa   :  { %2859 = vmatmul.mubr.bf16.vlgmr.msra.gmra.mrb[88].mxu0 %v2825_v2  ;;  %3958 = vmatmul.mubr.bf16.vlgmr.msra.gmra.mrb[72].mxu1 %v2825_v2 }
 0x7fb   :  { %2937 = vmatpush1.bf16.msra.mxu0 %v4417_v9  ;;  %3962 = vmatpush3.bf16.msra.mxu1 %v4418_v21 }
 0x7fc   :  { %2938 = vmatprep.subr.bf16.mxu0 %v4419_v58  ;;  %3963 = vmatprep.subr.bf16.mxu1 %v6116_v46 }
 0x7fd   :  { %2968 = vmatprep.mubr.bf16.mxu0 %v6117_v20  ;;  %3977 = vmatprep.mubr.msk.bf16.mxu1 %vm4567_vm4, %v6116_v46  ;;  %v4424_v20 = vld [vmem:[#allocation8 + $0x38] ss:$12 sps:$4 sm:$0xff]  }
 0x7ff   :  { %2939 = vmatpush1.bf16.msra.mxu0 %v4420_v17  ;;  %3964 = vmatpush3.bf16.msra.mxu1 %v4421_v14 }
 0x800   :  { %v4318_v42 = vpop.eup %4317  ;;  %2940 = vmatprep.subr.bf16.mxu0 %v4422_v6  ;;  %3965 = vmatprep.subr.bf16.mxu1 %v6116_v46 }
 0x801   :  { %v2811_v45 = vmul.f32 %v4318_v42, %v2810_v18  ;;  %v4320_v40 = vpop.eup %4319 }
 0x802   :  { %v2814_v60 = vsub.f32 1.0, %v4320_v40  ;;  %v2816_v41 = vmul.f32 %v4320_v40, %v5899_v35  ;;  %v4167_v35 = vld [vmem:[#allocation9] sm:$0xff]  }
 0x803   :  { %v2812_v62 = vadd.f32 %v2811_v45, %v6217_v0  ;;  %2941 = vmatpush1.bf16.msra.mxu0 %v4423_v7  ;;  %3966 = vmatpush3.bf16.msra.mxu1 %v4424_v20 }
 0x804   :  { %2942 = vmatprep.subr.bf16.mxu0 %v4425_v47  ;;  %3967 = vmatprep.subr.bf16.mxu1 %v6116_v46 }
 0x805   :  { %4321 = vtanh.f32 %v2812_v62 }
 0x807   :  { %2943 = vmatpush1.bf16.msra.mxu0 %v4426_v39  ;;  %3968 = vmatpush3.bf16.msra.mxu1 %v4427_v26 }
 0x808   :  { %2944 = vmatprep.subr.bf16.mxu0 %v4428_v37  ;;  %3969 = vmatprep.subr.bf16.mxu1 %v6116_v46  ;;  %v6222_v37 = vld [vmem:[#allocation42_spill] sm:$0xff] }
 0x80b   :  { %2945 = vmatpush1.bf16.msra.mxu0 %v4429_v15  ;;  %3970 = vmatpush3.bf16.msra.mxu1 %v4430_v56 }
 0x80c   :  { %2946 = vmatprep.subr.bf16.mxu0 %v4431_v10  ;;  %3971 = vmatprep.subr.bf16.mxu1 %v6116_v46  ;;  %v6223_v10 = vld [vmem:[#allocation48_spill] sm:$0xff] }
 0x80f   :  { %v4322_v36 = vpop.eup %4321  ;;  %2947 = vmatpush1.bf16.msra.mxu0 %v4432_v53  ;;  %3972 = vmatpush3.bf16.msra.mxu1 %v4433_v11  ;;  %v6224_v11 = vld [vmem:[#allocation49_spill] sm:$0xff] }
 0x810   :  { %v2815_v63 = vmul.f32 %v4322_v36, %v2814_v60  ;;  %2948 = vmatprep.subr.bf16.mxu0 %v4434_v25  ;;  %3973 = vmatprep.subr.bf16.mxu1 %v6116_v46 }
 0x812   :  { %v2817_v19 = vadd.f32 %v2816_v41, %v2815_v63 }
 0x813   :  { %2949 = vmatpush1.bf16.msra.mxu0 %v4435_v12  ;;  %3974 = vmatpush3.bf16.msra.mxu1 %v4436_v31 }
 0x814   :  { %2950 = vmatprep.subr.bf16.mxu0 %v4437_v4  ;;  %3975 = vmatprep.subr.bf16.mxu1 %v6116_v46  ;;  %v2818_v44 = vmul.f32 %v2817_v19, %v6218_v54 }
 0x816   :  { %v5948_v22 = vadd.f32 %v2819_v1, %v2818_v44 }
 0x817   :  { %2951 = vmatpush1.bf16.msra.mxu0 %v4438_v23  ;;  %3976 = vmatpush3.bf16.msra.mxu1 %v4439_v34 }
 0x818   :  { %v2935_v33 = vpack.c.bf16 %v5948_v22, %v5948_v22  ;;  %3981 = vmatprep.subr.bf16.mxu0 %v6116_v46  ;;  %4001 = vmatprep.subr.bf16.mxu1 %v6116_v46 }
 0x81a   :  { %2969 = vmatmul.mubr.bf16.vlgmr.msra.gmra.mrb[92].mxu0 %v2935_v33  ;;  %3978 = vmatmul.mubr.bf16.vlgmr.msra.gmra.mrb[76].mxu1 %v2935_v33 }
 0x81b   :  { %3997 = vmatprep.mubr.msk.bf16.mxu0 %vm4567_vm4, %v6116_v46  ;;  %4017 = vmatprep.mubr.msk.bf16.mxu1 %vm4567_vm4, %v6116_v46 }
 0x81c   :  { %3982 = vmatpush3.bf16.msra.mxu0 %v4167_v35  ;;  %4002 = vmatpush3.bf16.msra.mxu1 %v4175_v27  ;;  %v6225_v35 = vld [vmem:[#allocation71_spill] sm:$0xff] }
 0x81d   :  { %3983 = vmatprep.subr.bf16.mxu0 %v6116_v46  ;;  %4003 = vmatprep.subr.bf16.mxu1 %v6116_v46 }
 0x820   :  { %3984 = vmatpush3.bf16.msra.mxu0 %v4168_v30  ;;  %4004 = vmatpush3.bf16.msra.mxu1 %v4176_v3 }
 0x821   :  { %3985 = vmatprep.subr.bf16.mxu0 %v6116_v46  ;;  %4005 = vmatprep.subr.bf16.mxu1 %v6116_v46 }
 0x824   :  { %3986 = vmatpush3.bf16.msra.mxu0 %v4169_v38  ;;  %4006 = vmatpush3.bf16.msra.mxu1 %v4177_v32  ;;  %v6226_v38 = vld [vmem:[#allocation72_spill] sm:$0xff] }
 0x825   :  { %3987 = vmatprep.subr.bf16.mxu0 %v6116_v46  ;;  %4007 = vmatprep.subr.bf16.mxu1 %v6116_v46 }
 0x828   :  { %3988 = vmatpush3.bf16.msra.mxu0 %v4170_v13  ;;  %4008 = vmatpush3.bf16.msra.mxu1 %v4178_v61  ;;  %v2930_v13 = vmul.f32 %v5928_v55, %v6226_v38  ;;  %v6227_v61 = vld [vmem:[#allocation57_spill] sm:$0xff] }
 0x829   :  { %3989 = vmatprep.subr.bf16.mxu0 %v6116_v46  ;;  %4009 = vmatprep.subr.bf16.mxu1 %v6116_v46 }
 0x82c   :  { %3990 = vmatpush3.bf16.msra.mxu0 %v4171_v51  ;;  %4010 = vmatpush3.bf16.msra.mxu1 %v4179_v43 }
 0x82d   :  { %3991 = vmatprep.subr.bf16.mxu0 %v6116_v46  ;;  %4011 = vmatprep.subr.bf16.mxu1 %v6116_v46 }
 0x830   :  { %3992 = vmatpush3.bf16.msra.mxu0 %v4172_v8  ;;  %4012 = vmatpush3.bf16.msra.mxu1 %v4180_v48 }
 0x831   :  { %3993 = vmatprep.subr.bf16.mxu0 %v6116_v46  ;;  %4013 = vmatprep.subr.bf16.mxu1 %v6116_v46 }
 0x834   :  { %3994 = vmatpush3.bf16.msra.mxu0 %v4173_v29  ;;  %4014 = vmatpush3.bf16.msra.mxu1 %v4181_v49 }
 0x835   :  { %3995 = vmatprep.subr.bf16.mxu0 %v6116_v46  ;;  %4015 = vmatprep.subr.bf16.mxu1 %v6116_v46 }
 0x838   :  { %3996 = vmatpush3.bf16.msra.mxu0 %v4174_v24  ;;  %4016 = vmatpush3.bf16.msra.mxu1 %v4182_v50 }
 0x8cd   :  { %v2860_v52 = vpop.f32.mrb[88].mxu0  ;;  %v2901_v2 = vpop.f32.mrb[72].mxu1 }
 0x8ce   :  { %v2907_v9 = vadd.f32 %v2860_v52, %v6220_v5  ;;  %v2862_v21 = vpop.f32.mrb[89].mxu0  ;;  %v3959_v58 = vpop.f32.mrb[73].mxu1  ;;  %v2921_v47 = vadd.f32 %v5749_v16, %v2901_v2  ;;  %v6228_v5 = vld [vmem:[#allocation69_spill] sm:$0xff] }
 0x8cf   :  { %v2914_v18 = vadd.f32 %v2862_v21, %v6221_v59  ;;  %v2864_v17 = vpop.f32.mrb[90].mxu0  ;;  %v2904_v14 = vpop.f32.mrb[74].mxu1  ;;  %v6229_v21 = vld [vmem:[#allocation70_spill] sm:$0xff] }
 0x8d0   :  { %v3406_v42 = vmul.f32 -1.442695, %v2907_v9  ;;  %v2865_v6 = vpop.f32.mrb[91].mxu0  ;;  %v3960_v45 = vpop.f32.mrb[75].mxu1  ;;  %v3040_v58 = vmul.f32 %v5948_v22, %v6229_v21 }
 0x8d1   :  { %v3407_v0 = vmul.f32 -1.442695, %v2914_v18  ;;  %v3426_v45 = vld [vmem:[%s6006_s12] ss:$0 sm:$0xff] }
 0x8d2   :  { %4323 = vpow2.f32 %v3406_v42 }
 0x8d3   :  { %4325 = vpow2.f32 %v3407_v0 }
 0x8dc   :  { %v4324_v62 = vpop.eup %4323 }
 0x8dd   :  { %v2911_v7 = vadd.f32 1.0, %v4324_v62  ;;  %v4326_v46 = vpop.eup %4325 }
 0x8de   :  { %v2918_v20 = vadd.f32 1.0, %v4326_v46 }
 0x8df   :  { %4327 = vrcp.f32 %v2911_v7 }
 0x8e0   :  { %4329 = vrcp.f32 %v2918_v20 }
 0x8e9   :  { %v4328_v39 = vpop.eup %4327 }
 0x8ea   :  { %v2922_v26 = vmul.f32 %v4328_v39, %v2921_v47  ;;  %v4330_v16 = vpop.eup %4329 }
 0x8eb   :  { %v2925_v54 = vsub.f32 1.0, %v4330_v16  ;;  %v2927_v1 = vmul.f32 %v4330_v16, %v5928_v55 }
 0x8ec   :  { %v2923_v40 = vadd.f32 %v2922_v26, %v6222_v37 }
 0x8ed   :  { %v2970_v15 = vpop.f32.mrb[92].mxu0  ;;  %v3011_v56 = vpop.f32.mrb[76].mxu1 }
 0x8ee   :  { %4331 = vtanh.f32 %v2923_v40  ;;  %v3017_v60 = vadd.f32 %v2970_v15, %v6223_v10  ;;  %v2972_v36 = vpop.f32.mrb[93].mxu0  ;;  %v3979_v53 = vpop.f32.mrb[77].mxu1  ;;  %v3031_v27 = vadd.f32 %v5773_v28, %v3011_v56 }
 0x8ef   :  { %v3024_v63 = vadd.f32 %v2972_v36, %v6224_v11  ;;  %v2974_v41 = vpop.f32.mrb[94].mxu0  ;;  %v3014_v25 = vpop.f32.mrb[78].mxu1 }
 0x8f0   :  { %v3408_v19 = vmul.f32 -1.442695, %v3017_v60  ;;  %v2975_v12 = vpop.f32.mrb[95].mxu0  ;;  %v3980_v31 = vpop.f32.mrb[79].mxu1 }
 0x8f1   :  { %v3409_v4 = vmul.f32 -1.442695, %v3024_v63 }
 0x8f2   :  { %4333 = vpow2.f32 %v3408_v19 }
 0x8f3   :  { %4335 = vpow2.f32 %v3409_v4 }
 0x8f8   :  { %v4332_v44 = vpop.eup %4331 }
 0x8f9   :  { %v2926_v57 = vmul.f32 %v4332_v44, %v2925_v54 }
 0x8fb   :  { %v2928_v23 = vadd.f32 %v2927_v1, %v2926_v57 }
 0x8fc   :  { %v4334_v34 = vpop.eup %4333 }
 0x8fd   :  { %v3021_v33 = vadd.f32 1.0, %v4334_v34  ;;  %v2929_v30 = vmul.f32 %v2928_v23, %v6225_v35  ;;  %v4336_v29 = vpop.eup %4335 }
 0x8fe   :  { %v3028_v24 = vadd.f32 1.0, %v4336_v29 }
 0x8ff   :  { %4337 = vrcp.f32 %v3021_v33  ;;  %v2931_v51 = vadd.f32 %v2930_v13, %v2929_v30 }
 0x900   :  { %4339 = vrcp.f32 %v3028_v24 }
 0x901   :  { %v3075_v8 = vpack.c.bf16 %v2931_v51, %v2931_v51 }
 0x903   :  { %3998 = vmatmul.mubr.bf16.vlgmr.msra.gmra.mrb[96].mxu0 %v3075_v8 }
 0x909   :  { %v4338_v3 = vpop.eup %4337 }
 0x90a   :  { %v3032_v32 = vmul.f32 %v4338_v3, %v3031_v27  ;;  %v4340_v48 = vpop.eup %4339 }
 0x90b   :  { %v3035_v49 = vsub.f32 1.0, %v4340_v48  ;;  %v3037_v55 = vmul.f32 %v4340_v48, %v5948_v22 }
 0x90c   :  { %v3033_v43 = vadd.f32 %v3032_v32, %v6227_v61 }
 0x90e   :  { %4341 = vtanh.f32 %v3033_v43 }
 0x918   :  { %v4342_v50 = vpop.eup %4341 }
 0x919   :  { %v3036_v52 = vmul.f32 %v4342_v50, %v3035_v49 }
 0x91b   :  { %v3038_v2 = vadd.f32 %v3037_v55, %v3036_v52 }
 0x91d   :  { %v3039_v9 = vmul.f32 %v3038_v2, %v6228_v5 }
 0x91f   :  { %v3041_v59 = vadd.f32 %v3040_v58, %v3039_v9 }
 0x921   :  { %v3074_v28 = vpack.c.bf16 %v3041_v59, %v3041_v59 }
 0x923   :  { %4018 = vmatmul.mubr.bf16.vlgmr.msra.gmra.mrb[80].mxu1 %v3074_v28 }
 0x9d6   :  { %v3158_v18 = vpop.f32.mrb[96].mxu0 }
 0x9d7   :  { %v3999_v17 = vpop.f32.mrb[97].mxu0 }
 0x9d8   :  { %v3161_v14 = vpop.f32.mrb[98].mxu0 }
 0x9d9   :  { %v4000_v42 = vpop.f32.mrb[99].mxu0 }
 0x9f6   :  { %v3246_v6 = vpop.f32.mrb[80].mxu1 }
 0x9f7   :  { %v3247_v0 = vadd.f32 %v3246_v6, %v3158_v18  ;;  %v4019_v62 = vpop.f32.mrb[81].mxu1 }
 0x9f8   :  { %v3249_v7 = vpop.f32.mrb[82].mxu1 }
 0x9f9   :  { %v3259_v46 = vadd.f32 %v3426_v45, %v3247_v0  ;;  %v4020_v20 = vpop.f32.mrb[83].mxu1 }
 0x9fb   :  { %3260 = vst [vmem:[%s6007_s13] sm:$0xff] %v3259_v46 }
 0x9fc   :  { %3265 = vsyncpa [#allocation5], 1 }
 0x9fd   :  { %3266 = vsyncpa [#allocation7], 1 }
 0x9fe   :  { %3267 = vsyncpa [#allocation10], 1 }

</bundles_post_ra>
